<compile_context>
chip_gen: v6e
topology: v6e:2x2x1
jax: 0.10.0
libtpu: 0.0.40
codegen_flags: <defaults>
</compile_context>

<pallas_src>
import numpy as np
import jax
import jax.numpy as jnp
from jax.experimental import pallas as pl
from jax.experimental.pallas import tpu as pltpu


def _round_up(x, m):
    return (x + m - 1) // m * m


# ---------------------- fused conv + bias + ReLU + maxpool --------------------

def _make_conv_pool_kernel(num_phases, cout):
    def kernel(x_ref, w_ref, b_ref, o_ref):
        # x_ref: (tm, P*K) packed patches; w_ref: (P*K, P*Cout) block-diagonal
        # weight; one MXU matmul computes the conv pre-activation for every
        # pooling phase at once.
        y = jnp.dot(x_ref[...], w_ref[...], preferred_element_type=jnp.float32)
        m = y[:, 0:cout]
        for p in range(1, num_phases):
            m = jnp.maximum(m, y[:, p * cout:(p + 1) * cout])
        # bias is identical across pool phases and ReLU is monotone, so
        # relu(max_p(conv_p) + b) == maxpool(relu(conv + b)).
        o_ref[...] = jnp.maximum(m + b_ref[...], 0.0).astype(o_ref.dtype)
    return kernel


def conv_relu_pool(x_nhwc, w_bd, bias, *, kh_kw, pool, cin, cout):
    """Conv2d(stride=1, valid) + ReLU + MaxPool2d(kernel=stride=pool, floor)."""
    B, H, W, Cin = x_nhwc.shape
    assert Cin == cin, (Cin, cin)
    KH, KW = kh_kw
    ph, pw = pool
    Ho, Wo = H - KH + 1, W - KW + 1
    Hp, Wp = Ho // ph, Wo // pw
    P = ph * pw                     # pooling phases
    K = KH * KW * Cin               # conv taps per phase
    Mp = B * Hp * Wp                # pooled output positions

    # ---- glue: pack (pool phase, conv tap) pairs onto lanes ------------------
    Hc, Wc = Hp * ph + KH - 1, Wp * pw + KW - 1
    xc = x_nhwc[:, :Hc, :Wc, :]
    taps = []
    for kh in range(KH):
        for kw in range(KW):
            s = xc[:, kh:kh + Hp * ph, kw:kw + Wp * pw, :]
            taps.append(s.reshape(B, Hp, ph, Wp, pw, Cin))
    pat = jnp.stack(taps, axis=5)                      # (B,Hp,ph,Wp,pw,KK,Cin)
    pat = jnp.transpose(pat, (0, 1, 3, 2, 4, 5, 6))    # (B,Hp,Wp,ph,pw,KK,Cin)
    pat = pat.reshape(Mp, P * K)                       # lanes = (dh,dw,kh,kw,ci)

    Mp8 = _round_up(Mp, 8)
    tm = Mp8 if Mp8 <= 256 else 128                    # row tile (mult of 8)
    Mp_pad = _round_up(Mp, tm)
    if Mp_pad != Mp:
        pat = jnp.pad(pat, ((0, Mp_pad - Mp), (0, 0)))

    out = pl.pallas_call(
        _make_conv_pool_kernel(P, cout),
        grid=(Mp_pad // tm,),
        in_specs=[
            pl.BlockSpec((tm, P * K), lambda i: (i, 0)),
            pl.BlockSpec((P * K, P * cout), lambda i: (0, 0)),
            pl.BlockSpec((1, cout), lambda i: (0, 0)),
        ],
        out_specs=pl.BlockSpec((tm, cout), lambda i: (i, 0)),
        out_shape=jax.ShapeDtypeStruct((Mp_pad, cout), jnp.float32),
        compiler_params=pltpu.CompilerParams(
            dimension_semantics=("parallel",)),
    )(pat, w_bd, bias.reshape(1, cout))

    return out[:Mp].reshape(B, Hp, Wp, cout)


# ------------------------------- MLP head kernel ------------------------------

def _mlp_kernel(x_ref, w1_ref, b1_ref, w2_ref, b2_ref, o_ref):
    h = jnp.dot(x_ref[...], w1_ref[...], preferred_element_type=jnp.float32)
    h = h + b1_ref[...]
    o = jnp.dot(h, w2_ref[...], preferred_element_type=jnp.float32)
    o_ref[...] = (o + b2_ref[...]).astype(o_ref.dtype)


def mlp_head(x, w1, b1, w2, b2):
    """(x @ w1 + b1) @ w2 + b2  (no activation, matching the PyTorch module)."""
    B, F = x.shape
    H = w1.shape[1]
    N = w2.shape[1]

    def full(shape):
        return pl.BlockSpec(shape, lambda i: (0,) * len(shape))

    return pl.pallas_call(
        _mlp_kernel,
        grid=(1,),
        in_specs=[full((B, F)), full((F, H)), full((1, H)),
                  full((H, N)), full((1, N))],
        out_specs=full((B, N)),
        out_shape=jax.ShapeDtypeStruct((B, N), jnp.float32),
    )(x, w1, b1.reshape(1, H), w2, b2.reshape(1, N))


# ------------------------------ parameter packing -----------------------------

def _pack_conv_weight(w_torch, pool):
    """(Cout,Cin,KH,KW) torch weight -> block-diag (P*K, P*Cout) matmul weight."""
    Cout, Cin, KH, KW = w_torch.shape
    P = pool[0] * pool[1]
    w_mat = jnp.transpose(w_torch, (2, 3, 1, 0)).reshape(KH * KW * Cin, Cout)
    return jnp.kron(jnp.eye(P, dtype=w_mat.dtype), w_mat)


# --------------------------------- BulBul model --------------------------------

class BulBulPallas:
    def __init__(self, time_axis=200, freq_axis=40, no_classes=10, key=None):
        self.no_classes = no_classes
        t, f = time_axis, freq_axis
        for _ in range(4):
            t = int(np.floor_divide(t - 2, 3))
        for _ in range(2):
            f = int(np.floor_divide(f - 2, 3))
        self.t_out, self.f_out = t, f
        self.fc1_in = 16 * t * f

        if key is None:
            key = jax.random.PRNGKey(0)
        keys = jax.random.split(key, 12)

        def u(k, shape, fan_in):
            bound = 1.0 / np.sqrt(fan_in)
            return jax.random.uniform(k, shape, jnp.float32, -bound, bound)

        self.layer_cfgs = [
            dict(name="c1", kh_kw=(3, 3), pool=(3, 3), cin=1, cout=16),
            dict(name="c2", kh_kw=(3, 3), pool=(3, 3), cin=16, cout=16),
            dict(name="c3", kh_kw=(3, 1), pool=(3, 1), cin=16, cout=16),
            dict(name="c4", kh_kw=(3, 1), pool=(3, 1), cin=16, cout=16),
        ]
        raw = {
            "c1_w": u(keys[0], (16, 1, 3, 3), 9),    "c1_b": u(keys[1], (16,), 9),
            "c2_w": u(keys[2], (16, 16, 3, 3), 144), "c2_b": u(keys[3], (16,), 144),
            "c3_w": u(keys[4], (16, 16, 3, 1), 48),  "c3_b": u(keys[5], (16,), 48),
            "c4_w": u(keys[6], (16, 16, 3, 1), 48),  "c4_b": u(keys[7], (16,), 48),
        }
        params = {
            "fc1_w": u(keys[8], (self.fc1_in, 256), self.fc1_in),
            "fc1_b": u(keys[9], (256,), self.fc1_in),
            "fc2_w": u(keys[10], (256, no_classes), 256),
            "fc2_b": u(keys[11], (no_classes,), 256),
        }
        for cfg in self.layer_cfgs:
            n = cfg["name"]
            params[n + "_wbd"] = _pack_conv_weight(raw[n + "_w"], cfg["pool"])
            params[n + "_b"] = raw[n + "_b"]
        self.params = params
        self._forward_jit = jax.jit(self._forward)

    def _forward(self, params, x_nchw):
        x = jnp.transpose(x_nchw, (0, 2, 3, 1))          # NCHW -> NHWC
        for cfg in self.layer_cfgs:
            n = cfg["name"]
            x = conv_relu_pool(x, params[n + "_wbd"], params[n + "_b"],
                               kh_kw=cfg["kh_kw"], pool=cfg["pool"],
                               cin=cfg["cin"], cout=cfg["cout"])
        B = x.shape[0]
        # flatten in PyTorch NCHW order so fc weights index (C, H, W)
        flat = jnp.transpose(x, (0, 3, 1, 2)).reshape(B, -1)
        assert flat.shape[1] == self.fc1_in, (flat.shape, self.fc1_in)
        return mlp_head(flat, params["fc1_w"], params["fc1_b"],
                        params["fc2_w"], params["fc2_b"])

    def __call__(self, x_nchw):
        return self._forward_jit(self.params, x_nchw)


# ------------------------------------ main -------------------------------------

if __name__ == "__main__":
    TIME, FREQ, NCLS, BATCH = 200, 40, 10, 2
    root = jax.random.PRNGKey(0)
    k_params, k_input = jax.random.split(root)
    model = BulBulPallas(time_axis=TIME, freq_axis=FREQ, no_classes=NCLS,
                         key=k_params)
    x = jax.random.normal(k_input, (BATCH, 1, TIME, FREQ), dtype=jnp.float32)
    out = jax.block_until_ready(model(x))
    assert out.shape == (BATCH, NCLS), out.shape
    assert bool(jnp.all(jnp.isfinite(out)))
    print("KERNEL_OK")
</pallas_src>

<mosaic_0001>
module attributes {stable_mosaic.version = 11 : i64} {
  func.func @kernel(%arg0: i32, %arg1: memref<128x81xf32, #tpu.memory_space<vmem>>, %arg2: memref<81x144xf32, #tpu.memory_space<vmem>>, %arg3: memref<1x16xf32, #tpu.memory_space<vmem>>, %arg4: memref<128x16xf32, #tpu.memory_space<vmem>>) attributes {dimension_semantics = [#tpu.dimension_semantics<parallel>], iteration_bounds = array<i64: 13>, scalar_prefetch = 0 : i64, scratch_operands = 0 : i64, tpu.core_type = #tpu.core_type<tc>, window_params = [{transform_indices = @transform_0, window_bounds = array<i64: 128, 81>}, {pipeline_mode = #tpu.pipeline_mode<synchronous>, transform_indices = @transform_1, window_bounds = array<i64: 81, 144>}, {pipeline_mode = #tpu.pipeline_mode<synchronous>, transform_indices = @transform_2, window_bounds = array<i64: 1, 16>}, {transform_indices = @transform_3, window_bounds = array<i64: 128, 16>}]} {
    %c0 = arith.constant 0 : index
    %c0_0 = arith.constant 0 : index
    %0 = vector.load %arg1[%c0, %c0_0] : memref<128x81xf32, #tpu.memory_space<vmem>>, vector<128x81xf32>
    %c0_1 = arith.constant 0 : index
    %c0_2 = arith.constant 0 : index
    %1 = vector.load %arg2[%c0_1, %c0_2] : memref<81x144xf32, #tpu.memory_space<vmem>>, vector<81x144xf32>
    %cst = arith.constant dense<0.000000e+00> : vector<128x144xf32>
    %2 = tpu.matmul %0, %1, %cst {dimension_numbers = #tpu.dot_dimension_numbers<[1], [0], [0], [1], [0, 0, 1, 1], [], []>} : vector<128x81xf32>, vector<81x144xf32>, vector<128x144xf32> -> vector<128x144xf32>
    %3 = vector.extract_strided_slice %2 {offsets = [0, 0], sizes = [128, 16], strides = [1, 1]} : vector<128x144xf32> to vector<128x16xf32>
    %4 = vector.extract_strided_slice %2 {offsets = [0, 16], sizes = [128, 16], strides = [1, 1]} : vector<128x144xf32> to vector<128x16xf32>
    %5 = arith.maximumf %3, %4 : vector<128x16xf32>
    %6 = vector.extract_strided_slice %2 {offsets = [0, 32], sizes = [128, 16], strides = [1, 1]} : vector<128x144xf32> to vector<128x16xf32>
    %7 = arith.maximumf %5, %6 : vector<128x16xf32>
    %8 = vector.extract_strided_slice %2 {offsets = [0, 48], sizes = [128, 16], strides = [1, 1]} : vector<128x144xf32> to vector<128x16xf32>
    %9 = arith.maximumf %7, %8 : vector<128x16xf32>
    %10 = vector.extract_strided_slice %2 {offsets = [0, 64], sizes = [128, 16], strides = [1, 1]} : vector<128x144xf32> to vector<128x16xf32>
    %11 = arith.maximumf %9, %10 : vector<128x16xf32>
    %12 = vector.extract_strided_slice %2 {offsets = [0, 80], sizes = [128, 16], strides = [1, 1]} : vector<128x144xf32> to vector<128x16xf32>
    %13 = arith.maximumf %11, %12 : vector<128x16xf32>
    %14 = vector.extract_strided_slice %2 {offsets = [0, 96], sizes = [128, 16], strides = [1, 1]} : vector<128x144xf32> to vector<128x16xf32>
    %15 = arith.maximumf %13, %14 : vector<128x16xf32>
    %16 = vector.extract_strided_slice %2 {offsets = [0, 112], sizes = [128, 16], strides = [1, 1]} : vector<128x144xf32> to vector<128x16xf32>
    %17 = arith.maximumf %15, %16 : vector<128x16xf32>
    %18 = vector.extract_strided_slice %2 {offsets = [0, 128], sizes = [128, 16], strides = [1, 1]} : vector<128x144xf32> to vector<128x16xf32>
    %19 = arith.maximumf %17, %18 : vector<128x16xf32>
    %c0_3 = arith.constant 0 : index
    %c0_4 = arith.constant 0 : index
    %20 = vector.load %arg3[%c0_3, %c0_4] : memref<1x16xf32, #tpu.memory_space<vmem>>, vector<1x16xf32>
    %21 = vector.broadcast %20 : vector<1x16xf32> to vector<128x16xf32>
    %22 = arith.addf %19, %21 : vector<128x16xf32>
    %cst_5 = arith.constant 0.000000e+00 : f32
    %23 = vector.broadcast %cst_5 : f32 to vector<128x16xf32>
    %24 = arith.maximumf %22, %23 : vector<128x16xf32>
    %c0_6 = arith.constant 0 : index
    %c0_7 = arith.constant 0 : index
    %25 = vector.load %arg4[%c0_6, %c0_7] : memref<128x16xf32, #tpu.memory_space<vmem>>, vector<128x16xf32>
    tpu.vector_store %arg4[%c0_6, %c0_7], %24 {strides = array<i32>} : memref<128x16xf32, #tpu.memory_space<vmem>>, vector<128x16xf32>,
    return
  }
  func.func @transform_0(%arg0: i32) -> (i32, i32) {
    %c0_i32 = arith.constant 0 : i32
    %c0_i32_0 = arith.constant 0 : i32
    return %arg0, %c0_i32 : i32, i32
  }
  func.func @transform_1(%arg0: i32) -> (i32, i32) {
    %c0_i32 = arith.constant 0 : i32
    %c0_i32_0 = arith.constant 0 : i32
    %c0_i32_1 = arith.constant 0 : i32
    return %c0_i32, %c0_i32_0 : i32, i32
  }
  func.func @transform_2(%arg0: i32) -> (i32, i32) {
    %c0_i32 = arith.constant 0 : i32
    %c0_i32_0 = arith.constant 0 : i32
    %c0_i32_1 = arith.constant 0 : i32
    return %c0_i32, %c0_i32_0 : i32, i32
  }
  func.func @transform_3(%arg0: i32) -> (i32, i32) {
    %c0_i32 = arith.constant 0 : i32
    %c0_i32_0 = arith.constant 0 : i32
    return %arg0, %c0_i32 : i32, i32
  }
}

module attributes {stable_mosaic.version = 11 : i64} {
  func.func @kernel(%arg0: i32, %arg1: memref<128x1296xf32, #tpu.memory_space<vmem>>, %arg2: memref<1296x144xf32, #tpu.memory_space<vmem>>, %arg3: memref<1x16xf32, #tpu.memory_space<vmem>>, %arg4: memref<128x16xf32, #tpu.memory_space<vmem>>) attributes {dimension_semantics = [#tpu.dimension_semantics<parallel>], iteration_bounds = array<i64: 1>, scalar_prefetch = 0 : i64, scratch_operands = 0 : i64, tpu.core_type = #tpu.core_type<tc>, window_params = [{transform_indices = @transform_0, window_bounds = array<i64: 128, 1296>}, {pipeline_mode = #tpu.pipeline_mode<synchronous>, transform_indices = @transform_1, window_bounds = array<i64: 1296, 144>}, {pipeline_mode = #tpu.pipeline_mode<synchronous>, transform_indices = @transform_2, window_bounds = array<i64: 1, 16>}, {transform_indices = @transform_3, window_bounds = array<i64: 128, 16>}]} {
    %c0 = arith.constant 0 : index
    %c0_0 = arith.constant 0 : index
    %0 = vector.load %arg1[%c0, %c0_0] : memref<128x1296xf32, #tpu.memory_space<vmem>>, vector<128x1296xf32>
    %c0_1 = arith.constant 0 : index
    %c0_2 = arith.constant 0 : index
    %1 = vector.load %arg2[%c0_1, %c0_2] : memref<1296x144xf32, #tpu.memory_space<vmem>>, vector<1296x144xf32>
    %cst = arith.constant dense<0.000000e+00> : vector<128x144xf32>
    %2 = tpu.matmul %0, %1, %cst {dimension_numbers = #tpu.dot_dimension_numbers<[1], [0], [0], [1], [0, 0, 1, 1], [], []>} : vector<128x1296xf32>, vector<1296x144xf32>, vector<128x144xf32> -> vector<128x144xf32>
    %3 = vector.extract_strided_slice %2 {offsets = [0, 0], sizes = [128, 16], strides = [1, 1]} : vector<128x144xf32> to vector<128x16xf32>
    %4 = vector.extract_strided_slice %2 {offsets = [0, 16], sizes = [128, 16], strides = [1, 1]} : vector<128x144xf32> to vector<128x16xf32>
    %5 = arith.maximumf %3, %4 : vector<128x16xf32>
    %6 = vector.extract_strided_slice %2 {offsets = [0, 32], sizes = [128, 16], strides = [1, 1]} : vector<128x144xf32> to vector<128x16xf32>
    %7 = arith.maximumf %5, %6 : vector<128x16xf32>
    %8 = vector.extract_strided_slice %2 {offsets = [0, 48], sizes = [128, 16], strides = [1, 1]} : vector<128x144xf32> to vector<128x16xf32>
    %9 = arith.maximumf %7, %8 : vector<128x16xf32>
    %10 = vector.extract_strided_slice %2 {offsets = [0, 64], sizes = [128, 16], strides = [1, 1]} : vector<128x144xf32> to vector<128x16xf32>
    %11 = arith.maximumf %9, %10 : vector<128x16xf32>
    %12 = vector.extract_strided_slice %2 {offsets = [0, 80], sizes = [128, 16], strides = [1, 1]} : vector<128x144xf32> to vector<128x16xf32>
    %13 = arith.maximumf %11, %12 : vector<128x16xf32>
    %14 = vector.extract_strided_slice %2 {offsets = [0, 96], sizes = [128, 16], strides = [1, 1]} : vector<128x144xf32> to vector<128x16xf32>
    %15 = arith.maximumf %13, %14 : vector<128x16xf32>
    %16 = vector.extract_strided_slice %2 {offsets = [0, 112], sizes = [128, 16], strides = [1, 1]} : vector<128x144xf32> to vector<128x16xf32>
    %17 = arith.maximumf %15, %16 : vector<128x16xf32>
    %18 = vector.extract_strided_slice %2 {offsets = [0, 128], sizes = [128, 16], strides = [1, 1]} : vector<128x144xf32> to vector<128x16xf32>
    %19 = arith.maximumf %17, %18 : vector<128x16xf32>
    %c0_3 = arith.constant 0 : index
    %c0_4 = arith.constant 0 : index
    %20 = vector.load %arg3[%c0_3, %c0_4] : memref<1x16xf32, #tpu.memory_space<vmem>>, vector<1x16xf32>
    %21 = vector.broadcast %20 : vector<1x16xf32> to vector<128x16xf32>
    %22 = arith.addf %19, %21 : vector<128x16xf32>
    %cst_5 = arith.constant 0.000000e+00 : f32
    %23 = vector.broadcast %cst_5 : f32 to vector<128x16xf32>
    %24 = arith.maximumf %22, %23 : vector<128x16xf32>
    %c0_6 = arith.constant 0 : index
    %c0_7 = arith.constant 0 : index
    %25 = vector.load %arg4[%c0_6, %c0_7] : memref<128x16xf32, #tpu.memory_space<vmem>>, vector<128x16xf32>
    tpu.vector_store %arg4[%c0_6, %c0_7], %24 {strides = array<i32>} : memref<128x16xf32, #tpu.memory_space<vmem>>, vector<128x16xf32>,
    return
  }
  func.func @transform_0(%arg0: i32) -> (i32, i32) {
    %c0_i32 = arith.constant 0 : i32
    %c0_i32_0 = arith.constant 0 : i32
    return %arg0, %c0_i32 : i32, i32
  }
  func.func @transform_1(%arg0: i32) -> (i32, i32) {
    %c0_i32 = arith.constant 0 : i32
    %c0_i32_0 = arith.constant 0 : i32
    %c0_i32_1 = arith.constant 0 : i32
    return %c0_i32, %c0_i32_0 : i32, i32
  }
  func.func @transform_2(%arg0: i32) -> (i32, i32) {
    %c0_i32 = arith.constant 0 : i32
    %c0_i32_0 = arith.constant 0 : i32
    %c0_i32_1 = arith.constant 0 : i32
    return %c0_i32, %c0_i32_0 : i32, i32
  }
  func.func @transform_3(%arg0: i32) -> (i32, i32) {
    %c0_i32 = arith.constant 0 : i32
    %c0_i32_0 = arith.constant 0 : i32
    return %arg0, %c0_i32 : i32, i32
  }
}

module attributes {stable_mosaic.version = 11 : i64} {
  func.func @kernel(%arg0: i32, %arg1: memref<40x144xf32, #tpu.memory_space<vmem>>, %arg2: memref<144x48xf32, #tpu.memory_space<vmem>>, %arg3: memref<1x16xf32, #tpu.memory_space<vmem>>, %arg4: memref<40x16xf32, #tpu.memory_space<vmem>>) attributes {dimension_semantics = [#tpu.dimension_semantics<parallel>], iteration_bounds = array<i64: 1>, scalar_prefetch = 0 : i64, scratch_operands = 0 : i64, tpu.core_type = #tpu.core_type<tc>, window_params = [{transform_indices = @transform_0, window_bounds = array<i64: 40, 144>}, {pipeline_mode = #tpu.pipeline_mode<synchronous>, transform_indices = @transform_1, window_bounds = array<i64: 144, 48>}, {pipeline_mode = #tpu.pipeline_mode<synchronous>, transform_indices = @transform_2, window_bounds = array<i64: 1, 16>}, {transform_indices = @transform_3, window_bounds = array<i64: 40, 16>}]} {
    %c0 = arith.constant 0 : index
    %c0_0 = arith.constant 0 : index
    %0 = vector.load %arg1[%c0, %c0_0] : memref<40x144xf32, #tpu.memory_space<vmem>>, vector<40x144xf32>
    %c0_1 = arith.constant 0 : index
    %c0_2 = arith.constant 0 : index
    %1 = vector.load %arg2[%c0_1, %c0_2] : memref<144x48xf32, #tpu.memory_space<vmem>>, vector<144x48xf32>
    %cst = arith.constant dense<0.000000e+00> : vector<40x48xf32>
    %2 = tpu.matmul %0, %1, %cst {dimension_numbers = #tpu.dot_dimension_numbers<[1], [0], [0], [1], [0, 0, 1, 1], [], []>} : vector<40x144xf32>, vector<144x48xf32>, vector<40x48xf32> -> vector<40x48xf32>
    %3 = vector.extract_strided_slice %2 {offsets = [0, 0], sizes = [40, 16], strides = [1, 1]} : vector<40x48xf32> to vector<40x16xf32>
    %4 = vector.extract_strided_slice %2 {offsets = [0, 16], sizes = [40, 16], strides = [1, 1]} : vector<40x48xf32> to vector<40x16xf32>
    %5 = arith.maximumf %3, %4 : vector<40x16xf32>
    %6 = vector.extract_strided_slice %2 {offsets = [0, 32], sizes = [40, 16], strides = [1, 1]} : vector<40x48xf32> to vector<40x16xf32>
    %7 = arith.maximumf %5, %6 : vector<40x16xf32>
    %c0_3 = arith.constant 0 : index
    %c0_4 = arith.constant 0 : index
    %8 = vector.load %arg3[%c0_3, %c0_4] : memref<1x16xf32, #tpu.memory_space<vmem>>, vector<1x16xf32>
    %9 = vector.broadcast %8 : vector<1x16xf32> to vector<40x16xf32>
    %10 = arith.addf %7, %9 : vector<40x16xf32>
    %cst_5 = arith.constant 0.000000e+00 : f32
    %11 = vector.broadcast %cst_5 : f32 to vector<40x16xf32>
    %12 = arith.maximumf %10, %11 : vector<40x16xf32>
    %c0_6 = arith.constant 0 : index
    %c0_7 = arith.constant 0 : index
    %13 = vector.load %arg4[%c0_6, %c0_7] : memref<40x16xf32, #tpu.memory_space<vmem>>, vector<40x16xf32>
    tpu.vector_store %arg4[%c0_6, %c0_7], %12 {strides = array<i32>} : memref<40x16xf32, #tpu.memory_space<vmem>>, vector<40x16xf32>,
    return
  }
  func.func @transform_0(%arg0: i32) -> (i32, i32) {
    %c0_i32 = arith.constant 0 : i32
    %c0_i32_0 = arith.constant 0 : i32
    return %arg0, %c0_i32 : i32, i32
  }
  func.func @transform_1(%arg0: i32) -> (i32, i32) {
    %c0_i32 = arith.constant 0 : i32
    %c0_i32_0 = arith.constant 0 : i32
    %c0_i32_1 = arith.constant 0 : i32
    return %c0_i32, %c0_i32_0 : i32, i32
  }
  func.func @transform_2(%arg0: i32) -> (i32, i32) {
    %c0_i32 = arith.constant 0 : i32
    %c0_i32_0 = arith.constant 0 : i32
    %c0_i32_1 = arith.constant 0 : i32
    return %c0_i32, %c0_i32_0 : i32, i32
  }
  func.func @transform_3(%arg0: i32) -> (i32, i32) {
    %c0_i32 = arith.constant 0 : i32
    %c0_i32_0 = arith.constant 0 : i32
    return %arg0, %c0_i32 : i32, i32
  }
}

module attributes {stable_mosaic.version = 11 : i64} {
  func.func @kernel(%arg0: i32, %arg1: memref<8x144xf32, #tpu.memory_space<vmem>>, %arg2: memref<144x48xf32, #tpu.memory_space<vmem>>, %arg3: memref<1x16xf32, #tpu.memory_space<vmem>>, %arg4: memref<8x16xf32, #tpu.memory_space<vmem>>) attributes {dimension_semantics = [#tpu.dimension_semantics<parallel>], iteration_bounds = array<i64: 1>, scalar_prefetch = 0 : i64, scratch_operands = 0 : i64, tpu.core_type = #tpu.core_type<tc>, window_params = [{transform_indices = @transform_0, window_bounds = array<i64: 8, 144>}, {pipeline_mode = #tpu.pipeline_mode<synchronous>, transform_indices = @transform_1, window_bounds = array<i64: 144, 48>}, {pipeline_mode = #tpu.pipeline_mode<synchronous>, transform_indices = @transform_2, window_bounds = array<i64: 1, 16>}, {transform_indices = @transform_3, window_bounds = array<i64: 8, 16>}]} {
    %c0 = arith.constant 0 : index
    %c0_0 = arith.constant 0 : index
    %0 = vector.load %arg1[%c0, %c0_0] : memref<8x144xf32, #tpu.memory_space<vmem>>, vector<8x144xf32>
    %c0_1 = arith.constant 0 : index
    %c0_2 = arith.constant 0 : index
    %1 = vector.load %arg2[%c0_1, %c0_2] : memref<144x48xf32, #tpu.memory_space<vmem>>, vector<144x48xf32>
    %cst = arith.constant dense<0.000000e+00> : vector<8x48xf32>
    %2 = tpu.matmul %0, %1, %cst {dimension_numbers = #tpu.dot_dimension_numbers<[1], [0], [0], [1], [0, 0, 1, 1], [], []>} : vector<8x144xf32>, vector<144x48xf32>, vector<8x48xf32> -> vector<8x48xf32>
    %3 = vector.extract_strided_slice %2 {offsets = [0, 0], sizes = [8, 16], strides = [1, 1]} : vector<8x48xf32> to vector<8x16xf32>
    %4 = vector.extract_strided_slice %2 {offsets = [0, 16], sizes = [8, 16], strides = [1, 1]} : vector<8x48xf32> to vector<8x16xf32>
    %5 = arith.maximumf %3, %4 : vector<8x16xf32>
    %6 = vector.extract_strided_slice %2 {offsets = [0, 32], sizes = [8, 16], strides = [1, 1]} : vector<8x48xf32> to vector<8x16xf32>
    %7 = arith.maximumf %5, %6 : vector<8x16xf32>
    %c0_3 = arith.constant 0 : index
    %c0_4 = arith.constant 0 : index
    %8 = vector.load %arg3[%c0_3, %c0_4] : memref<1x16xf32, #tpu.memory_space<vmem>>, vector<1x16xf32>
    %9 = vector.broadcast %8 : vector<1x16xf32> to vector<8x16xf32>
    %10 = arith.addf %7, %9 : vector<8x16xf32>
    %cst_5 = arith.constant 0.000000e+00 : f32
    %11 = vector.broadcast %cst_5 : f32 to vector<8x16xf32>
    %12 = arith.maximumf %10, %11 : vector<8x16xf32>
    %c0_6 = arith.constant 0 : index
    %c0_7 = arith.constant 0 : index
    %13 = vector.load %arg4[%c0_6, %c0_7] : memref<8x16xf32, #tpu.memory_space<vmem>>, vector<8x16xf32>
    tpu.vector_store %arg4[%c0_6, %c0_7], %12 {strides = array<i32>} : memref<8x16xf32, #tpu.memory_space<vmem>>, vector<8x16xf32>,
    return
  }
  func.func @transform_0(%arg0: i32) -> (i32, i32) {
    %c0_i32 = arith.constant 0 : i32
    %c0_i32_0 = arith.constant 0 : i32
    return %arg0, %c0_i32 : i32, i32
  }
  func.func @transform_1(%arg0: i32) -> (i32, i32) {
    %c0_i32 = arith.constant 0 : i32
    %c0_i32_0 = arith.constant 0 : i32
    %c0_i32_1 = arith.constant 0 : i32
    return %c0_i32, %c0_i32_0 : i32, i32
  }
  func.func @transform_2(%arg0: i32) -> (i32, i32) {
    %c0_i32 = arith.constant 0 : i32
    %c0_i32_0 = arith.constant 0 : i32
    %c0_i32_1 = arith.constant 0 : i32
    return %c0_i32, %c0_i32_0 : i32, i32
  }
  func.func @transform_3(%arg0: i32) -> (i32, i32) {
    %c0_i32 = arith.constant 0 : i32
    %c0_i32_0 = arith.constant 0 : i32
    return %arg0, %c0_i32 : i32, i32
  }
}

module attributes {stable_mosaic.version = 11 : i64} {
  func.func @_mlp_kernel(%arg0: i32, %arg1: memref<2x48xf32, #tpu.memory_space<vmem>>, %arg2: memref<48x256xf32, #tpu.memory_space<vmem>>, %arg3: memref<1x256xf32, #tpu.memory_space<vmem>>, %arg4: memref<256x10xf32, #tpu.memory_space<vmem>>, %arg5: memref<1x10xf32, #tpu.memory_space<vmem>>, %arg6: memref<2x10xf32, #tpu.memory_space<vmem>>) attributes {dimension_semantics = [#tpu.dimension_semantics<arbitrary>], iteration_bounds = array<i64: 1>, scalar_prefetch = 0 : i64, scratch_operands = 0 : i64, tpu.core_type = #tpu.core_type<tc>, window_params = [{pipeline_mode = #tpu.pipeline_mode<synchronous>, transform_indices = @transform_0, window_bounds = array<i64: 2, 48>}, {pipeline_mode = #tpu.pipeline_mode<synchronous>, transform_indices = @transform_1, window_bounds = array<i64: 48, 256>}, {pipeline_mode = #tpu.pipeline_mode<synchronous>, transform_indices = @transform_2, window_bounds = array<i64: 1, 256>}, {pipeline_mode = #tpu.pipeline_mode<synchronous>, transform_indices = @transform_3, window_bounds = array<i64: 256, 10>}, {pipeline_mode = #tpu.pipeline_mode<synchronous>, transform_indices = @transform_4, window_bounds = array<i64: 1, 10>}, {pipeline_mode = #tpu.pipeline_mode<synchronous>, transform_indices = @transform_5, window_bounds = array<i64: 2, 10>}]} {
    %c0 = arith.constant 0 : index
    %c0_0 = arith.constant 0 : index
    %0 = vector.load %arg1[%c0, %c0_0] : memref<2x48xf32, #tpu.memory_space<vmem>>, vector<2x48xf32>
    %c0_1 = arith.constant 0 : index
    %c0_2 = arith.constant 0 : index
    %1 = vector.load %arg2[%c0_1, %c0_2] : memref<48x256xf32, #tpu.memory_space<vmem>>, vector<48x256xf32>
    %cst = arith.constant dense<0.000000e+00> : vector<2x256xf32>
    %2 = tpu.matmul %0, %1, %cst {dimension_numbers = #tpu.dot_dimension_numbers<[1], [0], [0], [1], [0, 0, 1, 1], [], []>} : vector<2x48xf32>, vector<48x256xf32>, vector<2x256xf32> -> vector<2x256xf32>
    %c0_3 = arith.constant 0 : index
    %c0_4 = arith.constant 0 : index
    %3 = vector.load %arg3[%c0_3, %c0_4] : memref<1x256xf32, #tpu.memory_space<vmem>>, vector<1x256xf32>
    %4 = vector.broadcast %3 : vector<1x256xf32> to vector<2x256xf32>
    %5 = arith.addf %2, %4 : vector<2x256xf32>
    %c0_5 = arith.constant 0 : index
    %c0_6 = arith.constant 0 : index
    %6 = vector.load %arg4[%c0_5, %c0_6] : memref<256x10xf32, #tpu.memory_space<vmem>>, vector<256x10xf32>
    %cst_7 = arith.constant dense<0.000000e+00> : vector<2x10xf32>
    %7 = tpu.matmul %5, %6, %cst_7 {dimension_numbers = #tpu.dot_dimension_numbers<[1], [0], [0], [1], [0, 0, 1, 1], [], []>} : vector<2x256xf32>, vector<256x10xf32>, vector<2x10xf32> -> vector<2x10xf32>
    %c0_8 = arith.constant 0 : index
    %c0_9 = arith.constant 0 : index
    %8 = vector.load %arg5[%c0_8, %c0_9] : memref<1x10xf32, #tpu.memory_space<vmem>>, vector<1x10xf32>
    %9 = vector.broadcast %8 : vector<1x10xf32> to vector<2x10xf32>
    %10 = arith.addf %7, %9 : vector<2x10xf32>
    %c0_10 = arith.constant 0 : index
    %c0_11 = arith.constant 0 : index
    %11 = vector.load %arg6[%c0_10, %c0_11] : memref<2x10xf32, #tpu.memory_space<vmem>>, vector<2x10xf32>
    tpu.vector_store %arg6[%c0_10, %c0_11], %10 {strides = array<i32>} : memref<2x10xf32, #tpu.memory_space<vmem>>, vector<2x10xf32>,
    return
  }
  func.func @transform_0(%arg0: i32) -> (i32, i32) {
    %c0_i32 = arith.constant 0 : i32
    %c0_i32_0 = arith.constant 0 : i32
    %c0_i32_1 = arith.constant 0 : i32
    return %c0_i32, %c0_i32_0 : i32, i32
  }
  func.func @transform_1(%arg0: i32) -> (i32, i32) {
    %c0_i32 = arith.constant 0 : i32
    %c0_i32_0 = arith.constant 0 : i32
    %c0_i32_1 = arith.constant 0 : i32
    return %c0_i32, %c0_i32_0 : i32, i32
  }
  func.func @transform_2(%arg0: i32) -> (i32, i32) {
    %c0_i32 = arith.constant 0 : i32
    %c0_i32_0 = arith.constant 0 : i32
    %c0_i32_1 = arith.constant 0 : i32
    return %c0_i32, %c0_i32_0 : i32, i32
  }
  func.func @transform_3(%arg0: i32) -> (i32, i32) {
    %c0_i32 = arith.constant 0 : i32
    %c0_i32_0 = arith.constant 0 : i32
    %c0_i32_1 = arith.constant 0 : i32
    return %c0_i32, %c0_i32_0 : i32, i32
  }
  func.func @transform_4(%arg0: i32) -> (i32, i32) {
    %c0_i32 = arith.constant 0 : i32
    %c0_i32_0 = arith.constant 0 : i32
    %c0_i32_1 = arith.constant 0 : i32
    return %c0_i32, %c0_i32_0 : i32, i32
  }
  func.func @transform_5(%arg0: i32) -> (i32, i32) {
    %c0_i32 = arith.constant 0 : i32
    %c0_i32_0 = arith.constant 0 : i32
    %c0_i32_1 = arith.constant 0 : i32
    return %c0_i32, %c0_i32_0 : i32, i32
  }
}

</mosaic_0001>

<bundles_post_ra>
// kernel: _forward.5
= control target key start
LH: loop header
LB: loop body
LE: loop exit
PB: predicated region body
PF: predicated region fallthrough
CT: control target
= control target key end

     0   :  { %s1125_s12 = smov 0   ;;  %s1633_s0 = inlined_call_operand.vmem [shape: f32[1664,81], index: 0, kind: input, shape index: {}]   ;;  %s1634_s1 = inlined_call_operand.vmem [shape: f32[81,144], index: 1, kind: input, shape index: {}]   ;;  %s1635_s2 = inlined_call_operand.vmem [shape: f32[1,16], index: 2, kind: input, shape index: {}]   ;;  %s1636_s3 = inlined_call_operand.vmem [shape: f32[1664,16], index: 3, kind: output, shape index: {}]  }
   0x1 LB: > { %s1021_s13 = sadd.s32 4294967295, %s1095_s12   ;;  %p1025_p0 = scmp.ge.s32.totalorder %s1095_s12, 1  ;;  %s1095_s12 = sphi %s1125_s12, %s13_s12  }
   0x2   : > { %p138_p1 = scmp.lt.s32.totalorder %s1095_s12, 14 }
   0x4   : > { %p139_p2 = pnand %p1025_p0, %p138_p1 }
   0x5   : > { %s1026_s28 = sshll.u32 (!%p139_p2), %s1021_s13, 4  ;;  %s1098_s11 = smov (!%p139_p2), 112  }
   0x6   : > { %142 = sbr.rel (%p139_p2) target bundleno = 576 (0x240), region = 32  ;;  %p163_p3 = scmp.lt.s32.totalorder (!%p139_p2), %s1026_s28, 207 }
   0x7   : > { %s1099_s13 = smov (!%p139_p2), 96   ;;  %s1100_s14 = smov (!%p139_p2), 80  }
   0x8   : > { %s1101_s15 = smov (!%p139_p2), 64   ;;  %s1102_s16 = smov (!%p139_p2), 48  }
   0x9   : > { %s1103_s17 = smov (!%p139_p2), 32   ;;  %s1104_s18 = smov (!%p139_p2), 16  }
   0xb   : > { %v211_v0 = vld [vmem:[%s1634_s1 + $0xa8] sm:$0x1]  ;;  %vm261_vm0 = vcmask 1040384   ;;  %v210_v1 = vld [vmem:[%s1634_s1 + $0xa0] sm:$0x1]  ;;  %v209_v2 = vld [vmem:[%s1634_s1 + $0x98] sm:$0xff] }
   0xc   : > { %1030 = vmatprep.subr.msk.mxu0 %vm261_vm0, %v211_v0  ;;  %1051 = vmatprep.subr.msk.mxu1 %vm261_vm0, %v211_v0  ;;  %v208_v3 = vld [vmem:[%s1634_s1 + $0x90] sm:$0xff]  ;;  %v207_v4 = vld [vmem:[%s1634_s1 + $0x88] sm:$0xff]  ;;  %v206_v5 = vld [vmem:[%s1634_s1 + $0x80] sm:$0xff]  ;;  %s1638_s28 = smov (!%p163_p3, %s1026_s28), 207  ;;  %vm212_vm1 = vcmask 662528   ;;  %v1097_v24 = vmov 0.0  }
   0xd   : > { %1031 = vmatpush1.msk.msra.mxu0 %vm261_vm0, %v210_v1  ;;  %1062 = vmatpush1.msk.msra.mxu1 %vm261_vm0, %v210_v1  ;;  %v205_v6 = vld [vmem:[%s1634_s1 + $0x78] sm:$0xff]  ;;  %v204_v7 = vld [vmem:[%s1634_s1 + $0x70] sm:$0xff]  ;;  %v203_v8 = vld [vmem:[%s1634_s1 + $0x68] sm:$0xff]  ;;  %s1027_s25 = sshll.u32 %s1638_s28, 3  ;;  %vm948_vm2 = vcmask 130048  }
   0xe   : > { %280 = vmatprep.subr.mxu0 %v209_v2  ;;  %1052 = vmatprep.subr.mxu1 %v209_v2  ;;  %v202_v9 = vld [vmem:[%s1634_s1 + $0x60] sm:$0xff]  ;;  %v201_v10 = vld [vmem:[%s1634_s1 + $0x58] sm:$0xff]  ;;  %v200_v11 = vld [vmem:[%s1634_s1 + $0x50] sm:$0xff]  ;;  %s1204_s8 = scalar_lea.vmem %s1633_s0, %s1027_s25  ;;  %s1486_s23 = scalar_lea.vmem %s1636_s3, %s1027_s25 }
   0xf   : > { %281 = vmatpush1.msra.mxu0 %v208_v3  ;;  %1063 = vmatpush1.msra.mxu1 %v208_v3  ;;  %v199_v12 = vld [vmem:[%s1634_s1 + $0x48] sm:$0xff]  ;;  %v198_v13 = vld [vmem:[%s1634_s1 + $0x40] sm:$0xff]  ;;  %v197_v14 = vld [vmem:[%s1634_s1 + $0x38] sm:$0xff] }
  0x10   : > { %282 = vmatprep.subr.mxu0 %v207_v4  ;;  %1053 = vmatprep.subr.mxu1 %v207_v4  ;;  %v196_v15 = vld [vmem:[%s1634_s1 + $0x30] sm:$0xff]  ;;  %v195_v16 = vld [vmem:[%s1634_s1 + $0x28] sm:$0xff]  ;;  %v194_v17 = vld [vmem:[%s1634_s1 + $0x20] sm:$0xff] }
  0x11   : > { %283 = vmatpush1.msra.mxu0 %v206_v5  ;;  %1064 = vmatpush1.msra.mxu1 %v206_v5  ;;  %v193_v18 = vld [vmem:[%s1634_s1 + $0x18] sm:$0xff]  ;;  %v192_v19 = vld [vmem:[%s1634_s1 + $0x10] sm:$0xff]  ;;  %v191_v20 = vld [vmem:[%s1634_s1 + $0x8] sm:$0xff] }
  0x12   : > { %284 = vmatprep.subr.mxu0 %v205_v6  ;;  %1054 = vmatprep.subr.mxu1 %v205_v6  ;;  %v190_v21 = vld [vmem:[%s1634_s1] sm:$0xff]  ;;  %v183_v25 = vld [vmem:[%s1204_s8 + $0x48] sm:$0xff]  ;;  %v176_v27 = vld [vmem:[%s1204_s8 + $0x10] sm:$0xff] }
  0x13   : > { %285 = vmatpush1.msra.mxu0 %v204_v7  ;;  %1065 = vmatpush1.msra.mxu1 %v204_v7  ;;  %v174_v22 = vld [vmem:[%s1204_s8] sm:$0xff]  ;;  %v175_v26 = vld [vmem:[%s1204_s8 + $0x8] sm:$0xff]  ;;  %v184_v28 = vld [vmem:[%s1204_s8 + $0x50] sm:$0xff] }
  0x14   : > { %286 = vmatprep.subr.mxu0 %v203_v8  ;;  %1055 = vmatprep.subr.mxu1 %v203_v8  ;;  %v182_v23 = vld [vmem:[%s1204_s8 + $0x40] sm:$0xff]  ;;  %v177_v29 = vld [vmem:[%s1204_s8 + $0x18] sm:$0xff]  ;;  %v179_v33 = vld [vmem:[%s1204_s8 + $0x28] sm:$0xff] }
  0x15   : > { %287 = vmatpush1.msra.mxu0 %v202_v9  ;;  %1066 = vmatpush1.msra.mxu1 %v202_v9  ;;  %v185_v30 = vld [vmem:[%s1204_s8 + $0x58] sm:$0xff]  ;;  %v178_v31 = vld [vmem:[%s1204_s8 + $0x20] sm:$0xff]  ;;  %v187_v34 = vld [vmem:[%s1204_s8 + $0x68] sm:$0xff] }
  0x16   : > { %288 = vmatprep.subr.mxu0 %v201_v10  ;;  %1056 = vmatprep.subr.mxu1 %v201_v10  ;;  %v186_v32 = vld [vmem:[%s1204_s8 + $0x60] sm:$0xff]  ;;  %v180_v35 = vld [vmem:[%s1204_s8 + $0x30] sm:$0xff]  ;;  %v181_v37 = vld [vmem:[%s1204_s8 + $0x38] sm:$0xff] }
  0x17   : > { %289 = vmatpush1.msra.mxu0 %v200_v11  ;;  %1067 = vmatpush1.msra.mxu1 %v200_v11  ;;  %v188_v36 = vld [vmem:[%s1204_s8 + $0x70] sm:$0xff]  ;;  %v189_v38 = vld [vmem:[%s1204_s8 + $0x78] sm:$0xff] }
  0x18   : > { %290 = vmatprep.subr.mxu0 %v199_v12  ;;  %1057 = vmatprep.subr.mxu1 %v199_v12 }
  0x19   : > { %291 = vmatpush1.msra.mxu0 %v198_v13  ;;  %1068 = vmatpush1.msra.mxu1 %v198_v13 }
  0x1a   : > { %292 = vmatprep.subr.mxu0 %v197_v14  ;;  %1058 = vmatprep.subr.mxu1 %v197_v14 }
  0x1b   : > { %293 = vmatpush1.msra.mxu0 %v196_v15  ;;  %1069 = vmatpush1.msra.mxu1 %v196_v15 }
  0x1c   : > { %294 = vmatprep.subr.mxu0 %v195_v16  ;;  %1059 = vmatprep.subr.mxu1 %v195_v16 }
  0x1d   : > { %295 = vmatpush1.msra.mxu0 %v194_v17  ;;  %1070 = vmatpush1.msra.mxu1 %v194_v17 }
  0x1e   : > { %296 = vmatprep.subr.mxu0 %v193_v18  ;;  %1060 = vmatprep.subr.mxu1 %v193_v18 }
  0x1f   : > { %297 = vmatpush1.msra.mxu0 %v192_v19  ;;  %1071 = vmatpush1.msra.mxu1 %v192_v19 }
  0x20   : > { %298 = vmatprep.subr.mxu0 %v191_v20  ;;  %1061 = vmatprep.subr.mxu1 %v191_v20 }
  0x21   : > { %299 = vmatpush1.msra.mxu0 %v190_v21  ;;  %1072 = vmatpush1.msra.mxu1 %v190_v21 }
  0x22   : > { %332 = vmatprep.mubr.f32.mxu0 %v1097_v24  ;;  %380 = vmatprep.mubr.f32.mxu1 %v1097_v24 }
  0x23   : > { %1032 = vmatmul.mubr.msk.f32.vlgmr.msra.gmra.mxu0 %vm212_vm1, %v174_v22  ;;  %1040 = vmatmul.mubr.msk.f32.vlgmr.msra.gmra.mxu1 %vm212_vm1, %v182_v23 }
  0x24   : > { %386 = vmatprep.mubr.f32.mxu1 %v1097_v24  ;;  %338 = vmatprep.mubr.f32.mxu0 %v1097_v24 }
  0x27   : > { %1041 = vmatmul.mubr.msk.f32.gmra.mxu1 %vm212_vm1, %v183_v25  ;;  %1033 = vmatmul.mubr.msk.f32.gmra.mxu0 %vm212_vm1, %v175_v26 }
  0x28   : > { %344 = vmatprep.mubr.f32.mxu0 %v1097_v24  ;;  %392 = vmatprep.mubr.f32.mxu1 %v1097_v24 }
  0x2b   : > { %1034 = vmatmul.mubr.msk.f32.gmra.mxu0 %vm212_vm1, %v176_v27  ;;  %1042 = vmatmul.mubr.msk.f32.gmra.mxu1 %vm212_vm1, %v184_v28 }
  0x2c   : > { %350 = vmatprep.mubr.f32.mxu0 %v1097_v24  ;;  %398 = vmatprep.mubr.f32.mxu1 %v1097_v24 }
  0x2f   : > { %1035 = vmatmul.mubr.msk.f32.gmra.mxu0 %vm212_vm1, %v177_v29  ;;  %1043 = vmatmul.mubr.msk.f32.gmra.mxu1 %vm212_vm1, %v185_v30 }
  0x30   : > { %356 = vmatprep.mubr.f32.mxu0 %v1097_v24  ;;  %404 = vmatprep.mubr.f32.mxu1 %v1097_v24 }
  0x33   : > { %1036 = vmatmul.mubr.msk.f32.gmra.mxu0 %vm212_vm1, %v178_v31  ;;  %1044 = vmatmul.mubr.msk.f32.gmra.mxu1 %vm212_vm1, %v186_v32 }
  0x34   : > { %362 = vmatprep.mubr.f32.mxu0 %v1097_v24  ;;  %410 = vmatprep.mubr.f32.mxu1 %v1097_v24 }
  0x37   : > { %1037 = vmatmul.mubr.msk.f32.gmra.mxu0 %vm212_vm1, %v179_v33  ;;  %1045 = vmatmul.mubr.msk.f32.gmra.mxu1 %vm212_vm1, %v187_v34 }
  0x38   : > { %368 = vmatprep.mubr.f32.mxu0 %v1097_v24  ;;  %416 = vmatprep.mubr.f32.mxu1 %v1097_v24 }
  0x3b   : > { %1038 = vmatmul.mubr.msk.f32.gmra.mxu0 %vm212_vm1, %v180_v35  ;;  %1046 = vmatmul.mubr.msk.f32.gmra.mxu1 %vm212_vm1, %v188_v36 }
  0x3c   : > { %374 = vmatprep.mubr.f32.mxu0 %v1097_v24  ;;  %422 = vmatprep.mubr.f32.mxu1 %v1097_v24 }
  0x3f   : > { %1039 = vmatmul.mubr.msk.f32.gmra.mxu0 %vm212_vm1, %v181_v37  ;;  %1047 = vmatmul.mubr.msk.f32.gmra.mxu1 %vm212_vm1, %v189_v38 }
  0xe3   : > { %v1241_v39 = vpop.f32.mrf.mxu0  ;;  %v1243_v40 = vpop.f32.mrf.mxu1 }
  0xe4   : > { %445 = vrot.lane.b32.xlu0 %v1241_v39, %s1098_s11 }
  0xe5   : > { %v1247_v41 = vpop.f32.mrf.mxu1  ;;  %v1249_v42 = vpop.f32.mrf.mxu0 }
  0xe7   : > { %v1251_v43 = vpop.f32.mrf.mxu1  ;;  %v1257_v44 = vpop.f32.mrf.mxu0 }
  0xe8   : > { %463 = vrot.lane.b32.xlu1 %v1251_v43, %s1098_s11  ;;  %461 = vrot.lane.b32.xlu0 %v1243_v40, %s1098_s11 }
  0xe9   : > { %v1303_v45 = vpop.f32.mrf.mxu0  ;;  %v1311_v47 = vpop.f32.mrf.mxu1 }
  0xeb   : > { %v1305_v46 = vpop.f32.mrf.mxu0  ;;  %v1315_v49 = vpop.f32.mrf.mxu1 }
  0xec   : > { %509 = vrot.lane.b32.xlu0 %v1241_v39, %s1099_s13  ;;  %511 = vrot.lane.b32.xlu1 %v1257_v44, %s1099_s13 }
  0xed   : > { %v1313_v48 = vpop.f32.mrf.mxu0  ;;  %v1323_v51 = vpop.f32.mrf.mxu1 }
  0xef   : > { %v1321_v50 = vpop.f32.mrf.mxu0  ;;  %v1329_v52 = vpop.f32.mrf.mxu1 }
  0xf0   : > { %525 = vrot.lane.b32.xlu0 %v1243_v40, %s1099_s13  ;;  %527 = vrot.lane.b32.xlu1 %v1251_v43, %s1099_s13 }
  0xf1   : > { %v1375_v53 = vpop.f32.mrf.mxu0  ;;  %v1383_v55 = vpop.f32.mrf.mxu1 }
  0xf3   : > { %v1377_v54 = vpop.f32.mrf.mxu0  ;;  %v1387_v57 = vpop.f32.mrf.mxu1 }
  0xf4   : > { %573 = vrot.lane.b32.xlu0 %v1241_v39, %s1100_s14  ;;  %575 = vrot.lane.b32.xlu1 %v1257_v44, %s1100_s14 }
  0xf5   : > { %v1385_v56 = vpop.f32.mrf.mxu0  ;;  %v1395_v60 = vpop.f32.mrf.mxu1 }
  0xf7   : > { %v1393_v59 = vpop.f32.mrf.mxu0  ;;  %v1401_v63 = vpop.f32.mrf.mxu1 }
  0xf8   : > { %589 = vrot.lane.b32.xlu0 %v1243_v40, %s1100_s14  ;;  %591 = vrot.lane.b32.xlu1 %v1251_v43, %s1100_s14 }
  0xf9   : > { %v1460_v31 = vpop.f32.mrf.mxu0 }
  0xfc   : > { %637 = vrot.lane.b32.xlu0 %v1241_v39, %s1101_s15  ;;  %639 = vrot.lane.b32.xlu1 %v1257_v44, %s1101_s15 }
 0x100   : > { %653 = vrot.lane.b32.xlu0 %v1243_v40, %s1101_s15  ;;  %655 = vrot.lane.b32.xlu1 %v1251_v43, %s1101_s15 }
 0x104   : > { %701 = vrot.lane.b32.xlu0 %v1241_v39, %s1102_s16  ;;  %703 = vrot.lane.b32.xlu1 %v1257_v44, %s1102_s16 }
 0x108   : > { %717 = vrot.lane.b32.xlu0 %v1243_v40, %s1102_s16  ;;  %719 = vrot.lane.b32.xlu1 %v1251_v43, %s1102_s16 }
 0x10c   : > { %765 = vrot.lane.b32.xlu0 %v1241_v39, %s1103_s17  ;;  %767 = vrot.lane.b32.xlu1 %v1257_v44, %s1103_s17 }
 0x110   : > { %781 = vrot.lane.b32.xlu0 %v1243_v40, %s1103_s17  ;;  %783 = vrot.lane.b32.xlu1 %v1251_v43, %s1103_s17 }
 0x114   : > { %829 = vrot.lane.b32.xlu0 %v1241_v39, %s1104_s18  ;;  %831 = vrot.lane.b32.xlu1 %v1257_v44, %s1104_s18 }
 0x118   : > { %845 = vrot.lane.b32.xlu0 %v1243_v40, %s1104_s18  ;;  %847 = vrot.lane.b32.xlu1 %v1251_v43, %s1104_s18 }
 0x11c   : > { %447 = vrot.lane.b32.xlu0 %v1257_v44, %s1098_s11  ;;  %449 = vrot.lane.b32.xlu1 %v1305_v46, %s1098_s11 }
 0x120   : > { %465 = vrot.lane.b32.xlu0 %v1315_v49, %s1098_s11  ;;  %451 = vrot.lane.b32.xlu1 %v1321_v50, %s1098_s11 }
 0x124   : > { %513 = vrot.lane.b32.xlu0 %v1305_v46, %s1099_s13  ;;  %467 = vrot.lane.b32.xlu1 %v1329_v52, %s1098_s11 }
 0x128   : > { %529 = vrot.lane.b32.xlu0 %v1315_v49, %s1099_s13  ;;  %515 = vrot.lane.b32.xlu1 %v1321_v50, %s1099_s13 }
 0x12c   : > { %577 = vrot.lane.b32.xlu0 %v1305_v46, %s1100_s14  ;;  %531 = vrot.lane.b32.xlu1 %v1329_v52, %s1099_s13 }
 0x130   : > { %593 = vrot.lane.b32.xlu0 %v1315_v49, %s1100_s14  ;;  %579 = vrot.lane.b32.xlu1 %v1321_v50, %s1100_s14 }
 0x134   : > { %641 = vrot.lane.b32.xlu0 %v1305_v46, %s1101_s15  ;;  %595 = vrot.lane.b32.xlu1 %v1329_v52, %s1100_s14 }
 0x138   : > { %657 = vrot.lane.b32.xlu0 %v1315_v49, %s1101_s15  ;;  %643 = vrot.lane.b32.xlu1 %v1321_v50, %s1101_s15 }
 0x13c   : > { %705 = vrot.lane.b32.xlu0 %v1305_v46, %s1102_s16  ;;  %659 = vrot.lane.b32.xlu1 %v1329_v52, %s1101_s15 }
 0x140   : > { %721 = vrot.lane.b32.xlu0 %v1315_v49, %s1102_s16  ;;  %707 = vrot.lane.b32.xlu1 %v1321_v50, %s1102_s16 }
 0x144   : > { %769 = vrot.lane.b32.xlu0 %v1305_v46, %s1103_s17  ;;  %723 = vrot.lane.b32.xlu1 %v1329_v52, %s1102_s16 }
 0x148   : > { %785 = vrot.lane.b32.xlu0 %v1315_v49, %s1103_s17  ;;  %771 = vrot.lane.b32.xlu1 %v1321_v50, %s1103_s17 }
 0x14c   : > { %833 = vrot.lane.b32.xlu0 %v1305_v46, %s1104_s18  ;;  %787 = vrot.lane.b32.xlu1 %v1329_v52, %s1103_s17 }
 0x150   : > { %849 = vrot.lane.b32.xlu0 %v1315_v49, %s1104_s18  ;;  %835 = vrot.lane.b32.xlu1 %v1321_v50, %s1104_s18 }
 0x154   : > { %851 = vrot.lane.b32.xlu1 %v1329_v52, %s1104_s18  ;;  %453 = vrot.lane.b32.xlu0 %v1377_v54, %s1098_s11 }
 0x156   : > { %v446_v58 = vpop.permute.xlu0 %445 }
 0x157   : > { %v493_v16 = vmax.f32 %v1241_v39, %v446_v58  ;;  %v1473_v58 = vpop.f32.mrf.mxu1 }
 0x158   : > { %469 = vrot.lane.b32.xlu0 %v1387_v57, %s1098_s11  ;;  %455 = vrot.lane.b32.xlu1 %v1393_v59, %s1098_s11 }
 0x15a   : > { %v464_v61 = vpop.permute.xlu1 %463  ;;  %v462_v62 = vpop.permute.xlu0 %461 }
 0x15b   : > { %v502_v20 = vmax.f32 %v1251_v43, %v464_v61  ;;  %v501_v21 = vmax.f32 %v1243_v40, %v462_v62  ;;  %v1462_v40 = vpop.f32.mrf.mxu0  ;;  %v1467_v43 = vld [vmem:[%s1635_s2] ss:$0 sm:$0xff] }
 0x15c   : > { %517 = vrot.lane.b32.xlu0 %v1377_v54, %s1099_s13  ;;  %471 = vrot.lane.b32.xlu1 %v1401_v63, %s1098_s11 }
 0x15e   : > { %v510_v0 = vpop.permute.xlu0 %509  ;;  %v1407_v1 = vpop.permute.xlu1 %511 }
 0x15f   : > { %v557_v17 = vmax.f32 %v493_v16, %v510_v0 }
 0x160   : > { %533 = vrot.lane.b32.xlu0 %v1387_v57, %s1099_s13  ;;  %519 = vrot.lane.b32.xlu1 %v1393_v59, %s1099_s13 }
 0x162   : > { %v526_v2 = vpop.permute.xlu0 %525  ;;  %v528_v3 = vpop.permute.xlu1 %527 }
 0x163   : > { %v565_v23 = vmax.f32 %v501_v21, %v526_v2  ;;  %v566_v24 = vmax.f32 %v502_v20, %v528_v3 }
 0x164   : > { %581 = vrot.lane.b32.xlu0 %v1377_v54, %s1100_s14  ;;  %535 = vrot.lane.b32.xlu1 %v1401_v63, %s1099_s13 }
 0x166   : > { %v574_v4 = vpop.permute.xlu0 %573  ;;  %v1417_v5 = vpop.permute.xlu1 %575 }
 0x167   : > { %v621_v22 = vmax.f32 %v557_v17, %v574_v4 }
 0x168   : > { %597 = vrot.lane.b32.xlu0 %v1387_v57, %s1100_s14  ;;  %583 = vrot.lane.b32.xlu1 %v1393_v59, %s1100_s14 }
 0x16a   : > { %v590_v6 = vpop.permute.xlu0 %589  ;;  %v592_v7 = vpop.permute.xlu1 %591 }
 0x16b   : > { %v629_v28 = vmax.f32 %v565_v23, %v590_v6  ;;  %v630_v29 = vmax.f32 %v566_v24, %v592_v7 }
 0x16c   : > { %645 = vrot.lane.b32.xlu0 %v1377_v54, %s1101_s15  ;;  %599 = vrot.lane.b32.xlu1 %v1401_v63, %s1100_s14 }
 0x16e   : > { %v638_v8 = vpop.permute.xlu0 %637  ;;  %v1427_v9 = vpop.permute.xlu1 %639 }
 0x16f   : > { %v685_v25 = vmax.f32 %v621_v22, %v638_v8  ;;  %v1477_v8 = vpop.f32.mrf.mxu0 }
 0x170   : > { %661 = vrot.lane.b32.xlu0 %v1387_v57, %s1101_s15  ;;  %647 = vrot.lane.b32.xlu1 %v1393_v59, %s1101_s15 }
 0x172   : > { %v654_v10 = vpop.permute.xlu0 %653  ;;  %v656_v11 = vpop.permute.xlu1 %655 }
 0x173   : > { %v693_v32 = vmax.f32 %v629_v28, %v654_v10  ;;  %v694_v33 = vmax.f32 %v630_v29, %v656_v11  ;;  %v1479_v10 = vpop.f32.mrf.mxu1 }
 0x174   : > { %709 = vrot.lane.b32.xlu0 %v1377_v54, %s1102_s16  ;;  %663 = vrot.lane.b32.xlu1 %v1401_v63, %s1101_s15 }
 0x175   : > { %v1501_v21 = vpop.f32.mrf.mxu1 }
 0x176   : > { %v702_v12 = vpop.permute.xlu0 %701  ;;  %v1437_v13 = vpop.permute.xlu1 %703 }
 0x177   : > { %v749_v30 = vmax.f32 %v685_v25, %v702_v12  ;;  %v1513_v25 = vpop.f32.mrf.mxu1 }
 0x178   : > { %725 = vrot.lane.b32.xlu0 %v1387_v57, %s1102_s16  ;;  %711 = vrot.lane.b32.xlu1 %v1393_v59, %s1102_s16 }
 0x17a   : > { %v718_v14 = vpop.permute.xlu0 %717  ;;  %v720_v15 = vpop.permute.xlu1 %719 }
 0x17b   : > { %v757_v37 = vmax.f32 %v693_v32, %v718_v14  ;;  %v758_v38 = vmax.f32 %v694_v33, %v720_v15 }
 0x17c   : > { %773 = vrot.lane.b32.xlu0 %v1377_v54, %s1103_s17  ;;  %727 = vrot.lane.b32.xlu1 %v1401_v63, %s1102_s16 }
 0x17e   : > { %v766_v18 = vpop.permute.xlu0 %765  ;;  %v1448_v19 = vpop.permute.xlu1 %767 }
 0x17f   : > { %v813_v34 = vmax.f32 %v749_v30, %v766_v18  ;;  %v1498_v18 = vpop.f32.mrf.mxu0 }
 0x180   : > { %789 = vrot.lane.b32.xlu0 %v1387_v57, %s1103_s17  ;;  %775 = vrot.lane.b32.xlu1 %v1393_v59, %s1103_s17 }
 0x182   : > { %v782_v26 = vpop.permute.xlu0 %781  ;;  %v784_v27 = vpop.permute.xlu1 %783 }
 0x183   : > { %v821_v61 = vmax.f32 %v757_v37, %v782_v26  ;;  %v822_v62 = vmax.f32 %v758_v38, %v784_v27 }
 0x184   : > { %837 = vrot.lane.b32.xlu0 %v1377_v54, %s1104_s18  ;;  %791 = vrot.lane.b32.xlu1 %v1401_v63, %s1103_s17 }
 0x186   : > { %v830_v35 = vpop.permute.xlu0 %829  ;;  %v832_v36 = vpop.permute.xlu1 %831 }
 0x187   : > { %v877_v39 = vmax.f32 %v813_v34, %v830_v35 }
 0x188   : > { %853 = vrot.lane.b32.xlu0 %v1387_v57, %s1104_s18  ;;  %839 = vrot.lane.b32.xlu1 %v1393_v59, %s1104_s18 }
 0x189   : > { %v893_v0 = vmax.f32 %v877_v39, %v1249_v42 }
 0x18a   : > { %v846_v2 = vpop.permute.xlu0 %845  ;;  %v848_v3 = vpop.permute.xlu1 %847 }
 0x18b   : > { %v916_v4 = vadd.f32 %v1467_v43, %v893_v0  ;;  %v885_v6 = vmax.f32 %v821_v61, %v846_v2  ;;  %v886_v7 = vmax.f32 %v822_v62, %v848_v3 }
 0x18c   : > { %855 = vrot.lane.b32.xlu1 %v1401_v63, %s1104_s18  ;;  %457 = vrot.lane.b32.xlu0 %v1462_v40, %s1098_s11 }
 0x18d   : > { %v932_v42 = vmax.f32 %v916_v4, 0.0  ;;  %v901_v11 = vmax.f32 %v885_v6, %v1247_v41  ;;  %v902_v12 = vmax.f32 %v886_v7, %v1311_v47 }
 0x18e   : > { %v448_v14 = vpop.permute.xlu0 %447  ;;  %v450_v15 = vpop.permute.xlu1 %449 }
 0x18f   : > { %949 = vst.msk [vmem:[%s1486_s23] sm:$0xff] %vm948_vm2, %v932_v42  ;;  %v924_v16 = vadd.f32 %v1467_v43, %v901_v11  ;;  %v925_v17 = vadd.f32 %v1467_v43, %v902_v12  ;;  %v494_v20 = vmax.f32 %v1257_v44, %v448_v14  ;;  %v495_v3 = vmax.f32 %v1305_v46, %v450_v15 }
 0x190   : > { %473 = vrot.lane.b32.xlu0 %v1479_v10, %s1098_s11  ;;  %459 = vrot.lane.b32.xlu1 %v1498_v18, %s1098_s11 }
 0x191   : > { %v940_v41 = vmax.f32 %v924_v16, 0.0  ;;  %v941_v47 = vmax.f32 %v925_v17, 0.0  ;;  %v558_v22 = vmax.f32 %v494_v20, %v1407_v1 }
 0x192   : > { %v466_v23 = vpop.permute.xlu0 %465  ;;  %v452_v24 = vpop.permute.xlu1 %451 }
 0x193   : > { %957 = vst.msk [vmem:[%s1486_s23 + $0x40] sm:$0xff] %vm948_vm2, %v940_v41  ;;  %958 = vst.msk [vmem:[%s1486_s23 + $0x48] sm:$0xff] %vm948_vm2, %v941_v47  ;;  %v622_v44 = vmax.f32 %v558_v22, %v1417_v5  ;;  %v503_v42 = vmax.f32 %v1315_v49, %v466_v23  ;;  %v496_v11 = vmax.f32 %v1321_v50, %v452_v24 }
 0x194   : > { %521 = vrot.lane.b32.xlu0 %v1462_v40, %s1099_s13  ;;  %475 = vrot.lane.b32.xlu1 %v1513_v25, %s1098_s11 }
 0x195   : > { %v686_v26 = vmax.f32 %v622_v44, %v1427_v9 }
 0x196   : > { %v514_v27 = vpop.permute.xlu0 %513  ;;  %v468_v1 = vpop.permute.xlu1 %467 }
 0x197   : > { %v750_v28 = vmax.f32 %v686_v26, %v1437_v13  ;;  %v559_v4 = vmax.f32 %v495_v3, %v514_v27  ;;  %v504_v20 = vmax.f32 %v1329_v52, %v468_v1 }
 0x198   : > { %537 = vrot.lane.b32.xlu0 %v1479_v10, %s1099_s13  ;;  %523 = vrot.lane.b32.xlu1 %v1498_v18, %s1099_s13 }
 0x199   : > { %v814_v5 = vmax.f32 %v750_v28, %v1448_v19 }
 0x19a   : > { %v530_v29 = vpop.permute.xlu0 %529  ;;  %v516_v30 = vpop.permute.xlu1 %515 }
 0x19b   : > { %v878_v32 = vmax.f32 %v814_v5, %v832_v36  ;;  %v567_v46 = vmax.f32 %v503_v42, %v530_v29  ;;  %v560_v14 = vmax.f32 %v496_v11, %v516_v30 }
 0x19c   : > { %585 = vrot.lane.b32.xlu0 %v1462_v40, %s1100_s14  ;;  %539 = vrot.lane.b32.xlu1 %v1513_v25, %s1099_s13 }
 0x19d   : > { %v894_v9 = vmax.f32 %v878_v32, %v1303_v45 }
 0x19e   : > { %v578_v13 = vpop.permute.xlu0 %577  ;;  %v532_v33 = vpop.permute.xlu1 %531 }
 0x19f   : > { %v917_v34 = vadd.f32 %v1467_v43, %v894_v9  ;;  %v623_v12 = vmax.f32 %v559_v4, %v578_v13  ;;  %v568_v49 = vmax.f32 %v504_v20, %v532_v33 }
 0x1a0   : > { %601 = vrot.lane.b32.xlu0 %v1479_v10, %s1100_s14  ;;  %587 = vrot.lane.b32.xlu1 %v1498_v18, %s1100_s14 }
 0x1a1   : > { %v933_v19 = vmax.f32 %v917_v34, 0.0 }
 0x1a2   : > { %v594_v35 = vpop.permute.xlu0 %593  ;;  %v580_v36 = vpop.permute.xlu1 %579 }
 0x1a3   : > { %950 = vst.msk [vmem:[%s1486_s23 + $0x8] sm:$0xff] %vm948_vm2, %v933_v19  ;;  %v631_v41 = vmax.f32 %v567_v46, %v594_v35  ;;  %v624_v47 = vmax.f32 %v560_v14, %v580_v36 }
 0x1a4   : > { %649 = vrot.lane.b32.xlu0 %v1462_v40, %s1101_s15  ;;  %603 = vrot.lane.b32.xlu1 %v1513_v25, %s1100_s14 }
 0x1a6   : > { %v642_v45 = vpop.permute.xlu0 %641  ;;  %v596_v37 = vpop.permute.xlu1 %595 }
 0x1a7   : > { %v687_v15 = vmax.f32 %v623_v12, %v642_v45  ;;  %v632_v27 = vmax.f32 %v568_v49, %v596_v37 }
 0x1a8   : > { %665 = vrot.lane.b32.xlu0 %v1479_v10, %s1101_s15  ;;  %651 = vrot.lane.b32.xlu1 %v1498_v18, %s1101_s15 }
 0x1aa   : > { %v658_v38 = vpop.permute.xlu0 %657  ;;  %v644_v39 = vpop.permute.xlu1 %643 }
 0x1ab   : > { %v695_v50 = vmax.f32 %v631_v41, %v658_v38  ;;  %v688_v23 = vmax.f32 %v624_v47, %v644_v39 }
 0x1ac   : > { %713 = vrot.lane.b32.xlu0 %v1462_v40, %s1102_s16  ;;  %667 = vrot.lane.b32.xlu1 %v1513_v25, %s1101_s15 }
 0x1ae   : > { %v706_v61 = vpop.permute.xlu0 %705  ;;  %v660_v62 = vpop.permute.xlu1 %659 }
 0x1af   : > { %v751_v22 = vmax.f32 %v687_v15, %v706_v61  ;;  %v696_v52 = vmax.f32 %v632_v27, %v660_v62 }
 0x1b0   : > { %729 = vrot.lane.b32.xlu0 %v1479_v10, %s1102_s16  ;;  %715 = vrot.lane.b32.xlu1 %v1498_v18, %s1102_s16 }
 0x1b2   : > { %v722_v0 = vpop.permute.xlu0 %721  ;;  %v708_v2 = vpop.permute.xlu1 %707 }
 0x1b3   : > { %v759_v28 = vmax.f32 %v695_v50, %v722_v0  ;;  %v752_v5 = vmax.f32 %v688_v23, %v708_v2 }
 0x1b4   : > { %777 = vrot.lane.b32.xlu0 %v1462_v40, %s1103_s17  ;;  %731 = vrot.lane.b32.xlu1 %v1513_v25, %s1102_s16 }
 0x1b6   : > { %v770_v6 = vpop.permute.xlu0 %769  ;;  %v724_v7 = vpop.permute.xlu1 %723 }
 0x1b7   : > { %v815_v24 = vmax.f32 %v751_v22, %v770_v6  ;;  %v760_v33 = vmax.f32 %v696_v52, %v724_v7 }
 0x1b8   : > { %793 = vrot.lane.b32.xlu0 %v1479_v10, %s1103_s17  ;;  %779 = vrot.lane.b32.xlu1 %v1498_v18, %s1103_s17 }
 0x1ba   : > { %v786_v16 = vpop.permute.xlu0 %785  ;;  %v772_v17 = vpop.permute.xlu1 %771 }
 0x1bb   : > { %v823_v1 = vmax.f32 %v759_v28, %v786_v16  ;;  %v816_v30 = vmax.f32 %v752_v5, %v772_v17 }
 0x1bc   : > { %841 = vrot.lane.b32.xlu0 %v1462_v40, %s1104_s18  ;;  %795 = vrot.lane.b32.xlu1 %v1513_v25, %s1103_s17 }
 0x1be   : > { %v834_v44 = vpop.permute.xlu0 %833  ;;  %v788_v26 = vpop.permute.xlu1 %787 }
 0x1bf   : > { %v879_v29 = vmax.f32 %v815_v24, %v834_v44  ;;  %v824_v45 = vmax.f32 %v760_v33, %v788_v26 }
 0x1c0   : > { %857 = vrot.lane.b32.xlu0 %v1479_v10, %s1104_s18  ;;  %843 = vrot.lane.b32.xlu1 %v1498_v18, %s1104_s18 }
 0x1c1   : > { %v895_v32 = vmax.f32 %v879_v29, %v1313_v48 }
 0x1c2   : > { %v850_v9 = vpop.permute.xlu0 %849  ;;  %v836_v13 = vpop.permute.xlu1 %835 }
 0x1c3   : > { %v918_v34 = vadd.f32 %v1467_v43, %v895_v32  ;;  %v887_v19 = vmax.f32 %v823_v1, %v850_v9  ;;  %v880_v35 = vmax.f32 %v816_v30, %v836_v13 }
 0x1c4   : > { %859 = vrot.lane.b32.xlu1 %v1513_v25, %s1104_s18 }
 0x1c5   : > { %v934_v36 = vmax.f32 %v918_v34, 0.0  ;;  %v903_v37 = vmax.f32 %v887_v19, %v1323_v51  ;;  %v896_v38 = vmax.f32 %v880_v35, %v1375_v53 }
 0x1c6   : > { %v852_v39 = vpop.permute.xlu1 %851  ;;  %v454_v48 = vpop.permute.xlu0 %453 }
 0x1c7   : > { %951 = vst.msk [vmem:[%s1486_s23 + $0x10] sm:$0xff] %vm948_vm2, %v934_v36  ;;  %v926_v61 = vadd.f32 %v1467_v43, %v903_v37  ;;  %v919_v62 = vadd.f32 %v1467_v43, %v896_v38  ;;  %v888_v0 = vmax.f32 %v824_v45, %v852_v39  ;;  %v497_v24 = vmax.f32 %v1377_v54, %v454_v48 }
 0x1c9   : > { %v942_v2 = vmax.f32 %v926_v61, 0.0  ;;  %v935_v3 = vmax.f32 %v919_v62, 0.0  ;;  %v904_v4 = vmax.f32 %v888_v0, %v1383_v55 }
 0x1ca   : > { %v470_v6 = vpop.permute.xlu0 %469  ;;  %v456_v7 = vpop.permute.xlu1 %455 }
 0x1cb   : > { %959 = vst.msk [vmem:[%s1486_s23 + $0x50] sm:$0xff] %vm948_vm2, %v942_v2  ;;  %952 = vst.msk [vmem:[%s1486_s23 + $0x18] sm:$0xff] %vm948_vm2, %v935_v3  ;;  %v927_v51 = vadd.f32 %v1467_v43, %v904_v4  ;;  %v505_v28 = vmax.f32 %v1387_v57, %v470_v6  ;;  %v498_v5 = vmax.f32 %v1393_v59, %v456_v7 }
 0x1cd   : > { %v943_v53 = vmax.f32 %v927_v51, 0.0 }
 0x1ce   : > { %v518_v42 = vpop.permute.xlu0 %517  ;;  %v472_v11 = vpop.permute.xlu1 %471 }
 0x1cf   : > { %960 = vst.msk [vmem:[%s1486_s23 + $0x58] sm:$0xff] %vm948_vm2, %v943_v53  ;;  %v561_v44 = vmax.f32 %v497_v24, %v518_v42  ;;  %v506_v13 = vmax.f32 %v1401_v63, %v472_v11 }
 0x1d2   : > { %v534_v12 = vpop.permute.xlu0 %533  ;;  %v520_v46 = vpop.permute.xlu1 %519 }
 0x1d3   : > { %v569_v52 = vmax.f32 %v505_v28, %v534_v12  ;;  %v562_v1 = vmax.f32 %v498_v5, %v520_v46 }
 0x1d6   : > { %v582_v14 = vpop.permute.xlu0 %581  ;;  %v536_v15 = vpop.permute.xlu1 %535 }
 0x1d7   : > { %v625_v29 = vmax.f32 %v561_v44, %v582_v14  ;;  %v570_v35 = vmax.f32 %v506_v13, %v536_v15 }
 0x1da   : > { %v598_v16 = vpop.permute.xlu0 %597  ;;  %v584_v17 = vpop.permute.xlu1 %583 }
 0x1db   : > { %v633_v33 = vmax.f32 %v569_v52, %v598_v16  ;;  %v626_v34 = vmax.f32 %v562_v1, %v584_v17 }
 0x1de   : > { %v646_v55 = vpop.permute.xlu0 %645  ;;  %v600_v20 = vpop.permute.xlu1 %599 }
 0x1df   : > { %v689_v30 = vmax.f32 %v625_v29, %v646_v55  ;;  %v634_v57 = vmax.f32 %v570_v35, %v600_v20 }
 0x1e2   : > { %v662_v41 = vpop.permute.xlu0 %661  ;;  %v648_v47 = vpop.permute.xlu1 %647 }
 0x1e3   : > { %v697_v54 = vmax.f32 %v633_v33, %v662_v41  ;;  %v690_v36 = vmax.f32 %v626_v34, %v648_v47 }
 0x1e6   : > { %v710_v22 = vpop.permute.xlu0 %709  ;;  %v664_v49 = vpop.permute.xlu1 %663 }
 0x1e7   : > { %v753_v19 = vmax.f32 %v689_v30, %v710_v22  ;;  %v698_v61 = vmax.f32 %v634_v57, %v664_v49 }
 0x1ea   : > { %v726_v50 = vpop.permute.xlu0 %725  ;;  %v712_v23 = vpop.permute.xlu1 %711 }
 0x1eb   : > { %v761_v39 = vmax.f32 %v697_v54, %v726_v50  ;;  %v754_v59 = vmax.f32 %v690_v36, %v712_v23 }
 0x1ee   : > { %v774_v26 = vpop.permute.xlu0 %773  ;;  %v728_v27 = vpop.permute.xlu1 %727 }
 0x1ef   : > { %v817_v45 = vmax.f32 %v753_v19, %v774_v26  ;;  %v762_v4 = vmax.f32 %v698_v61, %v728_v27 }
 0x1f2   : > { %v790_v32 = vpop.permute.xlu0 %789  ;;  %v776_v9 = vpop.permute.xlu1 %775 }
 0x1f3   : > { %v825_v62 = vmax.f32 %v761_v39, %v790_v32  ;;  %v818_v0 = vmax.f32 %v754_v59, %v776_v9 }
 0x1f6   : > { %v838_v37 = vpop.permute.xlu0 %837  ;;  %v792_v38 = vpop.permute.xlu1 %791 }
 0x1f7   : > { %v881_v48 = vmax.f32 %v817_v45, %v838_v37  ;;  %v826_v42 = vmax.f32 %v762_v4, %v792_v38 }
 0x1f9   : > { %v897_v2 = vmax.f32 %v881_v48, %v1385_v56 }
 0x1fa   : > { %v854_v63 = vpop.permute.xlu0 %853  ;;  %v840_v3 = vpop.permute.xlu1 %839 }
 0x1fb   : > { %v920_v6 = vadd.f32 %v1467_v43, %v897_v2  ;;  %v889_v7 = vmax.f32 %v825_v62, %v854_v63  ;;  %v882_v51 = vmax.f32 %v818_v0, %v840_v3 }
 0x1fd   : > { %v936_v53 = vmax.f32 %v920_v6, 0.0  ;;  %v905_v11 = vmax.f32 %v889_v7, %v1395_v60  ;;  %v898_v12 = vmax.f32 %v882_v51, %v1460_v31 }
 0x1fe   : > { %v856_v46 = vpop.permute.xlu1 %855  ;;  %v458_v14 = vpop.permute.xlu0 %457 }
 0x1ff   : > { %953 = vst.msk [vmem:[%s1486_s23 + $0x20] sm:$0xff] %vm948_vm2, %v936_v53  ;;  %v928_v56 = vadd.f32 %v1467_v43, %v905_v11  ;;  %v921_v15 = vadd.f32 %v1467_v43, %v898_v12  ;;  %v890_v16 = vmax.f32 %v826_v42, %v856_v46  ;;  %v499_v9 = vmax.f32 %v1462_v40, %v458_v14 }
 0x201   : > { %v944_v17 = vmax.f32 %v928_v56, 0.0  ;;  %v937_v55 = vmax.f32 %v921_v15, 0.0  ;;  %v906_v20 = vmax.f32 %v890_v16, %v1473_v58  ;;  %v378_v15 = vpop.f32.mrf.mxu0 }
 0x202   : > { %v474_v41 = vpop.permute.xlu0 %473  ;;  %v460_v47 = vpop.permute.xlu1 %459 }
 0x203   : > { %961 = vst.msk [vmem:[%s1486_s23 + $0x60] sm:$0xff] %vm948_vm2, %v944_v17  ;;  %954 = vst.msk [vmem:[%s1486_s23 + $0x28] sm:$0xff] %vm948_vm2, %v937_v55  ;;  %v929_v60 = vadd.f32 %v1467_v43, %v906_v20  ;;  %v507_v19 = vmax.f32 %v1479_v10, %v474_v41  ;;  %v500_v35 = vmax.f32 %v1498_v18, %v460_v47 }
 0x205   : > { %v945_v31 = vmax.f32 %v929_v60, 0.0 }
 0x206   : > { %v522_v22 = vpop.permute.xlu0 %521  ;;  %v476_v49 = vpop.permute.xlu1 %475 }
 0x207   : > { %962 = vst.msk [vmem:[%s1486_s23 + $0x68] sm:$0xff] %vm948_vm2, %v945_v31  ;;  %v563_v13 = vmax.f32 %v499_v9, %v522_v22  ;;  %v508_v39 = vmax.f32 %v1513_v25, %v476_v49  ;;  %v426_v31 = vpop.f32.mrf.mxu1 }
 0x20a   : > { %v538_v50 = vpop.permute.xlu0 %537  ;;  %v524_v23 = vpop.permute.xlu1 %523 }
 0x20b   : > { %v571_v36 = vmax.f32 %v507_v19, %v538_v50  ;;  %v564_v45 = vmax.f32 %v500_v35, %v524_v23 }
 0x20e   : > { %v586_v24 = vpop.permute.xlu0 %585  ;;  %v540_v44 = vpop.permute.xlu1 %539 }
 0x20f   : > { %v627_v54 = vmax.f32 %v563_v13, %v586_v24  ;;  %v572_v62 = vmax.f32 %v508_v39, %v540_v44 }
 0x212   : > { %v602_v26 = vpop.permute.xlu0 %601  ;;  %v588_v27 = vpop.permute.xlu1 %587 }
 0x213   : > { %v635_v59 = vmax.f32 %v571_v36, %v602_v26  ;;  %v628_v48 = vmax.f32 %v564_v45, %v588_v27 }
 0x216   : > { %v650_v58 = vpop.permute.xlu0 %649  ;;  %v604_v28 = vpop.permute.xlu1 %603 }
 0x217   : > { %v691_v37 = vmax.f32 %v627_v54, %v650_v58  ;;  %v636_v10 = vmax.f32 %v572_v62, %v604_v28 }
 0x21a   : > { %v666_v5 = vpop.permute.xlu0 %665  ;;  %v652_v29 = vpop.permute.xlu1 %651 }
 0x21b   : > { %v699_v40 = vmax.f32 %v635_v59, %v666_v5  ;;  %v692_v0 = vmax.f32 %v628_v48, %v652_v29 }
 0x21e   : > { %v714_v52 = vpop.permute.xlu0 %713  ;;  %v668_v1 = vpop.permute.xlu1 %667 }
 0x21f   : > { %v755_v61 = vmax.f32 %v691_v37, %v714_v52  ;;  %v700_v7 = vmax.f32 %v636_v10, %v668_v1 }
 0x222   : > { %v730_v30 = vpop.permute.xlu0 %729  ;;  %v716_v32 = vpop.permute.xlu1 %715 }
 0x223   : > { %v763_v4 = vmax.f32 %v699_v40, %v730_v30  ;;  %v756_v18 = vmax.f32 %v692_v0, %v716_v32 }
 0x226   : > { %v778_v33 = vpop.permute.xlu0 %777  ;;  %v732_v34 = vpop.permute.xlu1 %731 }
 0x227   : > { %v819_v2 = vmax.f32 %v755_v61, %v778_v33  ;;  %v764_v12 = vmax.f32 %v700_v7, %v732_v34 }
 0x22a   : > { %v794_v38 = vpop.permute.xlu0 %793  ;;  %v780_v57 = vpop.permute.xlu1 %779 }
 0x22b   : > { %v827_v51 = vmax.f32 %v763_v4, %v794_v38  ;;  %v820_v53 = vmax.f32 %v756_v18, %v780_v57 }
 0x22e   : > { %v842_v63 = vpop.permute.xlu0 %841  ;;  %v796_v3 = vpop.permute.xlu1 %795 }
 0x22f   : > { %v883_v6 = vmax.f32 %v819_v2, %v842_v63  ;;  %v828_v17 = vmax.f32 %v764_v12, %v796_v3 }
 0x231   : > { %v899_v42 = vmax.f32 %v883_v6, %v1477_v8 }
 0x232   : > { %v858_v25 = vpop.permute.xlu0 %857  ;;  %v844_v11 = vpop.permute.xlu1 %843 }
 0x233   : > { %v922_v46 = vadd.f32 %v1467_v43, %v899_v42  ;;  %v891_v14 = vmax.f32 %v827_v51, %v858_v25  ;;  %v884_v56 = vmax.f32 %v820_v53, %v844_v11 }
 0x235   : > { %v938_v16 = vmax.f32 %v922_v46, 0.0  ;;  %v907_v55 = vmax.f32 %v891_v14, %v1501_v21  ;;  %v900_v20 = vmax.f32 %v884_v56, %v378_v15 }
 0x236   : > { %v860_v41 = vpop.permute.xlu1 %859 }
 0x237   : > { %955 = vst.msk [vmem:[%s1486_s23 + $0x30] sm:$0xff] %vm948_vm2, %v938_v16  ;;  %v930_v8 = vadd.f32 %v1467_v43, %v907_v55  ;;  %v923_v47 = vadd.f32 %v1467_v43, %v900_v20  ;;  %v892_v60 = vmax.f32 %v828_v17, %v860_v41 }
 0x239   : > { %v946_v22 = vmax.f32 %v930_v8, 0.0  ;;  %v939_v49 = vmax.f32 %v923_v47, 0.0  ;;  %v908_v50 = vmax.f32 %v892_v60, %v426_v31 }
 0x23b   : > { %963 = vst.msk [vmem:[%s1486_s23 + $0x70] sm:$0xff] %vm948_vm2, %v946_v22  ;;  %956 = vst.msk [vmem:[%s1486_s23 + $0x38] sm:$0xff] %vm948_vm2, %v939_v49  ;;  %v931_v23 = vadd.f32 %v1467_v43, %v908_v50 }
 0x23d   : > { %v947_v21 = vmax.f32 %v931_v23, 0.0 }
 0x23f   : > { %964 = vst.msk [vmem:[%s1486_s23 + $0x78] sm:$0xff] %vm948_vm2, %v947_v21 }
 0x240 PF: > { %s13_s12 = sadd.s32 1, %s1095_s12  }
 0x241   : > { %p10_p4 = scmp.ge.s32.totalorder %s13_s12, 15  }
 0x243   :  { %12 = sbr.rel (!%p10_p4) target bundleno = 1 (0x1), region = 62 }

// kernel: _forward.6
= control target key start
LH: loop header
LB: loop body
LE: loop exit
PB: predicated region body
PF: predicated region fallthrough
CT: control target
= control target key end

     0   :  { %vm514_vm0 = vcmask 130048   ;;  %s2095_s9 = smov 96   ;;  %s2096_s10 = smov 80   ;;  %s4319_s1 = inlined_call_operand.vmem [shape: f32[1296,144], index: 1, kind: input, shape index: {}]   ;;  %s4320_s0 = inlined_call_operand.vmem [shape: f32[128,1296], index: 0, kind: input, shape index: {}]   ;;  %s4321_s2 = inlined_call_operand.vmem [shape: f32[1,16], index: 2, kind: input, shape index: {}]   ;;  %s4322_s3 = inlined_call_operand.vmem [shape: f32[128,16], index: 3, kind: output, shape index: {}]  }
   0x1   :  { %v221_v0 = vld [vmem:[%s4319_s1 + $0xf8] sm:$0xff]  ;;  %v220_v2 = vld [vmem:[%s4319_s1 + $0xf0] sm:$0xff]  ;;  %v219_v4 = vld [vmem:[%s4319_s1 + $0xe8] sm:$0xff]  ;;  %s2097_s11 = smov 64   ;;  %s2098_s12 = smov 48  }
   0x2   :  { %v285_v1 = vld [vmem:[%s4319_s1 + $0x2f8] sm:$0xff]  ;;  %563 = vmatprep.subr.mxu0 %v221_v0  ;;  %v284_v3 = vld [vmem:[%s4319_s1 + $0x2f0] sm:$0xff]  ;;  %v283_v5 = vld [vmem:[%s4319_s1 + $0x2e8] sm:$0xff]  ;;  %s2099_s13 = smov 32   ;;  %s2100_s14 = smov 16  }
   0x3   :  { %724 = vmatprep.subr.mxu1 %v285_v1  ;;  %564 = vmatpush1.msra.mxu0 %v220_v2  ;;  %v218_v6 = vld [vmem:[%s4319_s1 + $0xe0] sm:$0xff]  ;;  %v217_v8 = vld [vmem:[%s4319_s1 + $0xd8] sm:$0xff]  ;;  %v216_v10 = vld [vmem:[%s4319_s1 + $0xd0] sm:$0xff] }
   0x4   :  { %725 = vmatpush1.msra.mxu1 %v284_v3  ;;  %v282_v7 = vld [vmem:[%s4319_s1 + $0x2e0] sm:$0xff]  ;;  %565 = vmatprep.subr.mxu0 %v219_v4  ;;  %v281_v9 = vld [vmem:[%s4319_s1 + $0x2d8] sm:$0xff]  ;;  %v280_v11 = vld [vmem:[%s4319_s1 + $0x2d0] sm:$0xff] }
   0x5   :  { %726 = vmatprep.subr.mxu1 %v283_v5  ;;  %566 = vmatpush1.msra.mxu0 %v218_v6  ;;  %v215_v12 = vld [vmem:[%s4319_s1 + $0xc8] sm:$0xff]  ;;  %v214_v14 = vld [vmem:[%s4319_s1 + $0xc0] sm:$0xff]  ;;  %v213_v16 = vld [vmem:[%s4319_s1 + $0xb8] sm:$0xff] }
   0x6   :  { %727 = vmatpush1.msra.mxu1 %v282_v7  ;;  %v279_v13 = vld [vmem:[%s4319_s1 + $0x2c8] sm:$0xff]  ;;  %567 = vmatprep.subr.mxu0 %v217_v8  ;;  %v278_v15 = vld [vmem:[%s4319_s1 + $0x2c0] sm:$0xff]  ;;  %v277_v17 = vld [vmem:[%s4319_s1 + $0x2b8] sm:$0xff] }
   0x7   :  { %728 = vmatprep.subr.mxu1 %v281_v9  ;;  %568 = vmatpush1.msra.mxu0 %v216_v10  ;;  %v212_v18 = vld [vmem:[%s4319_s1 + $0xb0] sm:$0xff]  ;;  %v211_v20 = vld [vmem:[%s4319_s1 + $0xa8] sm:$0xff]  ;;  %v210_v22 = vld [vmem:[%s4319_s1 + $0xa0] sm:$0xff] }
   0x8   :  { %729 = vmatpush1.msra.mxu1 %v280_v11  ;;  %569 = vmatprep.subr.mxu0 %v215_v12  ;;  %v276_v19 = vld [vmem:[%s4319_s1 + $0x2b0] sm:$0xff]  ;;  %v275_v21 = vld [vmem:[%s4319_s1 + $0x2a8] sm:$0xff]  ;;  %v274_v23 = vld [vmem:[%s4319_s1 + $0x2a0] sm:$0xff] }
   0x9   :  { %730 = vmatprep.subr.mxu1 %v279_v13  ;;  %570 = vmatpush1.msra.mxu0 %v214_v14  ;;  %v209_v24 = vld [vmem:[%s4319_s1 + $0x98] sm:$0xff]  ;;  %v208_v26 = vld [vmem:[%s4319_s1 + $0x90] sm:$0xff]  ;;  %v207_v28 = vld [vmem:[%s4319_s1 + $0x88] sm:$0xff] }
   0xa   :  { %731 = vmatpush1.msra.mxu1 %v278_v15  ;;  %571 = vmatprep.subr.mxu0 %v213_v16  ;;  %v273_v25 = vld [vmem:[%s4319_s1 + $0x298] sm:$0xff]  ;;  %v272_v27 = vld [vmem:[%s4319_s1 + $0x290] sm:$0xff]  ;;  %v271_v29 = vld [vmem:[%s4319_s1 + $0x288] sm:$0xff] }
   0xb   :  { %732 = vmatprep.subr.mxu1 %v277_v17  ;;  %572 = vmatpush1.msra.mxu0 %v212_v18  ;;  %v206_v30 = vld [vmem:[%s4319_s1 + $0x80] sm:$0xff]  ;;  %v205_v32 = vld [vmem:[%s4319_s1 + $0x78] sm:$0xff]  ;;  %v204_v34 = vld [vmem:[%s4319_s1 + $0x70] sm:$0xff] }
   0xc   :  { %733 = vmatpush1.msra.mxu1 %v276_v19  ;;  %573 = vmatprep.subr.mxu0 %v211_v20  ;;  %v270_v31 = vld [vmem:[%s4319_s1 + $0x280] sm:$0xff]  ;;  %v269_v33 = vld [vmem:[%s4319_s1 + $0x278] sm:$0xff]  ;;  %v268_v35 = vld [vmem:[%s4319_s1 + $0x270] sm:$0xff] }
   0xd   :  { %734 = vmatprep.subr.mxu1 %v275_v21  ;;  %574 = vmatpush1.msra.mxu0 %v210_v22  ;;  %v203_v36 = vld [vmem:[%s4319_s1 + $0x68] sm:$0xff]  ;;  %v202_v38 = vld [vmem:[%s4319_s1 + $0x60] sm:$0xff]  ;;  %v201_v40 = vld [vmem:[%s4319_s1 + $0x58] sm:$0xff] }
   0xe   :  { %735 = vmatpush1.msra.mxu1 %v274_v23  ;;  %575 = vmatprep.subr.mxu0 %v209_v24  ;;  %v267_v37 = vld [vmem:[%s4319_s1 + $0x268] sm:$0xff]  ;;  %v266_v39 = vld [vmem:[%s4319_s1 + $0x260] sm:$0xff]  ;;  %v265_v41 = vld [vmem:[%s4319_s1 + $0x258] sm:$0xff] }
   0xf   :  { %736 = vmatprep.subr.mxu1 %v273_v25  ;;  %576 = vmatpush1.msra.mxu0 %v208_v26  ;;  %v200_v42 = vld [vmem:[%s4319_s1 + $0x50] sm:$0xff]  ;;  %v199_v44 = vld [vmem:[%s4319_s1 + $0x48] sm:$0xff]  ;;  %v198_v46 = vld [vmem:[%s4319_s1 + $0x40] sm:$0xff] }
  0x10   :  { %737 = vmatpush1.msra.mxu1 %v272_v27  ;;  %577 = vmatprep.subr.mxu0 %v207_v28  ;;  %v264_v43 = vld [vmem:[%s4319_s1 + $0x250] sm:$0xff]  ;;  %v263_v45 = vld [vmem:[%s4319_s1 + $0x248] sm:$0xff]  ;;  %v262_v47 = vld [vmem:[%s4319_s1 + $0x240] sm:$0xff] }
  0x11   :  { %738 = vmatprep.subr.mxu1 %v271_v29  ;;  %578 = vmatpush1.msra.mxu0 %v206_v30  ;;  %v197_v48 = vld [vmem:[%s4319_s1 + $0x38] sm:$0xff]  ;;  %v196_v50 = vld [vmem:[%s4319_s1 + $0x30] sm:$0xff]  ;;  %v195_v52 = vld [vmem:[%s4319_s1 + $0x28] sm:$0xff] }
  0x12   :  { %739 = vmatpush1.msra.mxu1 %v270_v31  ;;  %579 = vmatprep.subr.mxu0 %v205_v32  ;;  %v261_v49 = vld [vmem:[%s4319_s1 + $0x238] sm:$0xff]  ;;  %v260_v51 = vld [vmem:[%s4319_s1 + $0x230] sm:$0xff]  ;;  %v259_v53 = vld [vmem:[%s4319_s1 + $0x228] sm:$0xff] }
  0x13   :  { %740 = vmatprep.subr.mxu1 %v269_v33  ;;  %580 = vmatpush1.msra.mxu0 %v204_v34  ;;  %v194_v54 = vld [vmem:[%s4319_s1 + $0x20] sm:$0xff]  ;;  %v193_v56 = vld [vmem:[%s4319_s1 + $0x18] sm:$0xff]  ;;  %v192_v58 = vld [vmem:[%s4319_s1 + $0x10] sm:$0xff] }
  0x14   :  { %741 = vmatpush1.msra.mxu1 %v268_v35  ;;  %581 = vmatprep.subr.mxu0 %v203_v36  ;;  %v258_v55 = vld [vmem:[%s4319_s1 + $0x220] sm:$0xff]  ;;  %v257_v57 = vld [vmem:[%s4319_s1 + $0x218] sm:$0xff]  ;;  %v256_v59 = vld [vmem:[%s4319_s1 + $0x210] sm:$0xff] }
  0x15   :  { %742 = vmatprep.subr.mxu1 %v267_v37  ;;  %582 = vmatpush1.msra.mxu0 %v202_v38  ;;  %v191_v60 = vld [vmem:[%s4319_s1 + $0x8] sm:$0xff]  ;;  %v190_v62 = vld [vmem:[%s4319_s1] sm:$0xff]  ;;  %v253_v0 = vld [vmem:[%s4319_s1 + $0x1f8] sm:$0xff] }
  0x16   :  { %743 = vmatpush1.msra.mxu1 %v266_v39  ;;  %583 = vmatprep.subr.mxu0 %v201_v40  ;;  %v255_v61 = vld [vmem:[%s4319_s1 + $0x208] sm:$0xff]  ;;  %v254_v63 = vld [vmem:[%s4319_s1 + $0x200] sm:$0xff]  ;;  %v317_v1 = vld [vmem:[%s4319_s1 + $0x3f8] sm:$0xff] }
  0x17   :  { %744 = vmatprep.subr.mxu1 %v265_v41  ;;  %584 = vmatpush1.msra.mxu0 %v200_v42  ;;  %v252_v2 = vld [vmem:[%s4319_s1 + $0x1f0] sm:$0xff]  ;;  %v251_v4 = vld [vmem:[%s4319_s1 + $0x1e8] sm:$0xff]  ;;  %v250_v6 = vld [vmem:[%s4319_s1 + $0x1e0] sm:$0xff] }
  0x18   :  { %745 = vmatpush1.msra.mxu1 %v264_v43  ;;  %585 = vmatprep.subr.mxu0 %v199_v44  ;;  %v316_v3 = vld [vmem:[%s4319_s1 + $0x3f0] sm:$0xff]  ;;  %v315_v5 = vld [vmem:[%s4319_s1 + $0x3e8] sm:$0xff]  ;;  %v314_v7 = vld [vmem:[%s4319_s1 + $0x3e0] sm:$0xff] }
  0x19   :  { %746 = vmatprep.subr.mxu1 %v263_v45  ;;  %586 = vmatpush1.msra.mxu0 %v198_v46  ;;  %v249_v8 = vld [vmem:[%s4319_s1 + $0x1d8] sm:$0xff]  ;;  %v248_v10 = vld [vmem:[%s4319_s1 + $0x1d0] sm:$0xff]  ;;  %v247_v12 = vld [vmem:[%s4319_s1 + $0x1c8] sm:$0xff] }
  0x1a   :  { %747 = vmatpush1.msra.mxu1 %v262_v47  ;;  %587 = vmatprep.subr.mxu0 %v197_v48  ;;  %v313_v9 = vld [vmem:[%s4319_s1 + $0x3d8] sm:$0xff]  ;;  %v312_v11 = vld [vmem:[%s4319_s1 + $0x3d0] sm:$0xff]  ;;  %v311_v13 = vld [vmem:[%s4319_s1 + $0x3c8] sm:$0xff] }
  0x1b   :  { %748 = vmatprep.subr.mxu1 %v261_v49  ;;  %588 = vmatpush1.msra.mxu0 %v196_v50  ;;  %v246_v14 = vld [vmem:[%s4319_s1 + $0x1c0] sm:$0xff]  ;;  %v245_v16 = vld [vmem:[%s4319_s1 + $0x1b8] sm:$0xff]  ;;  %v244_v18 = vld [vmem:[%s4319_s1 + $0x1b0] sm:$0xff] }
  0x1c   :  { %749 = vmatpush1.msra.mxu1 %v260_v51  ;;  %589 = vmatprep.subr.mxu0 %v195_v52  ;;  %v310_v15 = vld [vmem:[%s4319_s1 + $0x3c0] sm:$0xff]  ;;  %v309_v17 = vld [vmem:[%s4319_s1 + $0x3b8] sm:$0xff]  ;;  %v308_v19 = vld [vmem:[%s4319_s1 + $0x3b0] sm:$0xff] }
  0x1d   :  { %750 = vmatprep.subr.mxu1 %v259_v53  ;;  %590 = vmatpush1.msra.mxu0 %v194_v54  ;;  %v243_v20 = vld [vmem:[%s4319_s1 + $0x1a8] sm:$0xff]  ;;  %v242_v22 = vld [vmem:[%s4319_s1 + $0x1a0] sm:$0xff]  ;;  %v241_v24 = vld [vmem:[%s4319_s1 + $0x198] sm:$0xff] }
  0x1e   :  { %751 = vmatpush1.msra.mxu1 %v258_v55  ;;  %591 = vmatprep.subr.mxu0 %v193_v56  ;;  %v307_v21 = vld [vmem:[%s4319_s1 + $0x3a8] sm:$0xff]  ;;  %v306_v23 = vld [vmem:[%s4319_s1 + $0x3a0] sm:$0xff]  ;;  %v305_v25 = vld [vmem:[%s4319_s1 + $0x398] sm:$0xff] }
  0x1f   :  { %752 = vmatprep.subr.mxu1 %v257_v57  ;;  %592 = vmatpush1.msra.mxu0 %v192_v58  ;;  %v240_v26 = vld [vmem:[%s4319_s1 + $0x190] sm:$0xff]  ;;  %v239_v28 = vld [vmem:[%s4319_s1 + $0x188] sm:$0xff]  ;;  %v238_v30 = vld [vmem:[%s4319_s1 + $0x180] sm:$0xff] }
  0x20   :  { %753 = vmatpush1.msra.mxu1 %v256_v59  ;;  %593 = vmatprep.subr.mxu0 %v191_v60  ;;  %v304_v27 = vld [vmem:[%s4319_s1 + $0x390] sm:$0xff]  ;;  %v303_v29 = vld [vmem:[%s4319_s1 + $0x388] sm:$0xff]  ;;  %v302_v31 = vld [vmem:[%s4319_s1 + $0x380] sm:$0xff] }
  0x21   :  { %754 = vmatprep.subr.mxu1 %v255_v61  ;;  %594 = vmatpush1.msra.mxu0 %v190_v62  ;;  %v237_v32 = vld [vmem:[%s4319_s1 + $0x178] sm:$0xff]  ;;  %v236_v34 = vld [vmem:[%s4319_s1 + $0x170] sm:$0xff]  ;;  %v235_v36 = vld [vmem:[%s4319_s1 + $0x168] sm:$0xff] }
  0x22   :  { %755 = vmatpush1.msra.mxu1 %v254_v63  ;;  %595 = vmatprep.subr.mxu0 %v253_v0  ;;  %v301_v33 = vld [vmem:[%s4319_s1 + $0x378] sm:$0xff]  ;;  %v300_v35 = vld [vmem:[%s4319_s1 + $0x370] sm:$0xff]  ;;  %v299_v37 = vld [vmem:[%s4319_s1 + $0x368] sm:$0xff] }
  0x23   :  { %756 = vmatprep.subr.mxu1 %v317_v1  ;;  %596 = vmatpush2.msra.mxu0 %v252_v2  ;;  %v234_v38 = vld [vmem:[%s4319_s1 + $0x160] sm:$0xff]  ;;  %v233_v40 = vld [vmem:[%s4319_s1 + $0x158] sm:$0xff]  ;;  %v232_v42 = vld [vmem:[%s4319_s1 + $0x150] sm:$0xff] }
  0x24   :  { %757 = vmatpush2.msra.mxu1 %v316_v3  ;;  %597 = vmatprep.subr.mxu0 %v251_v4  ;;  %v298_v39 = vld [vmem:[%s4319_s1 + $0x360] sm:$0xff]  ;;  %v297_v41 = vld [vmem:[%s4319_s1 + $0x358] sm:$0xff]  ;;  %v296_v43 = vld [vmem:[%s4319_s1 + $0x350] sm:$0xff] }
  0x25   :  { %758 = vmatprep.subr.mxu1 %v315_v5  ;;  %598 = vmatpush2.msra.mxu0 %v250_v6  ;;  %v231_v44 = vld [vmem:[%s4319_s1 + $0x148] sm:$0xff]  ;;  %v230_v46 = vld [vmem:[%s4319_s1 + $0x140] sm:$0xff]  ;;  %v229_v48 = vld [vmem:[%s4319_s1 + $0x138] sm:$0xff] }
  0x26   :  { %759 = vmatpush2.msra.mxu1 %v314_v7  ;;  %599 = vmatprep.subr.mxu0 %v249_v8  ;;  %v295_v45 = vld [vmem:[%s4319_s1 + $0x348] sm:$0xff]  ;;  %v294_v47 = vld [vmem:[%s4319_s1 + $0x340] sm:$0xff]  ;;  %v293_v49 = vld [vmem:[%s4319_s1 + $0x338] sm:$0xff] }
  0x27   :  { %760 = vmatprep.subr.mxu1 %v313_v9  ;;  %600 = vmatpush2.msra.mxu0 %v248_v10  ;;  %v228_v50 = vld [vmem:[%s4319_s1 + $0x130] sm:$0xff]  ;;  %v227_v52 = vld [vmem:[%s4319_s1 + $0x128] sm:$0xff]  ;;  %v226_v54 = vld [vmem:[%s4319_s1 + $0x120] sm:$0xff] }
  0x28   :  { %761 = vmatpush2.msra.mxu1 %v312_v11  ;;  %601 = vmatprep.subr.mxu0 %v247_v12  ;;  %v292_v51 = vld [vmem:[%s4319_s1 + $0x330] sm:$0xff]  ;;  %v291_v53 = vld [vmem:[%s4319_s1 + $0x328] sm:$0xff]  ;;  %v290_v55 = vld [vmem:[%s4319_s1 + $0x320] sm:$0xff] }
  0x29   :  { %762 = vmatprep.subr.mxu1 %v311_v13  ;;  %602 = vmatpush2.msra.mxu0 %v246_v14  ;;  %v225_v56 = vld [vmem:[%s4319_s1 + $0x118] sm:$0xff]  ;;  %v224_v58 = vld [vmem:[%s4319_s1 + $0x110] sm:$0xff]  ;;  %v223_v60 = vld [vmem:[%s4319_s1 + $0x108] sm:$0xff] }
  0x2a   :  { %763 = vmatpush2.msra.mxu1 %v310_v15  ;;  %603 = vmatprep.subr.mxu0 %v245_v16  ;;  %v289_v57 = vld [vmem:[%s4319_s1 + $0x318] sm:$0xff]  ;;  %v288_v59 = vld [vmem:[%s4319_s1 + $0x310] sm:$0xff]  ;;  %v287_v61 = vld [vmem:[%s4319_s1 + $0x308] sm:$0xff] }
  0x2b   :  { %764 = vmatprep.subr.mxu1 %v309_v17  ;;  %604 = vmatpush2.msra.mxu0 %v244_v18  ;;  %v222_v62 = vld [vmem:[%s4319_s1 + $0x100] sm:$0xff]  ;;  %v15_v63 = vld [vmem:[%s4320_s0 + $0x8] sm:$0xff]  ;;  %v17_v1 = vld [vmem:[%s4320_s0 + $0x18] sm:$0xff] }
  0x2c   :  { %765 = vmatpush2.msra.mxu1 %v308_v19  ;;  %605 = vmatprep.subr.mxu0 %v243_v20  ;;  %v286_v0 = vld [vmem:[%s4319_s1 + $0x300] sm:$0xff]  ;;  %v16_v3 = vld [vmem:[%s4320_s0 + $0x10] sm:$0xff]  ;;  %v349_v4 = vld [vmem:[%s4319_s1 + $0x4f8] sm:$0xff] }
  0x2d   :  { %766 = vmatprep.subr.mxu1 %v307_v21  ;;  %606 = vmatpush2.msra.mxu0 %v242_v22  ;;  %v14_v2 = vld [vmem:[%s4320_s0] sm:$0xff]  ;;  %v413_v5 = vld [vmem:[%s4319_s1 + $0x6f8] sm:$0xff]  ;;  %v348_v6 = vld [vmem:[%s4319_s1 + $0x4f0] sm:$0xff] }
  0x2e   :  { %767 = vmatpush2.msra.mxu1 %v306_v23  ;;  %607 = vmatprep.subr.mxu0 %v241_v24  ;;  %v412_v7 = vld [vmem:[%s4319_s1 + $0x6f0] sm:$0xff]  ;;  %v347_v8 = vld [vmem:[%s4319_s1 + $0x4e8] sm:$0xff]  ;;  %v26_v9 = vld [vmem:[%s4320_s0 + $0x60] sm:$0xff] }
  0x2f   :  { %768 = vmatprep.subr.mxu1 %v305_v25  ;;  %608 = vmatpush2.msra.mxu0 %v240_v26  ;;  %v28_v10 = vld [vmem:[%s4320_s0 + $0x70] sm:$0xff]  ;;  %v346_v11 = vld [vmem:[%s4319_s1 + $0x4e0] sm:$0xff]  ;;  %v411_v12 = vld [vmem:[%s4319_s1 + $0x6e8] sm:$0xff] }
  0x30   :  { %769 = vmatpush2.msra.mxu1 %v304_v27  ;;  %609 = vmatprep.subr.mxu0 %v239_v28  ;;  %v25_v13 = vld [vmem:[%s4320_s0 + $0x58] sm:$0xff]  ;;  %v27_v14 = vld [vmem:[%s4320_s0 + $0x68] sm:$0xff]  ;;  %v410_v16 = vld [vmem:[%s4319_s1 + $0x6e0] sm:$0xff] }
  0x31   :  { %770 = vmatprep.subr.mxu1 %v303_v29  ;;  %610 = vmatpush2.msra.mxu0 %v238_v30  ;;  %v345_v15 = vld [vmem:[%s4319_s1 + $0x4d8] sm:$0xff]  ;;  %v344_v17 = vld [vmem:[%s4319_s1 + $0x4d0] sm:$0xff]  ;;  %v343_v19 = vld [vmem:[%s4319_s1 + $0x4c8] sm:$0xff] }
  0x32   :  { %771 = vmatpush2.msra.mxu1 %v302_v31  ;;  %611 = vmatprep.subr.mxu0 %v237_v32  ;;  %v409_v18 = vld [vmem:[%s4319_s1 + $0x6d8] sm:$0xff]  ;;  %v408_v20 = vld [vmem:[%s4319_s1 + $0x6d0] sm:$0xff]  ;;  %v39_v22 = vld [vmem:[%s4320_s0 + $0xc8] sm:$0xff] }
  0x33   :  { %772 = vmatprep.subr.mxu1 %v301_v33  ;;  %612 = vmatpush2.msra.mxu0 %v236_v34  ;;  %v37_v21 = vld [vmem:[%s4320_s0 + $0xb8] sm:$0xff]  ;;  %v342_v23 = vld [vmem:[%s4319_s1 + $0x4c0] sm:$0xff]  ;;  %v407_v24 = vld [vmem:[%s4319_s1 + $0x6c8] sm:$0xff] }
  0x34   :  { %773 = vmatpush2.msra.mxu1 %v300_v35  ;;  %613 = vmatprep.subr.mxu0 %v235_v36  ;;  %v36_v25 = vld [vmem:[%s4320_s0 + $0xb0] sm:$0xff]  ;;  %v38_v26 = vld [vmem:[%s4320_s0 + $0xc0] sm:$0xff]  ;;  %v341_v27 = vld [vmem:[%s4319_s1 + $0x4b8] sm:$0xff] }
  0x35   :  { %774 = vmatprep.subr.mxu1 %v299_v37  ;;  %614 = vmatpush2.msra.mxu0 %v234_v38  ;;  %v406_v28 = vld [vmem:[%s4319_s1 + $0x6c0] sm:$0xff]  ;;  %v340_v29 = vld [vmem:[%s4319_s1 + $0x4b0] sm:$0xff]  ;;  %v405_v30 = vld [vmem:[%s4319_s1 + $0x6b8] sm:$0xff] }
  0x36   :  { %775 = vmatpush2.msra.mxu1 %v298_v39  ;;  %615 = vmatprep.subr.mxu0 %v233_v40  ;;  %v339_v31 = vld [vmem:[%s4319_s1 + $0x4a8] sm:$0xff]  ;;  %v404_v32 = vld [vmem:[%s4319_s1 + $0x6b0] sm:$0xff]  ;;  %v50_v34 = vld [vmem:[%s4320_s0 + $0x120] sm:$0xff] }
  0x37   :  { %776 = vmatprep.subr.mxu1 %v297_v41  ;;  %616 = vmatpush2.msra.mxu0 %v232_v42  ;;  %v48_v33 = vld [vmem:[%s4320_s0 + $0x110] sm:$0xff]  ;;  %v338_v35 = vld [vmem:[%s4319_s1 + $0x4a0] sm:$0xff]  ;;  %v403_v36 = vld [vmem:[%s4319_s1 + $0x6a8] sm:$0xff] }
  0x38   :  { %777 = vmatpush2.msra.mxu1 %v296_v43  ;;  %617 = vmatprep.subr.mxu0 %v231_v44  ;;  %v47_v37 = vld [vmem:[%s4320_s0 + $0x108] sm:$0xff]  ;;  %v49_v38 = vld [vmem:[%s4320_s0 + $0x118] sm:$0xff]  ;;  %v402_v40 = vld [vmem:[%s4319_s1 + $0x6a0] sm:$0xff] }
  0x39   :  { %778 = vmatprep.subr.mxu1 %v295_v45  ;;  %618 = vmatpush2.msra.mxu0 %v230_v46  ;;  %v337_v39 = vld [vmem:[%s4319_s1 + $0x498] sm:$0xff]  ;;  %v336_v41 = vld [vmem:[%s4319_s1 + $0x490] sm:$0xff]  ;;  %v335_v43 = vld [vmem:[%s4319_s1 + $0x488] sm:$0xff] }
  0x3a   :  { %779 = vmatpush2.msra.mxu1 %v294_v47  ;;  %619 = vmatprep.subr.mxu0 %v229_v48  ;;  %v401_v42 = vld [vmem:[%s4319_s1 + $0x698] sm:$0xff]  ;;  %v400_v44 = vld [vmem:[%s4319_s1 + $0x690] sm:$0xff]  ;;  %v59_v45 = vld [vmem:[%s4320_s0 + $0x168] sm:$0xff] }
  0x3b   :  { %780 = vmatprep.subr.mxu1 %v293_v49  ;;  %620 = vmatpush2.msra.mxu0 %v228_v50  ;;  %v61_v46 = vld [vmem:[%s4320_s0 + $0x178] sm:$0xff]  ;;  %v334_v47 = vld [vmem:[%s4319_s1 + $0x480] sm:$0xff]  ;;  %v399_v48 = vld [vmem:[%s4319_s1 + $0x688] sm:$0xff] }
  0x3c   :  { %781 = vmatpush2.msra.mxu1 %v292_v51  ;;  %621 = vmatprep.subr.mxu0 %v227_v52  ;;  %v58_v49 = vld [vmem:[%s4320_s0 + $0x160] sm:$0xff]  ;;  %v60_v50 = vld [vmem:[%s4320_s0 + $0x170] sm:$0xff]  ;;  %v333_v51 = vld [vmem:[%s4319_s1 + $0x478] sm:$0xff] }
  0x3d   :  { %782 = vmatprep.subr.mxu1 %v291_v53  ;;  %622 = vmatpush2.msra.mxu0 %v226_v54  ;;  %v398_v52 = vld [vmem:[%s4319_s1 + $0x680] sm:$0xff]  ;;  %v332_v53 = vld [vmem:[%s4319_s1 + $0x470] sm:$0xff]  ;;  %v397_v54 = vld [vmem:[%s4319_s1 + $0x678] sm:$0xff] }
  0x3e   :  { %783 = vmatpush2.msra.mxu1 %v290_v55  ;;  %623 = vmatprep.subr.mxu0 %v225_v56  ;;  %v331_v55 = vld [vmem:[%s4319_s1 + $0x468] sm:$0xff]  ;;  %v396_v56 = vld [vmem:[%s4319_s1 + $0x670] sm:$0xff] }
  0x3f   :  { %784 = vmatprep.subr.mxu1 %v289_v57  ;;  %624 = vmatpush2.msra.mxu0 %v224_v58  ;;  %v70_v57 = vld [vmem:[%s4320_s0 + $0x1c0] sm:$0xff]  ;;  %v72_v58 = vld [vmem:[%s4320_s0 + $0x1d0] sm:$0xff] }
  0x40   :  { %785 = vmatpush2.msra.mxu1 %v288_v59  ;;  %625 = vmatprep.subr.mxu0 %v223_v60  ;;  %v330_v59 = vld [vmem:[%s4319_s1 + $0x460] sm:$0xff]  ;;  %v395_v60 = vld [vmem:[%s4319_s1 + $0x668] sm:$0xff] }
  0x41   :  { %786 = vmatprep.subr.mxu1 %v287_v61  ;;  %626 = vmatpush2.msra.mxu0 %v222_v62  ;;  %v69_v61 = vld [vmem:[%s4320_s0 + $0x1b8] sm:$0xff]  ;;  %v71_v62 = vld [vmem:[%s4320_s0 + $0x1c8] sm:$0xff] }
  0x42   :  { %627 = vmatprep.mubr.f32.mxu0 %v15_v63  ;;  %787 = vmatpush2.msra.mxu1 %v286_v0  ;;  %v329_v63 = vld [vmem:[%s4319_s1 + $0x458] sm:$0xff]  ;;  %v394_v0 = vld [vmem:[%s4319_s1 + $0x660] sm:$0xff] }
  0x43   :  { %788 = vmatprep.mubr.f32.mxu1 %v17_v1  ;;  %628 = vmatmul.mubr.f32.vlgmr.msra.gmra.mxu0 %v14_v2  ;;  %v328_v1 = vld [vmem:[%s4319_s1 + $0x450] sm:$0xff]  ;;  %v393_v2 = vld [vmem:[%s4319_s1 + $0x658] sm:$0xff] }
  0x44   :  { %789 = vmatmul.mubr.f32.vlgmr.msra.gmra.mxu1 %v16_v3  ;;  %885 = vmatprep.subr.mxu0 %v349_v4  ;;  %v327_v3 = vld [vmem:[%s4319_s1 + $0x448] sm:$0xff]  ;;  %v392_v4 = vld [vmem:[%s4319_s1 + $0x650] sm:$0xff] }
  0x45   :  { %1046 = vmatprep.subr.mxu1 %v413_v5  ;;  %886 = vmatpush1.msra.mxu0 %v348_v6  ;;  %v81_v5 = vld [vmem:[%s4320_s0 + $0x218] sm:$0xff]  ;;  %v83_v6 = vld [vmem:[%s4320_s0 + $0x228] sm:$0xff] }
  0x46   :  { %1047 = vmatpush1.msra.mxu1 %v412_v7  ;;  %887 = vmatprep.subr.mxu0 %v347_v8  ;;  %v326_v7 = vld [vmem:[%s4319_s1 + $0x440] sm:$0xff]  ;;  %v391_v8 = vld [vmem:[%s4319_s1 + $0x648] sm:$0xff] }
  0x47   :  { %633 = vmatprep.mubr.f32.mxu0 %v26_v9  ;;  %794 = vmatprep.mubr.f32.mxu1 %v28_v10  ;;  %v80_v9 = vld [vmem:[%s4320_s0 + $0x210] sm:$0xff]  ;;  %v82_v10 = vld [vmem:[%s4320_s0 + $0x220] sm:$0xff] }
  0x48   :  { %888 = vmatpush1.msra.mxu0 %v346_v11  ;;  %1048 = vmatprep.subr.mxu1 %v411_v12  ;;  %v325_v11 = vld [vmem:[%s4319_s1 + $0x438] sm:$0xff]  ;;  %v390_v12 = vld [vmem:[%s4319_s1 + $0x640] sm:$0xff] }
  0x49   :  { %634 = vmatmul.mubr.f32.gmra.mxu0 %v25_v13  ;;  %795 = vmatmul.mubr.f32.gmra.mxu1 %v27_v14  ;;  %v324_v13 = vld [vmem:[%s4319_s1 + $0x430] sm:$0xff]  ;;  %v389_v14 = vld [vmem:[%s4319_s1 + $0x638] sm:$0xff] }
  0x4a   :  { %889 = vmatprep.subr.mxu0 %v345_v15  ;;  %1049 = vmatpush1.msra.mxu1 %v410_v16  ;;  %v323_v15 = vld [vmem:[%s4319_s1 + $0x428] sm:$0xff]  ;;  %v388_v16 = vld [vmem:[%s4319_s1 + $0x630] sm:$0xff] }
  0x4b   :  { %890 = vmatpush1.msra.mxu0 %v344_v17  ;;  %1050 = vmatprep.subr.mxu1 %v409_v18  ;;  %v92_v17 = vld [vmem:[%s4320_s0 + $0x270] sm:$0xff]  ;;  %v94_v18 = vld [vmem:[%s4320_s0 + $0x280] sm:$0xff] }
  0x4c   :  { %891 = vmatprep.subr.mxu0 %v343_v19  ;;  %1051 = vmatpush1.msra.mxu1 %v408_v20  ;;  %v322_v19 = vld [vmem:[%s4319_s1 + $0x420] sm:$0xff]  ;;  %v387_v20 = vld [vmem:[%s4319_s1 + $0x628] sm:$0xff] }
  0x4d   :  { %639 = vmatprep.mubr.f32.mxu0 %v37_v21  ;;  %800 = vmatprep.mubr.f32.mxu1 %v39_v22  ;;  %v91_v21 = vld [vmem:[%s4320_s0 + $0x268] sm:$0xff]  ;;  %v93_v22 = vld [vmem:[%s4320_s0 + $0x278] sm:$0xff] }
  0x4e   :  { %892 = vmatpush1.msra.mxu0 %v342_v23  ;;  %1052 = vmatprep.subr.mxu1 %v407_v24  ;;  %v321_v23 = vld [vmem:[%s4319_s1 + $0x418] sm:$0xff]  ;;  %v386_v24 = vld [vmem:[%s4319_s1 + $0x620] sm:$0xff] }
  0x4f   :  { %640 = vmatmul.mubr.f32.gmra.mxu0 %v36_v25  ;;  %801 = vmatmul.mubr.f32.gmra.mxu1 %v38_v26  ;;  %v320_v25 = vld [vmem:[%s4319_s1 + $0x410] sm:$0xff]  ;;  %v385_v26 = vld [vmem:[%s4319_s1 + $0x618] sm:$0xff] }
  0x50   :  { %893 = vmatprep.subr.mxu0 %v341_v27  ;;  %1053 = vmatpush1.msra.mxu1 %v406_v28  ;;  %v319_v27 = vld [vmem:[%s4319_s1 + $0x408] sm:$0xff]  ;;  %v384_v28 = vld [vmem:[%s4319_s1 + $0x610] sm:$0xff] }
  0x51   :  { %894 = vmatpush1.msra.mxu0 %v340_v29  ;;  %1054 = vmatprep.subr.mxu1 %v405_v30  ;;  %v103_v29 = vld [vmem:[%s4320_s0 + $0x2c8] sm:$0xff]  ;;  %v105_v30 = vld [vmem:[%s4320_s0 + $0x2d8] sm:$0xff] }
  0x52   :  { %895 = vmatprep.subr.mxu0 %v339_v31  ;;  %1055 = vmatpush1.msra.mxu1 %v404_v32  ;;  %v318_v31 = vld [vmem:[%s4319_s1 + $0x400] sm:$0xff]  ;;  %v383_v32 = vld [vmem:[%s4319_s1 + $0x608] sm:$0xff] }
  0x53   :  { %645 = vmatprep.mubr.f32.mxu0 %v48_v33  ;;  %806 = vmatprep.mubr.f32.mxu1 %v50_v34  ;;  %v102_v33 = vld [vmem:[%s4320_s0 + $0x2c0] sm:$0xff]  ;;  %v104_v34 = vld [vmem:[%s4320_s0 + $0x2d0] sm:$0xff] }
  0x54   :  { %896 = vmatpush1.msra.mxu0 %v338_v35  ;;  %1056 = vmatprep.subr.mxu1 %v403_v36  ;;  %v381_v35 = vld [vmem:[%s4319_s1 + $0x5f8] sm:$0xff]  ;;  %v382_v36 = vld [vmem:[%s4319_s1 + $0x600] sm:$0xff] }
  0x55   :  { %646 = vmatmul.mubr.f32.gmra.mxu0 %v47_v37  ;;  %807 = vmatmul.mubr.f32.gmra.mxu1 %v49_v38  ;;  %v380_v37 = vld [vmem:[%s4319_s1 + $0x5f0] sm:$0xff]  ;;  %v445_v38 = vld [vmem:[%s4319_s1 + $0x7f8] sm:$0xff] }
  0x56   :  { %897 = vmatprep.subr.mxu0 %v337_v39  ;;  %1057 = vmatpush1.msra.mxu1 %v402_v40  ;;  %v379_v39 = vld [vmem:[%s4319_s1 + $0x5e8] sm:$0xff]  ;;  %v444_v40 = vld [vmem:[%s4319_s1 + $0x7f0] sm:$0xff] }
  0x57   :  { %898 = vmatpush1.msra.mxu0 %v336_v41  ;;  %1058 = vmatprep.subr.mxu1 %v401_v42  ;;  %v114_v41 = vld [vmem:[%s4320_s0 + $0x320] sm:$0xff]  ;;  %v116_v42 = vld [vmem:[%s4320_s0 + $0x330] sm:$0xff] }
  0x58   :  { %899 = vmatprep.subr.mxu0 %v335_v43  ;;  %1059 = vmatpush1.msra.mxu1 %v400_v44  ;;  %v378_v43 = vld [vmem:[%s4319_s1 + $0x5e0] sm:$0xff]  ;;  %v443_v44 = vld [vmem:[%s4319_s1 + $0x7e8] sm:$0xff] }
  0x59   :  { %651 = vmatprep.mubr.f32.mxu0 %v59_v45  ;;  %812 = vmatprep.mubr.f32.mxu1 %v61_v46  ;;  %v113_v45 = vld [vmem:[%s4320_s0 + $0x318] sm:$0xff]  ;;  %v115_v46 = vld [vmem:[%s4320_s0 + $0x328] sm:$0xff] }
  0x5a   :  { %900 = vmatpush1.msra.mxu0 %v334_v47  ;;  %1060 = vmatprep.subr.mxu1 %v399_v48  ;;  %v377_v47 = vld [vmem:[%s4319_s1 + $0x5d8] sm:$0xff]  ;;  %v442_v48 = vld [vmem:[%s4319_s1 + $0x7e0] sm:$0xff] }
  0x5b   :  { %652 = vmatmul.mubr.f32.gmra.mxu0 %v58_v49  ;;  %813 = vmatmul.mubr.f32.gmra.mxu1 %v60_v50  ;;  %v376_v49 = vld [vmem:[%s4319_s1 + $0x5d0] sm:$0xff]  ;;  %v441_v50 = vld [vmem:[%s4319_s1 + $0x7d8] sm:$0xff] }
  0x5c   :  { %901 = vmatprep.subr.mxu0 %v333_v51  ;;  %1061 = vmatpush1.msra.mxu1 %v398_v52  ;;  %v375_v51 = vld [vmem:[%s4319_s1 + $0x5c8] sm:$0xff]  ;;  %v440_v52 = vld [vmem:[%s4319_s1 + $0x7d0] sm:$0xff] }
  0x5d   :  { %902 = vmatpush1.msra.mxu0 %v332_v53  ;;  %1062 = vmatprep.subr.mxu1 %v397_v54  ;;  %v125_v53 = vld [vmem:[%s4320_s0 + $0x378] sm:$0xff]  ;;  %v127_v54 = vld [vmem:[%s4320_s0 + $0x388] sm:$0xff] }
  0x5e   :  { %903 = vmatprep.subr.mxu0 %v331_v55  ;;  %1063 = vmatpush1.msra.mxu1 %v396_v56  ;;  %v374_v55 = vld [vmem:[%s4319_s1 + $0x5c0] sm:$0xff]  ;;  %v439_v56 = vld [vmem:[%s4319_s1 + $0x7c8] sm:$0xff] }
  0x5f   :  { %657 = vmatprep.mubr.f32.mxu0 %v70_v57  ;;  %818 = vmatprep.mubr.f32.mxu1 %v72_v58  ;;  %v124_v57 = vld [vmem:[%s4320_s0 + $0x370] sm:$0xff]  ;;  %v126_v58 = vld [vmem:[%s4320_s0 + $0x380] sm:$0xff] }
  0x60   :  { %904 = vmatpush1.msra.mxu0 %v330_v59  ;;  %1064 = vmatprep.subr.mxu1 %v395_v60  ;;  %v373_v59 = vld [vmem:[%s4319_s1 + $0x5b8] sm:$0xff]  ;;  %v438_v60 = vld [vmem:[%s4319_s1 + $0x7c0] sm:$0xff] }
  0x61   :  { %658 = vmatmul.mubr.f32.gmra.mxu0 %v69_v61  ;;  %819 = vmatmul.mubr.f32.gmra.mxu1 %v71_v62  ;;  %v372_v61 = vld [vmem:[%s4319_s1 + $0x5b0] sm:$0xff]  ;;  %v437_v62 = vld [vmem:[%s4319_s1 + $0x7b8] sm:$0xff] }
  0x62   :  { %905 = vmatprep.subr.mxu0 %v329_v63  ;;  %1065 = vmatpush1.msra.mxu1 %v394_v0  ;;  %v371_v63 = vld [vmem:[%s4319_s1 + $0x5a8] sm:$0xff]  ;;  %v436_v0 = vld [vmem:[%s4319_s1 + $0x7b0] sm:$0xff] }
  0x63   :  { %906 = vmatpush1.msra.mxu0 %v328_v1  ;;  %1066 = vmatprep.subr.mxu1 %v393_v2  ;;  %v136_v1 = vld [vmem:[%s4320_s0 + $0x3d0] sm:$0xff]  ;;  %v138_v2 = vld [vmem:[%s4320_s0 + $0x3e0] sm:$0xff] }
  0x64   :  { %907 = vmatprep.subr.mxu0 %v327_v3  ;;  %1067 = vmatpush1.msra.mxu1 %v392_v4  ;;  %v370_v3 = vld [vmem:[%s4319_s1 + $0x5a0] sm:$0xff]  ;;  %v435_v4 = vld [vmem:[%s4319_s1 + $0x7a8] sm:$0xff] }
  0x65   :  { %663 = vmatprep.mubr.f32.mxu0 %v81_v5  ;;  %824 = vmatprep.mubr.f32.mxu1 %v83_v6  ;;  %v135_v5 = vld [vmem:[%s4320_s0 + $0x3c8] sm:$0xff]  ;;  %v137_v6 = vld [vmem:[%s4320_s0 + $0x3d8] sm:$0xff] }
  0x66   :  { %908 = vmatpush1.msra.mxu0 %v326_v7  ;;  %1068 = vmatprep.subr.mxu1 %v391_v8  ;;  %v369_v7 = vld [vmem:[%s4319_s1 + $0x598] sm:$0xff]  ;;  %v434_v8 = vld [vmem:[%s4319_s1 + $0x7a0] sm:$0xff] }
  0x67   :  { %664 = vmatmul.mubr.f32.gmra.mxu0 %v80_v9  ;;  %825 = vmatmul.mubr.f32.gmra.mxu1 %v82_v10  ;;  %v368_v9 = vld [vmem:[%s4319_s1 + $0x590] sm:$0xff]  ;;  %v433_v10 = vld [vmem:[%s4319_s1 + $0x798] sm:$0xff] }
  0x68   :  { %909 = vmatprep.subr.mxu0 %v325_v11  ;;  %1069 = vmatpush1.msra.mxu1 %v390_v12  ;;  %v367_v11 = vld [vmem:[%s4319_s1 + $0x588] sm:$0xff]  ;;  %v432_v12 = vld [vmem:[%s4319_s1 + $0x790] sm:$0xff] }
  0x69   :  { %910 = vmatpush1.msra.mxu0 %v324_v13  ;;  %1070 = vmatprep.subr.mxu1 %v389_v14  ;;  %v147_v13 = vld [vmem:[%s4320_s0 + $0x428] sm:$0xff]  ;;  %v149_v14 = vld [vmem:[%s4320_s0 + $0x438] sm:$0xff] }
  0x6a   :  { %911 = vmatprep.subr.mxu0 %v323_v15  ;;  %1071 = vmatpush1.msra.mxu1 %v388_v16  ;;  %v366_v15 = vld [vmem:[%s4319_s1 + $0x580] sm:$0xff]  ;;  %v431_v16 = vld [vmem:[%s4319_s1 + $0x788] sm:$0xff] }
  0x6b   :  { %669 = vmatprep.mubr.f32.mxu0 %v92_v17  ;;  %830 = vmatprep.mubr.f32.mxu1 %v94_v18  ;;  %v146_v17 = vld [vmem:[%s4320_s0 + $0x420] sm:$0xff]  ;;  %v148_v18 = vld [vmem:[%s4320_s0 + $0x430] sm:$0xff] }
  0x6c   :  { %912 = vmatpush1.msra.mxu0 %v322_v19  ;;  %1072 = vmatprep.subr.mxu1 %v387_v20  ;;  %v365_v19 = vld [vmem:[%s4319_s1 + $0x578] sm:$0xff]  ;;  %v430_v20 = vld [vmem:[%s4319_s1 + $0x780] sm:$0xff] }
  0x6d   :  { %670 = vmatmul.mubr.f32.gmra.mxu0 %v91_v21  ;;  %831 = vmatmul.mubr.f32.gmra.mxu1 %v93_v22  ;;  %v364_v21 = vld [vmem:[%s4319_s1 + $0x570] sm:$0xff]  ;;  %v429_v22 = vld [vmem:[%s4319_s1 + $0x778] sm:$0xff] }
  0x6e   :  { %913 = vmatprep.subr.mxu0 %v321_v23  ;;  %1073 = vmatpush1.msra.mxu1 %v386_v24  ;;  %v363_v23 = vld [vmem:[%s4319_s1 + $0x568] sm:$0xff]  ;;  %v428_v24 = vld [vmem:[%s4319_s1 + $0x770] sm:$0xff] }
  0x6f   :  { %914 = vmatpush1.msra.mxu0 %v320_v25  ;;  %1074 = vmatprep.subr.mxu1 %v385_v26  ;;  %v158_v25 = vld [vmem:[%s4320_s0 + $0x480] sm:$0xff]  ;;  %v160_v26 = vld [vmem:[%s4320_s0 + $0x490] sm:$0xff] }
  0x70   :  { %915 = vmatprep.subr.mxu0 %v319_v27  ;;  %1075 = vmatpush1.msra.mxu1 %v384_v28  ;;  %v362_v27 = vld [vmem:[%s4319_s1 + $0x560] sm:$0xff]  ;;  %v427_v28 = vld [vmem:[%s4319_s1 + $0x768] sm:$0xff] }
  0x71   :  { %675 = vmatprep.mubr.f32.mxu0 %v103_v29  ;;  %836 = vmatprep.mubr.f32.mxu1 %v105_v30  ;;  %v157_v29 = vld [vmem:[%s4320_s0 + $0x478] sm:$0xff]  ;;  %v159_v30 = vld [vmem:[%s4320_s0 + $0x488] sm:$0xff] }
  0x72   :  { %916 = vmatpush1.msra.mxu0 %v318_v31  ;;  %1076 = vmatprep.subr.mxu1 %v383_v32  ;;  %v361_v31 = vld [vmem:[%s4319_s1 + $0x558] sm:$0xff]  ;;  %v426_v32 = vld [vmem:[%s4319_s1 + $0x760] sm:$0xff] }
  0x73   :  { %676 = vmatmul.mubr.f32.gmra.mxu0 %v102_v33  ;;  %837 = vmatmul.mubr.f32.gmra.mxu1 %v104_v34  ;;  %v360_v33 = vld [vmem:[%s4319_s1 + $0x550] sm:$0xff]  ;;  %v425_v34 = vld [vmem:[%s4319_s1 + $0x758] sm:$0xff] }
  0x74   :  { %917 = vmatprep.subr.mxu0 %v381_v35  ;;  %1077 = vmatpush1.msra.mxu1 %v382_v36  ;;  %v359_v35 = vld [vmem:[%s4319_s1 + $0x548] sm:$0xff]  ;;  %v424_v36 = vld [vmem:[%s4319_s1 + $0x750] sm:$0xff] }
  0x75   :  { %918 = vmatpush2.msra.mxu0 %v380_v37  ;;  %1078 = vmatprep.subr.mxu1 %v445_v38  ;;  %v169_v37 = vld [vmem:[%s4320_s0 + $0x4d8] sm:$0xff]  ;;  %v171_v38 = vld [vmem:[%s4320_s0 + $0x4e8] sm:$0xff] }
  0x76   :  { %919 = vmatprep.subr.mxu0 %v379_v39  ;;  %1079 = vmatpush2.msra.mxu1 %v444_v40  ;;  %v358_v39 = vld [vmem:[%s4319_s1 + $0x540] sm:$0xff]  ;;  %v423_v40 = vld [vmem:[%s4319_s1 + $0x748] sm:$0xff] }
  0x77   :  { %681 = vmatprep.mubr.f32.mxu0 %v114_v41  ;;  %842 = vmatprep.mubr.f32.mxu1 %v116_v42  ;;  %v168_v41 = vld [vmem:[%s4320_s0 + $0x4d0] sm:$0xff]  ;;  %v170_v42 = vld [vmem:[%s4320_s0 + $0x4e0] sm:$0xff] }
  0x78   :  { %920 = vmatpush2.msra.mxu0 %v378_v43  ;;  %1080 = vmatprep.subr.mxu1 %v443_v44  ;;  %v357_v43 = vld [vmem:[%s4319_s1 + $0x538] sm:$0xff]  ;;  %v422_v44 = vld [vmem:[%s4319_s1 + $0x740] sm:$0xff] }
  0x79   :  { %682 = vmatmul.mubr.f32.gmra.mxu0 %v113_v45  ;;  %843 = vmatmul.mubr.f32.gmra.mxu1 %v115_v46  ;;  %v356_v45 = vld [vmem:[%s4319_s1 + $0x530] sm:$0xff]  ;;  %v421_v46 = vld [vmem:[%s4319_s1 + $0x738] sm:$0xff] }
  0x7a   :  { %921 = vmatprep.subr.mxu0 %v377_v47  ;;  %1081 = vmatpush2.msra.mxu1 %v442_v48  ;;  %v355_v47 = vld [vmem:[%s4319_s1 + $0x528] sm:$0xff]  ;;  %v420_v48 = vld [vmem:[%s4319_s1 + $0x730] sm:$0xff] }
  0x7b   :  { %922 = vmatpush2.msra.mxu0 %v376_v49  ;;  %1082 = vmatprep.subr.mxu1 %v441_v50  ;;  %v180_v49 = vld [vmem:[%s4320_s0 + $0x530] sm:$0xff]  ;;  %v182_v50 = vld [vmem:[%s4320_s0 + $0x540] sm:$0xff] }
  0x7c   :  { %923 = vmatprep.subr.mxu0 %v375_v51  ;;  %1083 = vmatpush2.msra.mxu1 %v440_v52  ;;  %v354_v51 = vld [vmem:[%s4319_s1 + $0x520] sm:$0xff]  ;;  %v419_v52 = vld [vmem:[%s4319_s1 + $0x728] sm:$0xff] }
  0x7d   :  { %687 = vmatprep.mubr.f32.mxu0 %v125_v53  ;;  %848 = vmatprep.mubr.f32.mxu1 %v127_v54  ;;  %v179_v53 = vld [vmem:[%s4320_s0 + $0x528] sm:$0xff]  ;;  %v181_v54 = vld [vmem:[%s4320_s0 + $0x538] sm:$0xff] }
  0x7e   :  { %924 = vmatpush2.msra.mxu0 %v374_v55  ;;  %1084 = vmatprep.subr.mxu1 %v439_v56  ;;  %v353_v55 = vld [vmem:[%s4319_s1 + $0x518] sm:$0xff]  ;;  %v418_v56 = vld [vmem:[%s4319_s1 + $0x720] sm:$0xff] }
  0x7f   :  { %688 = vmatmul.mubr.f32.gmra.mxu0 %v124_v57  ;;  %849 = vmatmul.mubr.f32.gmra.mxu1 %v126_v58  ;;  %v352_v57 = vld [vmem:[%s4319_s1 + $0x510] sm:$0xff]  ;;  %v417_v58 = vld [vmem:[%s4319_s1 + $0x718] sm:$0xff] }
  0x80   :  { %925 = vmatprep.subr.mxu0 %v373_v59  ;;  %1085 = vmatpush2.msra.mxu1 %v438_v60  ;;  %v351_v59 = vld [vmem:[%s4319_s1 + $0x508] sm:$0xff]  ;;  %v416_v60 = vld [vmem:[%s4319_s1 + $0x710] sm:$0xff] }
  0x81   :  { %926 = vmatpush2.msra.mxu0 %v372_v61  ;;  %1086 = vmatprep.subr.mxu1 %v437_v62  ;;  %v350_v61 = vld [vmem:[%s4319_s1 + $0x500] sm:$0xff]  ;;  %v19_v62 = vld [vmem:[%s4320_s0 + $0x28] sm:$0xff] }
  0x82   :  { %927 = vmatprep.subr.mxu0 %v371_v63  ;;  %1087 = vmatpush2.msra.mxu1 %v436_v0  ;;  %v415_v63 = vld [vmem:[%s4319_s1 + $0x708] sm:$0xff]  ;;  %v18_v0 = vld [vmem:[%s4320_s0 + $0x20] sm:$0xff] }
  0x83   :  { %693 = vmatprep.mubr.f32.mxu0 %v136_v1  ;;  %854 = vmatprep.mubr.f32.mxu1 %v138_v2  ;;  %v414_v1 = vld [vmem:[%s4319_s1 + $0x700] sm:$0xff]  ;;  %v21_v2 = vld [vmem:[%s4320_s0 + $0x38] sm:$0xff] }
  0x84   :  { %928 = vmatpush2.msra.mxu0 %v370_v3  ;;  %1088 = vmatprep.subr.mxu1 %v435_v4  ;;  %v477_v3 = vld [vmem:[%s4319_s1 + $0x8f8] sm:$0xff]  ;;  %v20_v4 = vld [vmem:[%s4320_s0 + $0x30] sm:$0xff] }
  0x85   :  { %694 = vmatmul.mubr.f32.gmra.mxu0 %v135_v5  ;;  %855 = vmatmul.mubr.f32.gmra.mxu1 %v137_v6  ;;  %v476_v5 = vld [vmem:[%s4319_s1 + $0x8f0] sm:$0xff]  ;;  %v475_v6 = vld [vmem:[%s4319_s1 + $0x8e8] sm:$0xff] }
  0x86   :  { %929 = vmatprep.subr.mxu0 %v369_v7  ;;  %1089 = vmatpush2.msra.mxu1 %v434_v8  ;;  %v513_v7 = vld [vmem:[%s4319_s1 + $0xa18] sm:$0xff]  ;;  %v30_v8 = vld [vmem:[%s4320_s0 + $0x80] sm:$0xff] }
  0x87   :  { %930 = vmatpush2.msra.mxu0 %v368_v9  ;;  %1090 = vmatprep.subr.mxu1 %v433_v10  ;;  %v474_v9 = vld [vmem:[%s4319_s1 + $0x8e0] sm:$0xff]  ;;  %v512_v10 = vld [vmem:[%s4319_s1 + $0xa10] sm:$0xff] }
  0x88   :  { %931 = vmatprep.subr.mxu0 %v367_v11  ;;  %1091 = vmatpush2.msra.mxu1 %v432_v12  ;;  %v29_v11 = vld [vmem:[%s4320_s0 + $0x78] sm:$0xff]  ;;  %v32_v12 = vld [vmem:[%s4320_s0 + $0x90] sm:$0xff] }
  0x89   :  { %699 = vmatprep.mubr.f32.mxu0 %v147_v13  ;;  %860 = vmatprep.mubr.f32.mxu1 %v149_v14  ;;  %v473_v13 = vld [vmem:[%s4319_s1 + $0x8d8] sm:$0xff]  ;;  %v31_v14 = vld [vmem:[%s4320_s0 + $0x88] sm:$0xff] }
  0x8a   :  { %932 = vmatpush2.msra.mxu0 %v366_v15  ;;  %1092 = vmatprep.subr.mxu1 %v431_v16  ;;  %v472_v15 = vld [vmem:[%s4319_s1 + $0x8d0] sm:$0xff]  ;;  %v471_v16 = vld [vmem:[%s4319_s1 + $0x8c8] sm:$0xff] }
  0x8b   :  { %700 = vmatmul.mubr.f32.gmra.mxu0 %v146_v17  ;;  %861 = vmatmul.mubr.f32.gmra.mxu1 %v148_v18  ;;  %v41_v17 = vld [vmem:[%s4320_s0 + $0xd8] sm:$0xff]  ;;  %v470_v18 = vld [vmem:[%s4319_s1 + $0x8c0] sm:$0xff] }
  0x8c   :  { %933 = vmatprep.subr.mxu0 %v365_v19  ;;  %1093 = vmatpush2.msra.mxu1 %v430_v20  ;;  %v43_v19 = vld [vmem:[%s4320_s0 + $0xe8] sm:$0xff]  ;;  %v40_v20 = vld [vmem:[%s4320_s0 + $0xd0] sm:$0xff] }
  0x8d   :  { %934 = vmatpush2.msra.mxu0 %v364_v21  ;;  %1094 = vmatprep.subr.mxu1 %v429_v22  ;;  %v469_v21 = vld [vmem:[%s4319_s1 + $0x8b8] sm:$0xff]  ;;  %v42_v22 = vld [vmem:[%s4320_s0 + $0xe0] sm:$0xff] }
  0x8e   :  { %935 = vmatprep.subr.mxu0 %v363_v23  ;;  %1095 = vmatpush2.msra.mxu1 %v428_v24  ;;  %v468_v23 = vld [vmem:[%s4319_s1 + $0x8b0] sm:$0xff]  ;;  %v467_v24 = vld [vmem:[%s4319_s1 + $0x8a8] sm:$0xff] }
  0x8f   :  { %705 = vmatprep.mubr.f32.mxu0 %v158_v25  ;;  %866 = vmatprep.mubr.f32.mxu1 %v160_v26  ;;  %v52_v25 = vld [vmem:[%s4320_s0 + $0x130] sm:$0xff]  ;;  %v466_v26 = vld [vmem:[%s4319_s1 + $0x8a0] sm:$0xff] }
  0x90   :  { %936 = vmatpush2.msra.mxu0 %v362_v27  ;;  %1096 = vmatprep.subr.mxu1 %v427_v28  ;;  %v54_v27 = vld [vmem:[%s4320_s0 + $0x140] sm:$0xff]  ;;  %v51_v28 = vld [vmem:[%s4320_s0 + $0x128] sm:$0xff] }
  0x91   :  { %706 = vmatmul.mubr.f32.gmra.mxu0 %v157_v29  ;;  %867 = vmatmul.mubr.f32.gmra.mxu1 %v159_v30  ;;  %v465_v29 = vld [vmem:[%s4319_s1 + $0x898] sm:$0xff] }
  0x92   :  { %937 = vmatprep.subr.mxu0 %v361_v31  ;;  %1097 = vmatpush2.msra.mxu1 %v426_v32  ;;  %v53_v30 = vld [vmem:[%s4320_s0 + $0x138] sm:$0xff]  ;;  %v464_v31 = vld [vmem:[%s4319_s1 + $0x890] sm:$0xff]  ;;  %v463_v32 = vld [vmem:[%s4319_s1 + $0x888] sm:$0xff] }
  0x93   :  { %938 = vmatpush2.msra.mxu0 %v360_v33  ;;  %1098 = vmatprep.subr.mxu1 %v425_v34  ;;  %v63_v33 = vld [vmem:[%s4320_s0 + $0x188] sm:$0xff]  ;;  %v462_v34 = vld [vmem:[%s4319_s1 + $0x880] sm:$0xff] }
  0x94   :  { %939 = vmatprep.subr.mxu0 %v359_v35  ;;  %1099 = vmatpush2.msra.mxu1 %v424_v36  ;;  %v65_v35 = vld [vmem:[%s4320_s0 + $0x198] sm:$0xff]  ;;  %v62_v36 = vld [vmem:[%s4320_s0 + $0x180] sm:$0xff] }
  0x95   :  { %711 = vmatprep.mubr.f32.mxu0 %v169_v37  ;;  %872 = vmatprep.mubr.f32.mxu1 %v171_v38  ;;  %v461_v37 = vld [vmem:[%s4319_s1 + $0x878] sm:$0xff]  ;;  %v64_v38 = vld [vmem:[%s4320_s0 + $0x190] sm:$0xff] }
  0x96   :  { %940 = vmatpush2.msra.mxu0 %v358_v39  ;;  %1100 = vmatprep.subr.mxu1 %v423_v40  ;;  %v460_v39 = vld [vmem:[%s4319_s1 + $0x870] sm:$0xff]  ;;  %v459_v40 = vld [vmem:[%s4319_s1 + $0x868] sm:$0xff] }
  0x97   :  { %712 = vmatmul.mubr.f32.gmra.mxu0 %v168_v41  ;;  %873 = vmatmul.mubr.f32.gmra.mxu1 %v170_v42  ;;  %v74_v41 = vld [vmem:[%s4320_s0 + $0x1e0] sm:$0xff] }
  0x98   :  { %941 = vmatprep.subr.mxu0 %v357_v43  ;;  %1101 = vmatpush2.msra.mxu1 %v422_v44  ;;  %v458_v42 = vld [vmem:[%s4319_s1 + $0x860] sm:$0xff]  ;;  %v76_v43 = vld [vmem:[%s4320_s0 + $0x1f0] sm:$0xff]  ;;  %v73_v44 = vld [vmem:[%s4320_s0 + $0x1d8] sm:$0xff] }
  0x99   :  { %942 = vmatpush2.msra.mxu0 %v356_v45  ;;  %1102 = vmatprep.subr.mxu1 %v421_v46  ;;  %v457_v45 = vld [vmem:[%s4319_s1 + $0x858] sm:$0xff]  ;;  %v75_v46 = vld [vmem:[%s4320_s0 + $0x1e8] sm:$0xff] }
  0x9a   :  { %943 = vmatprep.subr.mxu0 %v355_v47  ;;  %1103 = vmatpush2.msra.mxu1 %v420_v48  ;;  %v456_v47 = vld [vmem:[%s4319_s1 + $0x850] sm:$0xff]  ;;  %v455_v48 = vld [vmem:[%s4319_s1 + $0x848] sm:$0xff] }
  0x9b   :  { %717 = vmatprep.mubr.f32.mxu0 %v180_v49  ;;  %878 = vmatprep.mubr.f32.mxu1 %v182_v50  ;;  %v85_v49 = vld [vmem:[%s4320_s0 + $0x238] sm:$0xff]  ;;  %v454_v50 = vld [vmem:[%s4319_s1 + $0x840] sm:$0xff] }
  0x9c   :  { %944 = vmatpush2.msra.mxu0 %v354_v51  ;;  %1104 = vmatprep.subr.mxu1 %v419_v52  ;;  %v87_v51 = vld [vmem:[%s4320_s0 + $0x248] sm:$0xff]  ;;  %v84_v52 = vld [vmem:[%s4320_s0 + $0x230] sm:$0xff] }
  0x9d   :  { %718 = vmatmul.mubr.f32.gmra.mxu0 %v179_v53  ;;  %879 = vmatmul.mubr.f32.gmra.mxu1 %v181_v54  ;;  %v453_v53 = vld [vmem:[%s4319_s1 + $0x838] sm:$0xff]  ;;  %v86_v54 = vld [vmem:[%s4320_s0 + $0x240] sm:$0xff] }
  0x9e   :  { %945 = vmatprep.subr.mxu0 %v353_v55  ;;  %1105 = vmatpush2.msra.mxu1 %v418_v56  ;;  %v452_v55 = vld [vmem:[%s4319_s1 + $0x830] sm:$0xff]  ;;  %v451_v56 = vld [vmem:[%s4319_s1 + $0x828] sm:$0xff] }
  0x9f   :  { %946 = vmatpush2.msra.mxu0 %v352_v57  ;;  %1106 = vmatprep.subr.mxu1 %v417_v58  ;;  %v96_v57 = vld [vmem:[%s4320_s0 + $0x290] sm:$0xff]  ;;  %v450_v58 = vld [vmem:[%s4319_s1 + $0x820] sm:$0xff] }
  0xa0   :  { %947 = vmatprep.subr.mxu0 %v351_v59  ;;  %1107 = vmatpush2.msra.mxu1 %v416_v60  ;;  %v98_v59 = vld [vmem:[%s4320_s0 + $0x2a0] sm:$0xff]  ;;  %v95_v60 = vld [vmem:[%s4320_s0 + $0x288] sm:$0xff] }
  0xa1   :  { %948 = vmatpush2.msra.mxu0 %v350_v61  ;;  %949 = vmatprep.mubr.f32.mxu0 %v19_v62  ;;  %v449_v61 = vld [vmem:[%s4319_s1 + $0x818] sm:$0xff] }
  0xa2   :  { %1108 = vmatprep.subr.mxu1 %v415_v63  ;;  %950 = vmatmul.mubr.f32.vlgmr.msra.gmra.mxu0 %v18_v0  ;;  %v97_v62 = vld [vmem:[%s4320_s0 + $0x298] sm:$0xff]  ;;  %v448_v63 = vld [vmem:[%s4319_s1 + $0x810] sm:$0xff]  ;;  %v447_v0 = vld [vmem:[%s4319_s1 + $0x808] sm:$0xff] }
  0xa3   :  { %1109 = vmatpush2.msra.mxu1 %v414_v1  ;;  %1110 = vmatprep.mubr.f32.mxu1 %v21_v2  ;;  %v107_v1 = vld [vmem:[%s4320_s0 + $0x2e8] sm:$0xff]  ;;  %v446_v2 = vld [vmem:[%s4319_s1 + $0x800] sm:$0xff] }
  0xa4   :  { %1207 = vmatprep.subr.mxu0 %v477_v3  ;;  %1111 = vmatmul.mubr.f32.vlgmr.msra.gmra.mxu1 %v20_v4  ;;  %v109_v3 = vld [vmem:[%s4320_s0 + $0x2f8] sm:$0xff]  ;;  %v106_v4 = vld [vmem:[%s4320_s0 + $0x2e0] sm:$0xff] }
  0xa5   :  { %1208 = vmatpush1.msra.mxu0 %v476_v5  ;;  %1396 = vmatprep.subr.mxu1 %v513_v7  ;;  %v509_v5 = vld [vmem:[%s4319_s1 + $0x9f8] sm:$0xff]  ;;  %v508_v7 = vld [vmem:[%s4319_s1 + $0x9f0] sm:$0xff] }
  0xa6   :  { %1209 = vmatprep.subr.mxu0 %v475_v6  ;;  %955 = vmatprep.mubr.f32.mxu0 %v30_v8  ;;  %v108_v6 = vld [vmem:[%s4320_s0 + $0x2f0] sm:$0xff]  ;;  %v507_v8 = vld [vmem:[%s4319_s1 + $0x9e8] sm:$0xff] }
  0xa7   :  { %1210 = vmatpush1.msra.mxu0 %v474_v9  ;;  %1397 = vmatpush1.msra.mxu1 %v512_v10  ;;  %v511_v9 = vld [vmem:[%s4319_s1 + $0xa08] sm:$0xff]  ;;  %v118_v10 = vld [vmem:[%s4320_s0 + $0x340] sm:$0xff] }
  0xa8   :  { %956 = vmatmul.mubr.f32.gmra.mxu0 %v29_v11  ;;  %1116 = vmatprep.mubr.f32.mxu1 %v32_v12  ;;  %v506_v11 = vld [vmem:[%s4319_s1 + $0x9e0] sm:$0xff] }
  0xa9   :  { %1211 = vmatprep.subr.mxu0 %v473_v13  ;;  %1117 = vmatmul.mubr.f32.gmra.mxu1 %v31_v14  ;;  %v510_v12 = vld [vmem:[%s4319_s1 + $0xa00] sm:$0xff]  ;;  %v117_v13 = vld [vmem:[%s4320_s0 + $0x338] sm:$0xff]  ;;  %v120_v14 = vld [vmem:[%s4320_s0 + $0x350] sm:$0xff] }
  0xaa   :  { %1212 = vmatpush1.msra.mxu0 %v472_v15  ;;  %961 = vmatprep.mubr.f32.mxu0 %v41_v17  ;;  %v505_v15 = vld [vmem:[%s4319_s1 + $0x9d8] sm:$0xff]  ;;  %v504_v17 = vld [vmem:[%s4319_s1 + $0x9d0] sm:$0xff] }
  0xab   :  { %1213 = vmatprep.subr.mxu0 %v471_v16  ;;  %1122 = vmatprep.mubr.f32.mxu1 %v43_v19  ;;  %v119_v16 = vld [vmem:[%s4320_s0 + $0x348] sm:$0xff]  ;;  %v129_v19 = vld [vmem:[%s4320_s0 + $0x398] sm:$0xff] }
  0xac   :  { %1214 = vmatpush1.msra.mxu0 %v470_v18  ;;  %1398 = vmatprep.subr.mxu1 %v511_v9  ;;  %v503_v18 = vld [vmem:[%s4319_s1 + $0x9c8] sm:$0xff]  ;;  %v33_v9 = vld [vmem:[%s4320_s0 + $0x98] sm:$0xff] }
  0xad   :  { %962 = vmatmul.mubr.f32.gmra.mxu0 %v40_v20  ;;  %1215 = vmatprep.subr.mxu0 %v469_v21  ;;  %v502_v20 = vld [vmem:[%s4319_s1 + $0x9c0] sm:$0xff]  ;;  %v131_v21 = vld [vmem:[%s4320_s0 + $0x3a8] sm:$0xff] }
  0xae   :  { %1123 = vmatmul.mubr.f32.gmra.mxu1 %v42_v22  ;;  %1216 = vmatpush1.msra.mxu0 %v468_v23  ;;  %v128_v22 = vld [vmem:[%s4320_s0 + $0x390] sm:$0xff]  ;;  %v501_v23 = vld [vmem:[%s4319_s1 + $0x9b8] sm:$0xff] }
  0xaf   :  { %1217 = vmatprep.subr.mxu0 %v467_v24  ;;  %967 = vmatprep.mubr.f32.mxu0 %v52_v25  ;;  %v130_v24 = vld [vmem:[%s4320_s0 + $0x3a0] sm:$0xff]  ;;  %v500_v25 = vld [vmem:[%s4319_s1 + $0x9b0] sm:$0xff] }
  0xb0   :  { %1218 = vmatpush1.msra.mxu0 %v466_v26  ;;  %1128 = vmatprep.mubr.f32.mxu1 %v54_v27  ;;  %v499_v26 = vld [vmem:[%s4319_s1 + $0x9a8] sm:$0xff]  ;;  %v140_v27 = vld [vmem:[%s4320_s0 + $0x3f0] sm:$0xff] }
  0xb1   :  { %968 = vmatmul.mubr.f32.gmra.mxu0 %v51_v28  ;;  %1219 = vmatprep.subr.mxu0 %v465_v29  ;;  %v498_v28 = vld [vmem:[%s4319_s1 + $0x9a0] sm:$0xff] }
  0xb2   :  { %1129 = vmatmul.mubr.f32.gmra.mxu1 %v53_v30  ;;  %1220 = vmatpush1.msra.mxu0 %v464_v31  ;;  %v142_v29 = vld [vmem:[%s4320_s0 + $0x400] sm:$0xff]  ;;  %v139_v30 = vld [vmem:[%s4320_s0 + $0x3e8] sm:$0xff]  ;;  %v497_v31 = vld [vmem:[%s4319_s1 + $0x998] sm:$0xff] }
  0xb3   :  { %1221 = vmatprep.subr.mxu0 %v463_v32  ;;  %973 = vmatprep.mubr.f32.mxu0 %v63_v33  ;;  %v141_v32 = vld [vmem:[%s4320_s0 + $0x3f8] sm:$0xff]  ;;  %v496_v33 = vld [vmem:[%s4319_s1 + $0x990] sm:$0xff] }
  0xb4   :  { %1222 = vmatpush1.msra.mxu0 %v462_v34  ;;  %1134 = vmatprep.mubr.f32.mxu1 %v65_v35  ;;  %v495_v34 = vld [vmem:[%s4319_s1 + $0x988] sm:$0xff] }
  0xb5   :  { %974 = vmatmul.mubr.f32.gmra.mxu0 %v62_v36  ;;  %1223 = vmatprep.subr.mxu0 %v461_v37  ;;  %v151_v35 = vld [vmem:[%s4320_s0 + $0x448] sm:$0xff]  ;;  %v494_v36 = vld [vmem:[%s4319_s1 + $0x980] sm:$0xff]  ;;  %v153_v37 = vld [vmem:[%s4320_s0 + $0x458] sm:$0xff] }
  0xb6   :  { %1135 = vmatmul.mubr.f32.gmra.mxu1 %v64_v38  ;;  %1224 = vmatpush1.msra.mxu0 %v460_v39  ;;  %v150_v38 = vld [vmem:[%s4320_s0 + $0x440] sm:$0xff]  ;;  %v493_v39 = vld [vmem:[%s4319_s1 + $0x978] sm:$0xff] }
  0xb7   :  { %1225 = vmatprep.subr.mxu0 %v459_v40  ;;  %979 = vmatprep.mubr.f32.mxu0 %v74_v41  ;;  %v152_v40 = vld [vmem:[%s4320_s0 + $0x450] sm:$0xff] }
  0xb8   :  { %1226 = vmatpush1.msra.mxu0 %v458_v42  ;;  %1140 = vmatprep.mubr.f32.mxu1 %v76_v43  ;;  %v492_v41 = vld [vmem:[%s4319_s1 + $0x970] sm:$0xff]  ;;  %v491_v42 = vld [vmem:[%s4319_s1 + $0x968] sm:$0xff]  ;;  %v162_v43 = vld [vmem:[%s4320_s0 + $0x4a0] sm:$0xff] }
  0xb9   :  { %980 = vmatmul.mubr.f32.gmra.mxu0 %v73_v44  ;;  %1227 = vmatprep.subr.mxu0 %v457_v45  ;;  %v490_v44 = vld [vmem:[%s4319_s1 + $0x960] sm:$0xff]  ;;  %v164_v45 = vld [vmem:[%s4320_s0 + $0x4b0] sm:$0xff] }
  0xba   :  { %1141 = vmatmul.mubr.f32.gmra.mxu1 %v75_v46  ;;  %1228 = vmatpush1.msra.mxu0 %v456_v47  ;;  %v161_v46 = vld [vmem:[%s4320_s0 + $0x498] sm:$0xff] }
  0xbb   :  { %1229 = vmatprep.subr.mxu0 %v455_v48  ;;  %985 = vmatprep.mubr.f32.mxu0 %v85_v49  ;;  %v489_v47 = vld [vmem:[%s4319_s1 + $0x958] sm:$0xff]  ;;  %v163_v48 = vld [vmem:[%s4320_s0 + $0x4a8] sm:$0xff]  ;;  %v488_v49 = vld [vmem:[%s4319_s1 + $0x950] sm:$0xff] }
  0xbc   :  { %1230 = vmatpush1.msra.mxu0 %v454_v50  ;;  %1146 = vmatprep.mubr.f32.mxu1 %v87_v51  ;;  %v487_v50 = vld [vmem:[%s4319_s1 + $0x948] sm:$0xff]  ;;  %v173_v51 = vld [vmem:[%s4320_s0 + $0x4f8] sm:$0xff] }
  0xbd   :  { %986 = vmatmul.mubr.f32.gmra.mxu0 %v84_v52  ;;  %1231 = vmatprep.subr.mxu0 %v453_v53  ;;  %v486_v52 = vld [vmem:[%s4319_s1 + $0x940] sm:$0xff]  ;;  %v175_v53 = vld [vmem:[%s4320_s0 + $0x508] sm:$0xff] }
  0xbe   :  { %1147 = vmatmul.mubr.f32.gmra.mxu1 %v86_v54  ;;  %1232 = vmatpush1.msra.mxu0 %v452_v55  ;;  %v172_v54 = vld [vmem:[%s4320_s0 + $0x4f0] sm:$0xff]  ;;  %v485_v55 = vld [vmem:[%s4319_s1 + $0x938] sm:$0xff] }
  0xbf   :  { %1233 = vmatprep.subr.mxu0 %v451_v56  ;;  %991 = vmatprep.mubr.f32.mxu0 %v96_v57  ;;  %v174_v56 = vld [vmem:[%s4320_s0 + $0x500] sm:$0xff]  ;;  %v484_v57 = vld [vmem:[%s4319_s1 + $0x930] sm:$0xff] }
  0xc0   :  { %1234 = vmatpush1.msra.mxu0 %v450_v58  ;;  %1152 = vmatprep.mubr.f32.mxu1 %v98_v59  ;;  %v483_v58 = vld [vmem:[%s4319_s1 + $0x928] sm:$0xff]  ;;  %v184_v59 = vld [vmem:[%s4320_s0 + $0x550] sm:$0xff] }
  0xc1   :  { %992 = vmatmul.mubr.f32.gmra.mxu0 %v95_v60  ;;  %1235 = vmatprep.subr.mxu0 %v449_v61  ;;  %v482_v60 = vld [vmem:[%s4319_s1 + $0x920] sm:$0xff] }
  0xc2   :  { %1153 = vmatmul.mubr.f32.gmra.mxu1 %v97_v62  ;;  %1236 = vmatpush1.msra.mxu0 %v448_v63  ;;  %v186_v61 = vld [vmem:[%s4320_s0 + $0x560] sm:$0xff]  ;;  %v183_v62 = vld [vmem:[%s4320_s0 + $0x548] sm:$0xff]  ;;  %v481_v63 = vld [vmem:[%s4319_s1 + $0x918] sm:$0xff] }
  0xc3   :  { %1237 = vmatprep.subr.mxu0 %v447_v0  ;;  %997 = vmatprep.mubr.f32.mxu0 %v107_v1  ;;  %v185_v0 = vld [vmem:[%s4320_s0 + $0x558] sm:$0xff]  ;;  %v480_v1 = vld [vmem:[%s4319_s1 + $0x910] sm:$0xff] }
  0xc4   :  { %1238 = vmatpush1.msra.mxu0 %v446_v2  ;;  %1158 = vmatprep.mubr.f32.mxu1 %v109_v3  ;;  %v479_v2 = vld [vmem:[%s4319_s1 + $0x908] sm:$0xff] }
  0xc5   :  { %998 = vmatmul.mubr.f32.gmra.mxu0 %v106_v4  ;;  %1239 = vmatprep.subr.mxu0 %v509_v5  ;;  %v23_v3 = vld [vmem:[%s4320_s0 + $0x48] sm:$0xff]  ;;  %v478_v4 = vld [vmem:[%s4319_s1 + $0x900] sm:$0xff] }
  0xc6   :  { %1159 = vmatmul.mubr.f32.gmra.mxu1 %v108_v6  ;;  %1240 = vmatpush2.msra.mxu0 %v508_v7  ;;  %v22_v5 = vld [vmem:[%s4320_s0 + $0x40] sm:$0xff]  ;;  %v24_v6 = vld [vmem:[%s4320_s0 + $0x50] sm:$0xff] }
  0xc7   :  { %1241 = vmatprep.subr.mxu0 %v507_v8  ;;  %1003 = vmatprep.mubr.f32.mxu0 %v118_v10  ;;  %v34_v7 = vld [vmem:[%s4320_s0 + $0xa0] sm:$0xff]  ;;  %v2093_v8 = vmov 0.0   ;;  %v35_v10 = vld [vmem:[%s4320_s0 + $0xa8] sm:$0xff] }
  0xc8   :  { %1242 = vmatpush2.msra.mxu0 %v506_v11  ;;  %1399 = vmatpush1.msra.mxu1 %v510_v12  ;;  %v45_v11 = vld [vmem:[%s4320_s0 + $0xf8] sm:$0xff]  ;;  %v44_v12 = vld [vmem:[%s4320_s0 + $0xf0] sm:$0xff] }
  0xc9   :  { %1004 = vmatmul.mubr.f32.gmra.mxu0 %v117_v13  ;;  %1164 = vmatprep.mubr.f32.mxu1 %v120_v14  ;;  %v46_v13 = vld [vmem:[%s4320_s0 + $0x100] sm:$0xff]  ;;  %v56_v14 = vld [vmem:[%s4320_s0 + $0x150] sm:$0xff] }
  0xca   :  { %1243 = vmatprep.subr.mxu0 %v505_v15  ;;  %1165 = vmatmul.mubr.f32.gmra.mxu1 %v119_v16  ;;  %v55_v15 = vld [vmem:[%s4320_s0 + $0x148] sm:$0xff]  ;;  %v57_v16 = vld [vmem:[%s4320_s0 + $0x158] sm:$0xff] }
  0xcb   :  { %1244 = vmatpush2.msra.mxu0 %v504_v17  ;;  %1009 = vmatprep.mubr.f32.mxu0 %v129_v19  ;;  %v67_v17 = vld [vmem:[%s4320_s0 + $0x1a8] sm:$0xff]  ;;  %v68_v19 = vld [vmem:[%s4320_s0 + $0x1b0] sm:$0xff] }
  0xcc   :  { %1245 = vmatprep.subr.mxu0 %v503_v18  ;;  %1170 = vmatprep.mubr.f32.mxu1 %v131_v21  ;;  %v66_v18 = vld [vmem:[%s4320_s0 + $0x1a0] sm:$0xff]  ;;  %v77_v21 = vld [vmem:[%s4320_s0 + $0x1f8] sm:$0xff] }
  0xcd   :  { %1246 = vmatpush2.msra.mxu0 %v502_v20  ;;  %v78_v20 = vld [vmem:[%s4320_s0 + $0x200] sm:$0xff] }
  0xce   :  { %1010 = vmatmul.mubr.f32.gmra.mxu0 %v128_v22  ;;  %1247 = vmatprep.subr.mxu0 %v501_v23  ;;  %v79_v22 = vld [vmem:[%s4320_s0 + $0x208] sm:$0xff]  ;;  %v89_v23 = vld [vmem:[%s4320_s0 + $0x258] sm:$0xff] }
  0xcf   :  { %1171 = vmatmul.mubr.f32.gmra.mxu1 %v130_v24  ;;  %1248 = vmatpush2.msra.mxu0 %v500_v25  ;;  %v88_v24 = vld [vmem:[%s4320_s0 + $0x250] sm:$0xff]  ;;  %v90_v25 = vld [vmem:[%s4320_s0 + $0x260] sm:$0xff] }
  0xd0   :  { %1249 = vmatprep.subr.mxu0 %v499_v26  ;;  %1015 = vmatprep.mubr.f32.mxu0 %v140_v27  ;;  %v100_v26 = vld [vmem:[%s4320_s0 + $0x2b0] sm:$0xff]  ;;  %v99_v27 = vld [vmem:[%s4320_s0 + $0x2a8] sm:$0xff] }
  0xd1   :  { %1250 = vmatpush2.msra.mxu0 %v498_v28  ;;  %1176 = vmatprep.mubr.f32.mxu1 %v142_v29  ;;  %v101_v28 = vld [vmem:[%s4320_s0 + $0x2b8] sm:$0xff]  ;;  %v111_v29 = vld [vmem:[%s4320_s0 + $0x308] sm:$0xff] }
  0xd2   :  { %1016 = vmatmul.mubr.f32.gmra.mxu0 %v139_v30  ;;  %1251 = vmatprep.subr.mxu0 %v497_v31  ;;  %v110_v30 = vld [vmem:[%s4320_s0 + $0x300] sm:$0xff]  ;;  %v112_v31 = vld [vmem:[%s4320_s0 + $0x310] sm:$0xff] }
  0xd3   :  { %1177 = vmatmul.mubr.f32.gmra.mxu1 %v141_v32  ;;  %1252 = vmatpush2.msra.mxu0 %v496_v33  ;;  %v122_v32 = vld [vmem:[%s4320_s0 + $0x360] sm:$0xff] }
  0xd4   :  { %1253 = vmatprep.subr.mxu0 %v495_v34  ;;  %1021 = vmatprep.mubr.f32.mxu0 %v151_v35 }
  0xd5   :  { %1254 = vmatpush2.msra.mxu0 %v494_v36  ;;  %1182 = vmatprep.mubr.f32.mxu1 %v153_v37 }
  0xd6   :  { %1022 = vmatmul.mubr.f32.gmra.mxu0 %v150_v38  ;;  %1255 = vmatprep.subr.mxu0 %v493_v39  ;;  %v121_v38 = vld [vmem:[%s4320_s0 + $0x358] sm:$0xff] }
  0xd7   :  { %1183 = vmatmul.mubr.f32.gmra.mxu1 %v152_v40  ;;  %1256 = vmatpush2.msra.mxu0 %v492_v41  ;;  %v123_v40 = vld [vmem:[%s4320_s0 + $0x368] sm:$0xff]  ;;  %v133_v41 = vld [vmem:[%s4320_s0 + $0x3b8] sm:$0xff] }
  0xd8   :  { %1257 = vmatprep.subr.mxu0 %v491_v42  ;;  %1027 = vmatprep.mubr.f32.mxu0 %v162_v43 }
  0xd9   :  { %1258 = vmatpush2.msra.mxu0 %v490_v44  ;;  %1188 = vmatprep.mubr.f32.mxu1 %v164_v45  ;;  %v132_v44 = vld [vmem:[%s4320_s0 + $0x3b0] sm:$0xff] }
  0xda   :  { %1028 = vmatmul.mubr.f32.gmra.mxu0 %v161_v46  ;;  %1259 = vmatprep.subr.mxu0 %v489_v47  ;;  %v134_v47 = vld [vmem:[%s4320_s0 + $0x3c0] sm:$0xff] }
  0xdb   :  { %1189 = vmatmul.mubr.f32.gmra.mxu1 %v163_v48  ;;  %1260 = vmatpush2.msra.mxu0 %v488_v49  ;;  %v144_v48 = vld [vmem:[%s4320_s0 + $0x410] sm:$0xff] }
  0xdc   :  { %1261 = vmatprep.subr.mxu0 %v487_v50  ;;  %1033 = vmatprep.mubr.f32.mxu0 %v173_v51  ;;  %v143_v51 = vld [vmem:[%s4320_s0 + $0x408] sm:$0xff] }
  0xdd   :  { %1262 = vmatpush2.msra.mxu0 %v486_v52  ;;  %1194 = vmatprep.mubr.f32.mxu1 %v175_v53  ;;  %v145_v53 = vld [vmem:[%s4320_s0 + $0x418] sm:$0xff] }
  0xde   :  { %1034 = vmatmul.mubr.f32.gmra.mxu0 %v172_v54  ;;  %1263 = vmatprep.subr.mxu0 %v485_v55  ;;  %v155_v54 = vld [vmem:[%s4320_s0 + $0x468] sm:$0xff] }
  0xdf   :  { %1195 = vmatmul.mubr.f32.gmra.mxu1 %v174_v56  ;;  %1264 = vmatpush2.msra.mxu0 %v484_v57 }
  0xe0   :  { %1265 = vmatprep.subr.mxu0 %v483_v58  ;;  %1039 = vmatprep.mubr.f32.mxu0 %v184_v59  ;;  %v154_v59 = vld [vmem:[%s4320_s0 + $0x460] sm:$0xff] }
  0xe1   :  { %1266 = vmatpush2.msra.mxu0 %v482_v60  ;;  %1200 = vmatprep.mubr.f32.mxu1 %v186_v61  ;;  %v156_v61 = vld [vmem:[%s4320_s0 + $0x470] sm:$0xff] }
  0xe2   :  { %1040 = vmatmul.mubr.f32.gmra.mxu0 %v183_v62  ;;  %1267 = vmatprep.subr.mxu0 %v481_v63  ;;  %v166_v62 = vld [vmem:[%s4320_s0 + $0x4c0] sm:$0xff] }
  0xe3   :  { %1201 = vmatmul.mubr.f32.gmra.mxu1 %v185_v0  ;;  %1268 = vmatpush2.msra.mxu0 %v480_v1  ;;  %v165_v1 = vld [vmem:[%s4320_s0 + $0x4b8] sm:$0xff] }
  0xe4   :  { %1269 = vmatprep.subr.mxu0 %v479_v2  ;;  %1271 = vmatprep.mubr.f32.mxu0 %v23_v3 }
  0xe5   :  { %1270 = vmatpush2.msra.mxu0 %v478_v4  ;;  %1432 = vmatprep.mubr.f32.mxu1 %v2093_v8  ;;  %v167_v4 = vld [vmem:[%s4320_s0 + $0x4c8] sm:$0xff] }
  0xe6   :  { %1272 = vmatmul.mubr.f32.vlgmr.msra.gmra.mxu0 %v22_v5  ;;  %v177_v5 = vld [vmem:[%s4320_s0 + $0x518] sm:$0xff] }
  0xe7   :  { %2068 = vmatmul.mubr.msk.f32.vlgmr.msra.gmra.mxu1 %vm514_vm0, %v24_v6  ;;  %1277 = vmatprep.mubr.f32.mxu0 %v34_v7 }
  0xe8   :  { %1438 = vmatprep.mubr.f32.mxu1 %v2093_v8 }
  0xea   :  { %1278 = vmatmul.mubr.f32.gmra.mxu0 %v33_v9  ;;  %v176_v9 = vld [vmem:[%s4320_s0 + $0x510] sm:$0xff] }
  0xeb   :  { %2069 = vmatmul.mubr.msk.f32.gmra.mxu1 %vm514_vm0, %v35_v10  ;;  %1283 = vmatprep.mubr.f32.mxu0 %v45_v11  ;;  %v178_v11 = vld [vmem:[%s4320_s0 + $0x520] sm:$0xff] }
  0xec   :  { %1444 = vmatprep.mubr.f32.mxu1 %v2093_v8 }
  0xee   :  { %1284 = vmatmul.mubr.f32.gmra.mxu0 %v44_v12  ;;  %v188_v12 = vld [vmem:[%s4320_s0 + $0x570] sm:$0xff] }
  0xef   :  { %2070 = vmatmul.mubr.msk.f32.gmra.mxu1 %vm514_vm0, %v46_v13  ;;  %1289 = vmatprep.mubr.f32.mxu0 %v56_v14 }
  0xf0   :  { %1450 = vmatprep.mubr.f32.mxu1 %v2093_v8 }
  0xf2   :  { %1290 = vmatmul.mubr.f32.gmra.mxu0 %v55_v15 }
  0xf3   :  { %2071 = vmatmul.mubr.msk.f32.gmra.mxu1 %vm514_vm0, %v57_v16  ;;  %1295 = vmatprep.mubr.f32.mxu0 %v67_v17  ;;  %v187_v17 = vld [vmem:[%s4320_s0 + $0x568] sm:$0xff] }
  0xf4   :  { %1456 = vmatprep.mubr.f32.mxu1 %v2093_v8 }
  0xf6   :  { %1296 = vmatmul.mubr.f32.gmra.mxu0 %v66_v18 }
  0xf7   :  { %2072 = vmatmul.mubr.msk.f32.gmra.mxu1 %vm514_vm0, %v68_v19  ;;  %1301 = vmatprep.mubr.f32.mxu0 %v78_v20  ;;  %v189_v19 = vld [vmem:[%s4320_s0 + $0x578] sm:$0xff]  ;;  %s2094_s0 = smov 112  }
  0xf8   :  { %1462 = vmatprep.mubr.f32.mxu1 %v2093_v8 }
  0xfa   :  { %1302 = vmatmul.mubr.f32.gmra.mxu0 %v77_v21 }
  0xfb   :  { %2073 = vmatmul.mubr.msk.f32.gmra.mxu1 %vm514_vm0, %v79_v22  ;;  %1307 = vmatprep.mubr.f32.mxu0 %v89_v23 }
  0xfc   :  { %1468 = vmatprep.mubr.f32.mxu1 %v2093_v8 }
  0xfe   :  { %1308 = vmatmul.mubr.f32.gmra.mxu0 %v88_v24 }
  0xff   :  { %2074 = vmatmul.mubr.msk.f32.gmra.mxu1 %vm514_vm0, %v90_v25  ;;  %1313 = vmatprep.mubr.f32.mxu0 %v100_v26 }
 0x100   :  { %1474 = vmatprep.mubr.f32.mxu1 %v2093_v8 }
 0x102   :  { %1314 = vmatmul.mubr.f32.gmra.mxu0 %v99_v27 }
 0x103   :  { %2075 = vmatmul.mubr.msk.f32.gmra.mxu1 %vm514_vm0, %v101_v28  ;;  %1319 = vmatprep.mubr.f32.mxu0 %v111_v29  ;;  %v629_v33 = vpop.f32.mrf.mxu0 }
 0x104   :  { %1480 = vmatprep.mubr.f32.mxu1 %v2093_v8  ;;  %v790_v34 = vpop.f32.mrf.mxu1 }
 0x105   :  { %v3578_v35 = vadd.f32 %v790_v34, %v629_v33  ;;  %v631_v36 = vpop.f32.mrf.mxu0 }
 0x106   :  { %1320 = vmatmul.mubr.f32.gmra.mxu0 %v110_v30  ;;  %v792_v37 = vpop.f32.mrf.mxu1 }
 0x107   :  { %2076 = vmatmul.mubr.msk.f32.gmra.mxu1 %vm514_vm0, %v112_v31  ;;  %1325 = vmatprep.mubr.f32.mxu0 %v122_v32  ;;  %v3584_v39 = vadd.f32 %v792_v37, %v631_v36 }
 0x108   :  { %1486 = vmatprep.mubr.f32.mxu1 %v2093_v8 }
 0x109   :  { %v635_v42 = vpop.f32.mrf.mxu0  ;;  %v796_v43 = vpop.f32.mrf.mxu1 }
 0x10a   :  { %1326 = vmatmul.mubr.f32.gmra.mxu0 %v121_v38  ;;  %v3597_v45 = vadd.f32 %v796_v43, %v635_v42 }
 0x10b   :  { %2077 = vmatmul.mubr.msk.f32.gmra.mxu1 %vm514_vm0, %v123_v40  ;;  %1331 = vmatprep.mubr.f32.mxu0 %v133_v41  ;;  %v637_v46 = vpop.f32.mrf.mxu0  ;;  %v798_v49 = vpop.f32.mrf.mxu1 }
 0x10c   :  { %1492 = vmatprep.mubr.f32.mxu1 %v2093_v8  ;;  %v3606_v50 = vadd.f32 %v798_v49, %v637_v46 }
 0x10e   :  { %1332 = vmatmul.mubr.f32.gmra.mxu0 %v132_v44 }
 0x10f   :  { %2078 = vmatmul.mubr.msk.f32.gmra.mxu1 %vm514_vm0, %v134_v47  ;;  %1337 = vmatprep.mubr.f32.mxu0 %v144_v48  ;;  %v641_v52 = vpop.f32.mrf.mxu0  ;;  %v802_v55 = vpop.f32.mrf.mxu1 }
 0x110   :  { %1498 = vmatprep.mubr.f32.mxu1 %v2093_v8  ;;  %v3619_v56 = vadd.f32 %v802_v55, %v641_v52 }
 0x111   :  { %v643_v57 = vpop.f32.mrf.mxu0  ;;  %v804_v58 = vpop.f32.mrf.mxu1 }
 0x112   :  { %1338 = vmatmul.mubr.f32.gmra.mxu0 %v143_v51  ;;  %v3625_v60 = vadd.f32 %v804_v58, %v643_v57 }
 0x113   :  { %2079 = vmatmul.mubr.msk.f32.gmra.mxu1 %vm514_vm0, %v145_v53  ;;  %1343 = vmatprep.mubr.f32.mxu0 %v155_v54 }
 0x114   :  { %1504 = vmatprep.mubr.f32.mxu1 %v2093_v8 }
 0x115   :  { %v647_v63 = vpop.f32.mrf.mxu0  ;;  %v808_v0 = vpop.f32.mrf.mxu1 }
 0x116   :  { %1344 = vmatmul.mubr.f32.gmra.mxu0 %v154_v59  ;;  %v3638_v2 = vadd.f32 %v808_v0, %v647_v63 }
 0x117   :  { %2080 = vmatmul.mubr.msk.f32.gmra.mxu1 %vm514_vm0, %v156_v61  ;;  %1349 = vmatprep.mubr.f32.mxu0 %v166_v62  ;;  %v649_v3 = vpop.f32.mrf.mxu0  ;;  %v810_v6 = vpop.f32.mrf.mxu1 }
 0x118   :  { %1510 = vmatprep.mubr.f32.mxu1 %v2093_v8  ;;  %v3647_v7 = vadd.f32 %v810_v6, %v649_v3 }
 0x11a   :  { %1350 = vmatmul.mubr.f32.gmra.mxu0 %v165_v1 }
 0x11b   :  { %2081 = vmatmul.mubr.msk.f32.gmra.mxu1 %vm514_vm0, %v167_v4  ;;  %1355 = vmatprep.mubr.f32.mxu0 %v177_v5  ;;  %v653_v10 = vpop.f32.mrf.mxu0  ;;  %v814_v13 = vpop.f32.mrf.mxu1 }
 0x11c   :  { %1516 = vmatprep.mubr.f32.mxu1 %v2093_v8  ;;  %v3660_v14 = vadd.f32 %v814_v13, %v653_v10 }
 0x11d   :  { %v655_v15 = vpop.f32.mrf.mxu0  ;;  %v816_v16 = vpop.f32.mrf.mxu1 }
 0x11e   :  { %1356 = vmatmul.mubr.f32.gmra.mxu0 %v176_v9  ;;  %v3666_v18 = vadd.f32 %v816_v16, %v655_v15 }
 0x11f   :  { %2082 = vmatmul.mubr.msk.f32.gmra.mxu1 %vm514_vm0, %v178_v11  ;;  %1361 = vmatprep.mubr.f32.mxu0 %v188_v12 }
 0x120   :  { %1522 = vmatprep.mubr.f32.mxu1 %v2093_v8 }
 0x121   :  { %v659_v20 = vpop.f32.mrf.mxu0  ;;  %v820_v21 = vpop.f32.mrf.mxu1 }
 0x122   :  { %1362 = vmatmul.mubr.f32.gmra.mxu0 %v187_v17  ;;  %v3673_v22 = vadd.f32 %v820_v21, %v659_v20 }
 0x123   :  { %2083 = vmatmul.mubr.msk.f32.gmra.mxu1 %vm514_vm0, %v189_v19  ;;  %v661_v23 = vpop.f32.mrf.mxu0  ;;  %v822_v24 = vpop.f32.mrf.mxu1 }
 0x124   :  { %v3675_v25 = vadd.f32 %v822_v24, %v661_v23 }
 0x127   :  { %v665_v26 = vpop.f32.mrf.mxu0  ;;  %v826_v27 = vpop.f32.mrf.mxu1 }
 0x128   :  { %v3677_v28 = vadd.f32 %v826_v27, %v665_v26 }
 0x129   :  { %v667_v8 = vpop.f32.mrf.mxu0  ;;  %v828_v29 = vpop.f32.mrf.mxu1 }
 0x12a   :  { %v3679_v30 = vadd.f32 %v828_v29, %v667_v8 }
 0x12d   :  { %v671_v31 = vpop.f32.mrf.mxu0  ;;  %v832_v32 = vpop.f32.mrf.mxu1 }
 0x12e   :  { %v3681_v33 = vadd.f32 %v832_v32, %v671_v31 }
 0x12f   :  { %v673_v34 = vpop.f32.mrf.mxu0  ;;  %v834_v36 = vpop.f32.mrf.mxu1 }
 0x130   :  { %v3683_v37 = vadd.f32 %v834_v36, %v673_v34 }
 0x133   :  { %v677_v38 = vpop.f32.mrf.mxu0  ;;  %v838_v40 = vpop.f32.mrf.mxu1 }
 0x134   :  { %v3685_v41 = vadd.f32 %v838_v40, %v677_v38 }
 0x135   :  { %v679_v42 = vpop.f32.mrf.mxu0  ;;  %v840_v43 = vpop.f32.mrf.mxu1 }
 0x136   :  { %v3687_v44 = vadd.f32 %v840_v43, %v679_v42 }
 0x139   :  { %v683_v46 = vpop.f32.mrf.mxu0  ;;  %v844_v47 = vpop.f32.mrf.mxu1 }
 0x13a   :  { %v3689_v48 = vadd.f32 %v844_v47, %v683_v46 }
 0x13b   :  { %v685_v49 = vpop.f32.mrf.mxu0  ;;  %v846_v51 = vpop.f32.mrf.mxu1 }
 0x13c   :  { %v3691_v52 = vadd.f32 %v846_v51, %v685_v49 }
 0x13f   :  { %v689_v53 = vpop.f32.mrf.mxu0  ;;  %v850_v54 = vpop.f32.mrf.mxu1 }
 0x140   :  { %v3693_v55 = vadd.f32 %v850_v54, %v689_v53 }
 0x141   :  { %v691_v57 = vpop.f32.mrf.mxu0  ;;  %v852_v58 = vpop.f32.mrf.mxu1 }
 0x142   :  { %v3695_v59 = vadd.f32 %v852_v58, %v691_v57 }
 0x145   :  { %v695_v61 = vpop.f32.mrf.mxu0  ;;  %v856_v62 = vpop.f32.mrf.mxu1 }
 0x146   :  { %v3697_v63 = vadd.f32 %v856_v62, %v695_v61 }
 0x147   :  { %v697_v0 = vpop.f32.mrf.mxu0  ;;  %v858_v1 = vpop.f32.mrf.mxu1 }
 0x148   :  { %v3699_v3 = vadd.f32 %v858_v1, %v697_v0 }
 0x14b   :  { %v701_v4 = vpop.f32.mrf.mxu0  ;;  %v862_v5 = vpop.f32.mrf.mxu1 }
 0x14c   :  { %v3701_v6 = vadd.f32 %v862_v5, %v701_v4 }
 0x14d   :  { %v703_v9 = vpop.f32.mrf.mxu0  ;;  %v864_v10 = vpop.f32.mrf.mxu1 }
 0x14e   :  { %v3703_v11 = vadd.f32 %v864_v10, %v703_v9 }
 0x151   :  { %v707_v12 = vpop.f32.mrf.mxu0  ;;  %v868_v13 = vpop.f32.mrf.mxu1 }
 0x152   :  { %v3705_v15 = vadd.f32 %v868_v13, %v707_v12 }
 0x153   :  { %v709_v16 = vpop.f32.mrf.mxu0  ;;  %v870_v17 = vpop.f32.mrf.mxu1 }
 0x154   :  { %v3707_v19 = vadd.f32 %v870_v17, %v709_v16 }
 0x157   :  { %v713_v20 = vpop.f32.mrf.mxu0  ;;  %v874_v21 = vpop.f32.mrf.mxu1 }
 0x158   :  { %v3709_v23 = vadd.f32 %v874_v21, %v713_v20 }
 0x159   :  { %v715_v24 = vpop.f32.mrf.mxu0  ;;  %v876_v26 = vpop.f32.mrf.mxu1 }
 0x15a   :  { %v3711_v27 = vadd.f32 %v876_v26, %v715_v24 }
 0x15d   :  { %v719_v8 = vpop.f32.mrf.mxu0  ;;  %v880_v29 = vpop.f32.mrf.mxu1 }
 0x15e   :  { %v3713_v31 = vadd.f32 %v880_v29, %v719_v8 }
 0x15f   :  { %v721_v32 = vpop.f32.mrf.mxu0  ;;  %v882_v34 = vpop.f32.mrf.mxu1 }
 0x160   :  { %v3715_v36 = vadd.f32 %v882_v34, %v721_v32 }
 0x162   :  { %v3717_v38 = vpop.f32.mrf.mxu0 }
 0x164   :  { %v3719_v40 = vpop.f32.mrf.mxu1  ;;  %v953_v42 = vpop.f32.mrf.mxu0 }
 0x165   :  { %v954_v43 = vadd.f32 %v953_v42, %v3584_v39 }
 0x166   :  { %v1114_v46 = vpop.f32.mrf.mxu1 }
 0x167   :  { %v3722_v47 = vadd.f32 %v1114_v46, %v954_v43 }
 0x168   :  { %v3724_v49 = vpop.f32.mrf.mxu0 }
 0x169   :  { %v3726_v51 = vpop.f32.mrf.mxu1 }
 0x16a   :  { %v959_v53 = vpop.f32.mrf.mxu0 }
 0x16b   :  { %v960_v54 = vadd.f32 %v959_v53, %v3606_v50  ;;  %v1120_v57 = vpop.f32.mrf.mxu1 }
 0x16d   :  { %v3729_v58 = vadd.f32 %v1120_v57, %v960_v54  ;;  %v963_v61 = vpop.f32.mrf.mxu0 }
 0x16e   :  { %v964_v62 = vadd.f32 %v963_v61, %v3619_v56  ;;  %v1124_v0 = vpop.f32.mrf.mxu1 }
 0x16f   :  { %v965_v1 = vpop.f32.mrf.mxu0 }
 0x170   :  { %v3732_v4 = vadd.f32 %v1124_v0, %v964_v62  ;;  %v966_v39 = vadd.f32 %v965_v1, %v3625_v60  ;;  %v1126_v5 = vpop.f32.mrf.mxu1 }
 0x171   :  { %v969_v9 = vpop.f32.mrf.mxu0 }
 0x172   :  { %v3735_v10 = vadd.f32 %v1126_v5, %v966_v39  ;;  %v970_v12 = vadd.f32 %v969_v9, %v3638_v2  ;;  %v1130_v13 = vpop.f32.mrf.mxu1 }
 0x173   :  { %v971_v50 = vpop.f32.mrf.mxu0 }
 0x174   :  { %v3738_v16 = vadd.f32 %v1130_v13, %v970_v12  ;;  %v972_v17 = vadd.f32 %v971_v50, %v3647_v7  ;;  %v1132_v20 = vpop.f32.mrf.mxu1 }
 0x175   :  { %v975_v56 = vpop.f32.mrf.mxu0 }
 0x176   :  { %v3741_v21 = vadd.f32 %v1132_v20, %v972_v17  ;;  %v976_v24 = vadd.f32 %v975_v56, %v3660_v14  ;;  %v1136_v26 = vpop.f32.mrf.mxu1 }
 0x177   :  { %v977_v60 = vpop.f32.mrf.mxu0 }
 0x178   :  { %v3744_v8 = vadd.f32 %v1136_v26, %v976_v24  ;;  %v978_v29 = vadd.f32 %v977_v60, %v3666_v18  ;;  %v1138_v32 = vpop.f32.mrf.mxu1 }
 0x179   :  { %v981_v2 = vpop.f32.mrf.mxu0 }
 0x17a   :  { %v3747_v34 = vadd.f32 %v1138_v32, %v978_v29  ;;  %v982_v42 = vadd.f32 %v981_v2, %v3673_v22  ;;  %v1142_v43 = vpop.f32.mrf.mxu1 }
 0x17b   :  { %v983_v7 = vpop.f32.mrf.mxu0 }
 0x17c   :  { %v3750_v46 = vadd.f32 %v1142_v43, %v982_v42  ;;  %v984_v53 = vadd.f32 %v983_v7, %v3675_v25  ;;  %v1144_v54 = vpop.f32.mrf.mxu1 }
 0x17d   :  { %v987_v14 = vpop.f32.mrf.mxu0 }
 0x17e   :  { %v3753_v57 = vadd.f32 %v1144_v54, %v984_v53  ;;  %v988_v61 = vadd.f32 %v987_v14, %v3677_v28  ;;  %v1148_v62 = vpop.f32.mrf.mxu1 }
 0x17f   :  { %v989_v18 = vpop.f32.mrf.mxu0 }
 0x180   :  { %v3756_v0 = vadd.f32 %v1148_v62, %v988_v61  ;;  %v990_v1 = vadd.f32 %v989_v18, %v3679_v30  ;;  %v1150_v39 = vpop.f32.mrf.mxu1 }
 0x181   :  { %v993_v22 = vpop.f32.mrf.mxu0 }
 0x182   :  { %v3759_v5 = vadd.f32 %v1150_v39, %v990_v1  ;;  %v994_v9 = vadd.f32 %v993_v22, %v3681_v33  ;;  %v1154_v12 = vpop.f32.mrf.mxu1 }
 0x183   :  { %v995_v25 = vpop.f32.mrf.mxu0 }
 0x184   :  { %v3762_v13 = vadd.f32 %v1154_v12, %v994_v9  ;;  %v996_v50 = vadd.f32 %v995_v25, %v3683_v37  ;;  %v1156_v17 = vpop.f32.mrf.mxu1 }
 0x185   :  { %v999_v28 = vpop.f32.mrf.mxu0 }
 0x186   :  { %v3765_v20 = vadd.f32 %v1156_v17, %v996_v50  ;;  %v1000_v56 = vadd.f32 %v999_v28, %v3685_v41  ;;  %v1160_v24 = vpop.f32.mrf.mxu1 }
 0x187   :  { %v1001_v30 = vpop.f32.mrf.mxu0 }
 0x188   :  { %v3768_v26 = vadd.f32 %v1160_v24, %v1000_v56  ;;  %v1002_v60 = vadd.f32 %v1001_v30, %v3687_v44  ;;  %v1162_v29 = vpop.f32.mrf.mxu1 }
 0x189   :  { %v1005_v33 = vpop.f32.mrf.mxu0 }
 0x18a   :  { %v3771_v32 = vadd.f32 %v1162_v29, %v1002_v60  ;;  %v1006_v2 = vadd.f32 %v1005_v33, %v3689_v48  ;;  %v1166_v42 = vpop.f32.mrf.mxu1 }
 0x18b   :  { %v1007_v37 = vpop.f32.mrf.mxu0 }
 0x18c   :  { %v3774_v43 = vadd.f32 %v1166_v42, %v1006_v2  ;;  %v1008_v7 = vadd.f32 %v1007_v37, %v3691_v52  ;;  %v1168_v53 = vpop.f32.mrf.mxu1 }
 0x18e   :  { %v3777_v41 = vadd.f32 %v1168_v53, %v1008_v7  ;;  %v1011_v54 = vpop.f32.mrf.mxu0 }
 0x18f   :  { %v1012_v14 = vadd.f32 %v1011_v54, %v3693_v55  ;;  %v1172_v61 = vpop.f32.mrf.mxu1 }
 0x190   :  { %v1013_v44 = vpop.f32.mrf.mxu0 }
 0x191   :  { %v3780_v62 = vadd.f32 %v1172_v61, %v1012_v14  ;;  %v1014_v18 = vadd.f32 %v1013_v44, %v3695_v59  ;;  %v1174_v1 = vpop.f32.mrf.mxu1  ;;  %v952_v61 = vadd.f32 %v3717_v38, %v3578_v35 }
 0x192   :  { %v1017_v48 = vpop.f32.mrf.mxu0 }
 0x193   :  { %v3783_v39 = vadd.f32 %v1174_v1, %v1014_v18  ;;  %v1018_v22 = vadd.f32 %v1017_v48, %v3697_v63  ;;  %v1178_v9 = vpop.f32.mrf.mxu1 }
 0x194   :  { %v1019_v52 = vpop.f32.mrf.mxu0 }
 0x195   :  { %v3786_v12 = vadd.f32 %v1178_v9, %v1018_v22  ;;  %v1020_v25 = vadd.f32 %v1019_v52, %v3699_v3  ;;  %v1180_v50 = vpop.f32.mrf.mxu1  ;;  %v1113_v52 = vadd.f32 %v3719_v40, %v952_v61 }
 0x196   :  { %v1023_v55 = vpop.f32.mrf.mxu0 }
 0x197   :  { %v3789_v17 = vadd.f32 %v1180_v50, %v1020_v25  ;;  %v1024_v28 = vadd.f32 %v1023_v55, %v3701_v6  ;;  %v1184_v56 = vpop.f32.mrf.mxu1 }
 0x198   :  { %v1025_v59 = vpop.f32.mrf.mxu0 }
 0x199   :  { %v3792_v24 = vadd.f32 %v1184_v56, %v1024_v28  ;;  %v1026_v30 = vadd.f32 %v1025_v59, %v3703_v11  ;;  %v1186_v60 = vpop.f32.mrf.mxu1 }
 0x19a   :  { %v1029_v63 = vpop.f32.mrf.mxu0 }
 0x19b   :  { %v3795_v29 = vadd.f32 %v1186_v60, %v1026_v30  ;;  %v1030_v33 = vadd.f32 %v1029_v63, %v3705_v15  ;;  %v1190_v2 = vpop.f32.mrf.mxu1 }
 0x19c   :  { %v1031_v3 = vpop.f32.mrf.mxu0 }
 0x19d   :  { %v3798_v42 = vadd.f32 %v1190_v2, %v1030_v33  ;;  %v1032_v37 = vadd.f32 %v1031_v3, %v3707_v19  ;;  %v1192_v7 = vpop.f32.mrf.mxu1 }
 0x19e   :  { %v1035_v6 = vpop.f32.mrf.mxu0 }
 0x19f   :  { %v3801_v53 = vadd.f32 %v1192_v7, %v1032_v37  ;;  %v1036_v54 = vadd.f32 %v1035_v6, %v3709_v23  ;;  %v1196_v14 = vpop.f32.mrf.mxu1  ;;  %v958_v23 = vadd.f32 %v3724_v49, %v3597_v45 }
 0x1a0   :  { %v1037_v11 = vpop.f32.mrf.mxu0 }
 0x1a1   :  { %v3806_v44 = vadd.f32 %v1196_v14, %v1036_v54  ;;  %v1038_v15 = vadd.f32 %v1037_v11, %v3711_v27  ;;  %v1198_v18 = vpop.f32.mrf.mxu1 }
 0x1a2   :  { %v1041_v1 = vpop.f32.mrf.mxu0 }
 0x1a3   :  { %v3809_v48 = vadd.f32 %v1198_v18, %v1038_v15  ;;  %v1042_v19 = vadd.f32 %v1041_v1, %v3713_v31  ;;  %v1202_v22 = vpop.f32.mrf.mxu1  ;;  %v1119_v31 = vadd.f32 %v3726_v51, %v958_v23 }
 0x1a4   :  { %v1043_v9 = vpop.f32.mrf.mxu0 }
 0x1a5   :  { %v3815_v25 = vadd.f32 %v1202_v22, %v1042_v19  ;;  %v1044_v35 = vadd.f32 %v1043_v9, %v3715_v36  ;;  %v1204_v38 = vpop.f32.mrf.mxu1 }
 0x1a6   :  { %v1273_v50 = vpop.f32.mrf.mxu0 }
 0x1a7   :  { %v3818_v27 = vadd.f32 %v1204_v38, %v1044_v35  ;;  %v1274_v55 = vadd.f32 %v1273_v50, %v1113_v52  ;;  %v1434_v28 = vpop.f32.mrf.mxu1 }
 0x1a8   :  { %v1275_v56 = vpop.f32.mrf.mxu0 }
 0x1a9   :  { %v3821_v59 = vadd.f32 %v1434_v28, %v1274_v55  ;;  %v1276_v40 = vadd.f32 %v1275_v56, %v3722_v47  ;;  %v1436_v30 = vpop.f32.mrf.mxu1 }
 0x1aa   :  { %v1279_v60 = vpop.f32.mrf.mxu0 }
 0x1ab   :  { %v3824_v45 = vadd.f32 %v1436_v30, %v1276_v40  ;;  %v1280_v49 = vadd.f32 %v1279_v60, %v1119_v31  ;;  %v1440_v63 = vpop.f32.mrf.mxu1  ;;  %1545 = vrot.lane.b32.xlu0 %v3821_v59, %s2094_s0 }
 0x1ac   :  { %v1281_v36 = vpop.f32.mrf.mxu0 }
 0x1ad   :  { %v3828_v33 = vadd.f32 %v1440_v63, %v1280_v49  ;;  %v1282_v2 = vadd.f32 %v1281_v36, %v3729_v58  ;;  %v1442_v51 = vpop.f32.mrf.mxu1 }
 0x1ae   :  { %v1285_v3 = vpop.f32.mrf.mxu0 }
 0x1af   :  { %v3831_v37 = vadd.f32 %v1442_v51, %v1282_v2  ;;  %1611 = vrot.lane.b32.xlu1 %v3828_v33, %s2095_s9  ;;  %1609 = vrot.lane.b32.xlu0 %v3821_v59, %s2095_s9  ;;  %v1446_v47 = vpop.f32.mrf.mxu1  ;;  %v1286_v40 = vadd.f32 %v1285_v3, %v3732_v4 }
 0x1b0   :  { %v1287_v7 = vpop.f32.mrf.mxu0 }
 0x1b1   :  { %v1288_v6 = vadd.f32 %v1287_v7, %v3735_v10  ;;  %v1448_v54 = vpop.f32.mrf.mxu1  ;;  %v3889_v2 = vadd.f32 %v1446_v47, %v1286_v40 }
 0x1b2   :  { %v1291_v14 = vpop.f32.mrf.mxu0 }
 0x1b3   :  { %v3838_v11 = vadd.f32 %v1448_v54, %v1288_v6  ;;  %1675 = vrot.lane.b32.xlu1 %v3828_v33, %s2096_s10  ;;  %1673 = vrot.lane.b32.xlu0 %v3821_v59, %s2096_s10  ;;  %v1452_v58 = vpop.f32.mrf.mxu1  ;;  %v1292_v4 = vadd.f32 %v1291_v14, %v3738_v16 }
 0x1b4   :  { %v1293_v61 = vpop.f32.mrf.mxu0 }
 0x1b5   :  { %v1294_v15 = vadd.f32 %v1293_v61, %v3741_v21  ;;  %v1454_v18 = vpop.f32.mrf.mxu1  ;;  %v3903_v47 = vadd.f32 %v1452_v58, %v1292_v4 }
 0x1b6   :  { %v3845_v1 = vpop.f32.mrf.mxu0 }
 0x1b7   :  { %v3847_v19 = vadd.f32 %v1454_v18, %v1294_v15  ;;  %1739 = vrot.lane.b32.xlu1 %v3828_v33, %s2097_s11  ;;  %1737 = vrot.lane.b32.xlu0 %v3821_v59, %s2097_s11  ;;  %v3853_v10 = vpop.f32.mrf.mxu1 }
 0x1b8   :  { %v1299_v22 = vpop.f32.mrf.mxu0 }
 0x1b9   :  { %v1300_v9 = vadd.f32 %v1299_v22, %v3747_v34  ;;  %v1460_v52 = vpop.f32.mrf.mxu1 }
 0x1ba   :  { %v3856_v23 = vpop.f32.mrf.mxu0 }
 0x1bb   :  { %v3858_v21 = vadd.f32 %v1460_v52, %v1300_v9  ;;  %1803 = vrot.lane.b32.xlu1 %v3828_v33, %s2098_s12  ;;  %1801 = vrot.lane.b32.xlu0 %v3821_v59, %s2098_s12  ;;  %v3864_v35 = vpop.f32.mrf.mxu1 }
 0x1bc   :  { %v1305_v38 = vpop.f32.mrf.mxu0 }
 0x1bd   :  { %v1306_v50 = vadd.f32 %v1305_v38, %v3753_v57  ;;  %v1466_v55 = vpop.f32.mrf.mxu1 }
 0x1be   :  { %v3867_v28 = vpop.f32.mrf.mxu0 }
 0x1bf   :  { %v3869_v34 = vadd.f32 %v1466_v55, %v1306_v50  ;;  %1867 = vrot.lane.b32.xlu1 %v3828_v33, %s2099_s13  ;;  %1865 = vrot.lane.b32.xlu0 %v3821_v59, %s2099_s13  ;;  %v3875_v56 = vpop.f32.mrf.mxu1 }
 0x1c0   :  { %v1311_v31 = vpop.f32.mrf.mxu0 }
 0x1c1   :  { %v1312_v30 = vadd.f32 %v1311_v31, %v3759_v5  ;;  %v1472_v57 = vpop.f32.mrf.mxu1 }
 0x1c2   :  { %v3879_v60 = vpop.f32.mrf.mxu0 }
 0x1c3   :  { %v3881_v49 = vadd.f32 %v1472_v57, %v1312_v30  ;;  %1931 = vrot.lane.b32.xlu1 %v3828_v33, %s2100_s14  ;;  %1929 = vrot.lane.b32.xlu0 %v3821_v59, %s2100_s14  ;;  %v3887_v63 = vpop.f32.mrf.mxu1 }
 0x1c4   :  { %v1317_v36 = vpop.f32.mrf.mxu0 }
 0x1c5   :  { %v1318_v5 = vadd.f32 %v1317_v36, %v3765_v20  ;;  %v1478_v51 = vpop.f32.mrf.mxu1 }
 0x1c6   :  { %v3893_v3 = vpop.f32.mrf.mxu0 }
 0x1c7   :  { %v3895_v7 = vadd.f32 %v1478_v51, %v1318_v5  ;;  %1549 = vrot.lane.b32.xlu1 %v3889_v2, %s2094_s0  ;;  %1547 = vrot.lane.b32.xlu0 %v3828_v33, %s2094_s0  ;;  %v3901_v6 = vpop.f32.mrf.mxu1 }
 0x1c8   :  { %v1323_v54 = vpop.f32.mrf.mxu0 }
 0x1c9   :  { %v1324_v16 = vadd.f32 %v1323_v54, %v3771_v32  ;;  %v1484_v14 = vpop.f32.mrf.mxu1 }
 0x1ca   :  { %v3906_v20 = vpop.f32.mrf.mxu0 }
 0x1cb   :  { %v3908_v61 = vadd.f32 %v1484_v14, %v1324_v16  ;;  %1551 = vrot.lane.b32.xlu1 %v3903_v47, %s2094_s0  ;;  %1613 = vrot.lane.b32.xlu0 %v3889_v2, %s2095_s9  ;;  %v3914_v15 = vpop.f32.mrf.mxu1 }
 0x1cc   :  { %v1329_v18 = vpop.f32.mrf.mxu0 }
 0x1cd   :  { %v1330_v22 = vadd.f32 %v1329_v18, %v3777_v41  ;;  %v1490_v58 = vpop.f32.mrf.mxu1 }
 0x1ce   :  { %v3917_v9 = vpop.f32.mrf.mxu0 }
 0x1cf   :  { %v3919_v32 = vadd.f32 %v1490_v58, %v1330_v22  ;;  %1615 = vrot.lane.b32.xlu1 %v3903_v47, %s2095_s9  ;;  %1677 = vrot.lane.b32.xlu0 %v3889_v2, %s2096_s10  ;;  %v3925_v52 = vpop.f32.mrf.mxu1  ;;  %v1298_v58 = vadd.f32 %v3845_v1, %v3744_v8  ;;  %v1304_v8 = vadd.f32 %v3856_v23, %v3750_v46 }
 0x1d0   :  { %v1335_v38 = vpop.f32.mrf.mxu0  ;;  %v1310_v46 = vadd.f32 %v3867_v28, %v3756_v0 }
 0x1d1   :  { %v1336_v50 = vadd.f32 %v1335_v38, %v3783_v39  ;;  %v1496_v55 = vpop.f32.mrf.mxu1 }
 0x1d2   :  { %v3928_v31 = vpop.f32.mrf.mxu0 }
 0x1d3   :  { %v3930_v41 = vadd.f32 %v1496_v55, %v1336_v50  ;;  %1679 = vrot.lane.b32.xlu1 %v3903_v47, %s2096_s10  ;;  %1741 = vrot.lane.b32.xlu0 %v3889_v2, %s2097_s11  ;;  %v3936_v40 = vpop.f32.mrf.mxu1 }
 0x1d4   :  { %v1341_v30 = vpop.f32.mrf.mxu0 }
 0x1d5   :  { %v1342_v57 = vadd.f32 %v1341_v30, %v3789_v17  ;;  %v1502_v36 = vpop.f32.mrf.mxu1 }
 0x1d6   :  { %v3939_v4 = vpop.f32.mrf.mxu0 }
 0x1d7   :  { %v3941_v39 = vadd.f32 %v1502_v36, %v1342_v57  ;;  %1743 = vrot.lane.b32.xlu1 %v3903_v47, %s2097_s11  ;;  %1805 = vrot.lane.b32.xlu0 %v3889_v2, %s2098_s12  ;;  %v3947_v5 = vpop.f32.mrf.mxu1  ;;  %v3974_v36 = vadd.f32 %v3853_v10, %v1298_v58  ;;  %v1316_v10 = vadd.f32 %v3879_v60, %v3762_v13 }
 0x1d8   :  { %v1347_v51 = vpop.f32.mrf.mxu0  ;;  %v1322_v13 = vadd.f32 %v3893_v3, %v3768_v26 }
 0x1d9   :  { %v1348_v54 = vadd.f32 %v1347_v51, %v3795_v29  ;;  %v1508_v16 = vpop.f32.mrf.mxu1  ;;  %v4024_v0 = vadd.f32 %v3887_v63, %v1316_v10 }
 0x1da   :  { %v3950_v14 = vpop.f32.mrf.mxu0  ;;  %v4053_v23 = vadd.f32 %v3901_v6, %v1322_v13 }
 0x1db   :  { %v3952_v17 = vadd.f32 %v1508_v16, %v1348_v54  ;;  %1807 = vrot.lane.b32.xlu1 %v3903_v47, %s2098_s12  ;;  %1869 = vrot.lane.b32.xlu0 %v3889_v2, %s2099_s13  ;;  %v3958_v18 = vpop.f32.mrf.mxu1  ;;  %v3986_v54 = vadd.f32 %v3864_v35, %v1304_v8  ;;  %v1328_v35 = vadd.f32 %v3906_v20, %v3774_v43 }
 0x1dc   :  { %v1353_v22 = vpop.f32.mrf.mxu0 }
 0x1dd   :  { %v1354_v38 = vadd.f32 %v1353_v22, %v3801_v53  ;;  %v1514_v29 = vpop.f32.mrf.mxu1  ;;  %v4062_v26 = vadd.f32 %v3914_v15, %v1328_v35 }
 0x1de   :  { %v3963_v50 = vpop.f32.mrf.mxu0 }
 0x1df   :  { %v3965_v55 = vadd.f32 %v1514_v29, %v1354_v38  ;;  %1871 = vrot.lane.b32.xlu1 %v3903_v47, %s2099_s13  ;;  %1933 = vrot.lane.b32.xlu0 %v3889_v2, %s2100_s14  ;;  %v3971_v30 = vpop.f32.mrf.mxu1 }
 0x1e0   :  { %v1359_v57 = vpop.f32.mrf.mxu0 }
 0x1e1   :  { %v1360_v53 = vadd.f32 %v1359_v57, %v3809_v48  ;;  %v1520_v1 = vpop.f32.mrf.mxu1  ;;  %v4015_v48 = vadd.f32 %v3875_v56, %v1310_v46  ;;  %v1340_v46 = vadd.f32 %v3928_v31, %v3786_v12 }
 0x1e3   :  { %v3979_v51 = vadd.f32 %v1520_v1, %v1360_v53  ;;  %1935 = vrot.lane.b32.xlu1 %v3903_v47, %s2100_s14  ;;  %1553 = vrot.lane.b32.xlu0 %v3974_v36, %s2094_s0 }
 0x1e7   :  { %1555 = vrot.lane.b32.xlu1 %v3986_v54, %s2094_s0  ;;  %1617 = vrot.lane.b32.xlu0 %v3974_v36, %s2095_s9 }
 0x1eb   :  { %1619 = vrot.lane.b32.xlu1 %v3986_v54, %s2095_s9  ;;  %1681 = vrot.lane.b32.xlu0 %v3974_v36, %s2096_s10 }
 0x1ef   :  { %1683 = vrot.lane.b32.xlu1 %v3986_v54, %s2096_s10  ;;  %1745 = vrot.lane.b32.xlu0 %v3974_v36, %s2097_s11 }
 0x1f3   :  { %1747 = vrot.lane.b32.xlu1 %v3986_v54, %s2097_s11  ;;  %1809 = vrot.lane.b32.xlu0 %v3974_v36, %s2098_s12 }
 0x1f7   :  { %1811 = vrot.lane.b32.xlu1 %v3986_v54, %s2098_s12  ;;  %1873 = vrot.lane.b32.xlu0 %v3974_v36, %s2099_s13 }
 0x1fb   :  { %1875 = vrot.lane.b32.xlu1 %v3986_v54, %s2099_s13  ;;  %1937 = vrot.lane.b32.xlu0 %v3974_v36, %s2100_s14 }
 0x1ff   :  { %1939 = vrot.lane.b32.xlu1 %v3986_v54, %s2100_s14  ;;  %1557 = vrot.lane.b32.xlu0 %v4015_v48, %s2094_s0 }
 0x203   :  { %1559 = vrot.lane.b32.xlu1 %v4024_v0, %s2094_s0  ;;  %1621 = vrot.lane.b32.xlu0 %v4015_v48, %s2095_s9 }
 0x207   :  { %1623 = vrot.lane.b32.xlu1 %v4024_v0, %s2095_s9  ;;  %1685 = vrot.lane.b32.xlu0 %v4015_v48, %s2096_s10 }
 0x20b   :  { %1687 = vrot.lane.b32.xlu1 %v4024_v0, %s2096_s10  ;;  %1749 = vrot.lane.b32.xlu0 %v4015_v48, %s2097_s11 }
 0x20f   :  { %1751 = vrot.lane.b32.xlu1 %v4024_v0, %s2097_s11  ;;  %1813 = vrot.lane.b32.xlu0 %v4015_v48, %s2098_s12 }
 0x213   :  { %1815 = vrot.lane.b32.xlu1 %v4024_v0, %s2098_s12  ;;  %1877 = vrot.lane.b32.xlu0 %v4015_v48, %s2099_s13 }
 0x217   :  { %1879 = vrot.lane.b32.xlu1 %v4024_v0, %s2099_s13  ;;  %1941 = vrot.lane.b32.xlu0 %v4015_v48, %s2100_s14 }
 0x21b   :  { %1943 = vrot.lane.b32.xlu1 %v4024_v0, %s2100_s14  ;;  %1561 = vrot.lane.b32.xlu0 %v4053_v23, %s2094_s0 }
 0x21d   :  { %v1546_v28 = vpop.permute.xlu0 %1545 }
 0x21e   :  { %v1593_v20 = vmax.f32 %v3821_v59, %v1546_v28  ;;  %v1334_v59 = vadd.f32 %v3917_v9, %v3780_v62  ;;  %v4099_v62 = vld [vmem:[%s4321_s2] ss:$0 sm:$0xff] }
 0x21f   :  { %1563 = vrot.lane.b32.xlu1 %v4062_v26, %s2094_s0  ;;  %1625 = vrot.lane.b32.xlu0 %v4053_v23, %s2095_s9 }
 0x220   :  { %v4092_v1 = vadd.f32 %v3925_v52, %v1334_v59  ;;  %v4107_v52 = vadd.f32 %v3936_v40, %v1340_v46 }
 0x221   :  { %v1612_v56 = vpop.permute.xlu1 %1611  ;;  %v1610_v60 = vpop.permute.xlu0 %1609 }
 0x222   :  { %v1657_v15 = vmax.f32 %v1593_v20, %v1610_v60 }
 0x223   :  { %1627 = vrot.lane.b32.xlu1 %v4062_v26, %s2095_s9  ;;  %1689 = vrot.lane.b32.xlu0 %v4053_v23, %s2096_s10 }
 0x225   :  { %v1676_v43 = vpop.permute.xlu1 %1675  ;;  %v1674_v63 = vpop.permute.xlu0 %1673 }
 0x226   :  { %v1721_v58 = vmax.f32 %v1657_v15, %v1674_v63 }
 0x227   :  { %1691 = vrot.lane.b32.xlu1 %v4062_v26, %s2096_s10  ;;  %1753 = vrot.lane.b32.xlu0 %v4053_v23, %s2097_s11 }
 0x229   :  { %v1740_v3 = vpop.permute.xlu1 %1739  ;;  %v1738_v6 = vpop.permute.xlu0 %1737 }
 0x22a   :  { %v1785_v38 = vmax.f32 %v1721_v58, %v1738_v6 }
 0x22b   :  { %1755 = vrot.lane.b32.xlu1 %v4062_v26, %s2097_s11  ;;  %1817 = vrot.lane.b32.xlu0 %v4053_v23, %s2098_s12 }
 0x22d   :  { %v1804_v16 = vpop.permute.xlu1 %1803  ;;  %v1802_v22 = vpop.permute.xlu0 %1801 }
 0x22e   :  { %v1849_v8 = vmax.f32 %v1785_v38, %v1802_v22 }
 0x22f   :  { %1819 = vrot.lane.b32.xlu1 %v4062_v26, %s2098_s12  ;;  %1881 = vrot.lane.b32.xlu0 %v4053_v23, %s2099_s13 }
 0x231   :  { %v1868_v29 = vpop.permute.xlu1 %1867  ;;  %v1866_v57 = vpop.permute.xlu0 %1865 }
 0x232   :  { %v1913_v53 = vmax.f32 %v1849_v8, %v1866_v57 }
 0x233   :  { %1883 = vrot.lane.b32.xlu1 %v4062_v26, %s2099_s13  ;;  %1945 = vrot.lane.b32.xlu0 %v4053_v23, %s2100_s14 }
 0x235   :  { %v1932_v10 = vpop.permute.xlu1 %1931  ;;  %v1930_v13 = vpop.permute.xlu0 %1929 }
 0x236   :  { %v1977_v35 = vmax.f32 %v1913_v53, %v1930_v13 }
 0x237   :  { %1947 = vrot.lane.b32.xlu1 %v4062_v26, %s2100_s14  ;;  %1565 = vrot.lane.b32.xlu0 %v4092_v1, %s2094_s0 }
 0x238   :  { %v1993_v9 = vmax.f32 %v1977_v35, %v3824_v45 }
 0x239   :  { %v1550_v12 = vpop.permute.xlu1 %1549  ;;  %v1548_v31 = vpop.permute.xlu0 %1547 }
 0x23a   :  { %v2016_v28 = vadd.f32 %v4099_v62, %v1993_v9  ;;  %v1594_v60 = vmax.f32 %v3828_v33, %v1548_v31 }
 0x23b   :  { %1567 = vrot.lane.b32.xlu1 %v4107_v52, %s2094_s0  ;;  %1629 = vrot.lane.b32.xlu0 %v4092_v1, %s2095_s9 }
 0x23c   :  { %v2032_v63 = vmax.f32 %v2016_v28, 0.0  ;;  %v1658_v6 = vmax.f32 %v1594_v60, %v1612_v56 }
 0x23d   :  { %v1552_v20 = vpop.permute.xlu1 %1551  ;;  %v1614_v15 = vpop.permute.xlu0 %1613 }
 0x23e   :  { %2048 = vst.msk [vmem:[%s4322_s3] sm:$0xff] %vm514_vm0, %v2032_v63  ;;  %v1722_v45 = vmax.f32 %v1658_v6, %v1676_v43  ;;  %v1595_v43 = vmax.f32 %v3889_v2, %v1550_v12 }
 0x23f   :  { %1631 = vrot.lane.b32.xlu1 %v4107_v52, %s2095_s9  ;;  %1693 = vrot.lane.b32.xlu0 %v4092_v1, %s2096_s10 }
 0x240   :  { %v1786_v33 = vmax.f32 %v1722_v45, %v1740_v3 }
 0x241   :  { %v1616_v40 = vpop.permute.xlu1 %1615  ;;  %v1678_v22 = vpop.permute.xlu0 %1677 }
 0x242   :  { %v1850_v58 = vmax.f32 %v1786_v33, %v1804_v16  ;;  %v1659_v16 = vmax.f32 %v1595_v43, %v1614_v15 }
 0x243   :  { %1695 = vrot.lane.b32.xlu1 %v4107_v52, %s2096_s10  ;;  %1757 = vrot.lane.b32.xlu0 %v4092_v1, %s2097_s11 }
 0x244   :  { %v1914_v56 = vmax.f32 %v1850_v58, %v1868_v29  ;;  %v1596_v29 = vmax.f32 %v3903_v47, %v1552_v20  ;;  %v1723_v13 = vmax.f32 %v1659_v16, %v1678_v22 }
 0x245   :  { %v1680_v38 = vpop.permute.xlu1 %1679  ;;  %v1742_v59 = vpop.permute.xlu0 %1741 }
 0x246   :  { %v1978_v57 = vmax.f32 %v1914_v56, %v1932_v10  ;;  %v1660_v10 = vmax.f32 %v1596_v29, %v1616_v40  ;;  %v1787_v35 = vmax.f32 %v1723_v13, %v1742_v59 }
 0x247   :  { %1759 = vrot.lane.b32.xlu1 %v4107_v52, %s2097_s11  ;;  %1821 = vrot.lane.b32.xlu0 %v4092_v1, %s2098_s12 }
 0x248   :  { %v1994_v3 = vmax.f32 %v1978_v57, %v3831_v37  ;;  %v1346_v37 = vadd.f32 %v3939_v4, %v3792_v24  ;;  %v1724_v47 = vmax.f32 %v1660_v10, %v1680_v38  ;;  %v1352_v24 = vadd.f32 %v3950_v14, %v3798_v42 }
 0x249   :  { %v1744_v8 = vpop.permute.xlu1 %1743  ;;  %v1806_v53 = vpop.permute.xlu0 %1805  ;;  %v1358_v10 = vadd.f32 %v3963_v50, %v3806_v44 }
 0x24a   :  { %v2017_v46 = vadd.f32 %v4099_v62, %v1994_v3  ;;  %v1851_v31 = vmax.f32 %v1787_v35, %v1806_v53  ;;  %v1788_v28 = vmax.f32 %v1724_v47, %v1744_v8  ;;  %v4150_v63 = vadd.f32 %v3947_v5, %v1346_v37  ;;  %v1524_v50 = vpop.f32.mrf.mxu1 }
 0x24b   :  { %1823 = vrot.lane.b32.xlu1 %v4107_v52, %s2098_s12  ;;  %1885 = vrot.lane.b32.xlu0 %v4092_v1, %s2099_s13  ;;  %v4160_v40 = vadd.f32 %v3958_v18, %v1352_v24 }
 0x24c   :  { %v2033_v2 = vmax.f32 %v2017_v46, 0.0 }
 0x24d   :  { %v1808_v9 = vpop.permute.xlu1 %1807  ;;  %v1870_v12 = vpop.permute.xlu0 %1869 }
 0x24e   :  { %2049 = vst.msk [vmem:[%s4322_s3 + $0x8] sm:$0xff] %vm514_vm0, %v2033_v2  ;;  %v1915_v60 = vmax.f32 %v1851_v31, %v1870_v12  ;;  %v1852_v20 = vmax.f32 %v1788_v28, %v1808_v9  ;;  %v1363_v9 = vpop.f32.mrf.mxu0  ;;  %v4202_v28 = vadd.f32 %v3971_v30, %v1358_v10 }
 0x24f   :  { %1887 = vrot.lane.b32.xlu1 %v4107_v52, %s2099_s13  ;;  %1949 = vrot.lane.b32.xlu0 %v4092_v1, %s2100_s14 }
 0x251   :  { %v1872_v4 = vpop.permute.xlu1 %1871  ;;  %v1934_v6 = vpop.permute.xlu0 %1933 }
 0x252   :  { %v1979_v15 = vmax.f32 %v1915_v60, %v1934_v6  ;;  %v1916_v45 = vmax.f32 %v1852_v20, %v1872_v4  ;;  %v1364_v60 = vadd.f32 %v1363_v9, %v3815_v25 }
 0x253   :  { %1951 = vrot.lane.b32.xlu1 %v4107_v52, %s2100_s14  ;;  %1569 = vrot.lane.b32.xlu0 %v4150_v63, %s2094_s0 }
 0x254   :  { %v1995_v33 = vmax.f32 %v1979_v15, %v3838_v11 }
 0x255   :  { %v1936_v5 = vpop.permute.xlu1 %1935  ;;  %v1554_v22 = vpop.permute.xlu0 %1553 }
 0x256   :  { %v2018_v42 = vadd.f32 %v4099_v62, %v1995_v33  ;;  %v1980_v14 = vmax.f32 %v1916_v45, %v1936_v5  ;;  %v1597_v16 = vmax.f32 %v3974_v36, %v1554_v22  ;;  %v4210_v45 = vadd.f32 %v1524_v50, %v1364_v60 }
 0x257   :  { %1571 = vrot.lane.b32.xlu1 %v4160_v40, %s2094_s0  ;;  %1633 = vrot.lane.b32.xlu0 %v4150_v63, %s2095_s9 }
 0x258   :  { %v2034_v58 = vmax.f32 %v2018_v42, 0.0  ;;  %v1996_v56 = vmax.f32 %v1980_v14, %v3847_v19 }
 0x259   :  { %v1556_v38 = vpop.permute.xlu1 %1555  ;;  %v1618_v59 = vpop.permute.xlu0 %1617 }
 0x25a   :  { %2050 = vst.msk [vmem:[%s4322_s3 + $0x10] sm:$0xff] %vm514_vm0, %v2034_v58  ;;  %v2019_v11 = vadd.f32 %v4099_v62, %v1996_v56  ;;  %v1661_v8 = vmax.f32 %v1597_v16, %v1618_v59  ;;  %v1598_v29 = vmax.f32 %v3986_v54, %v1556_v38 }
 0x25b   :  { %1635 = vrot.lane.b32.xlu1 %v4160_v40, %s2095_s9  ;;  %1697 = vrot.lane.b32.xlu0 %v4150_v63, %s2096_s10 }
 0x25c   :  { %v2035_v18 = vmax.f32 %v2019_v11, 0.0 }
 0x25d   :  { %v1620_v43 = vpop.permute.xlu1 %1619  ;;  %v1682_v57 = vpop.permute.xlu0 %1681 }
 0x25e   :  { %2051 = vst.msk [vmem:[%s4322_s3 + $0x18] sm:$0xff] %vm514_vm0, %v2035_v18  ;;  %v1725_v13 = vmax.f32 %v1661_v8, %v1682_v57  ;;  %v1662_v2 = vmax.f32 %v1598_v29, %v1620_v43 }
 0x25f   :  { %1699 = vrot.lane.b32.xlu1 %v4160_v40, %s2096_s10  ;;  %1761 = vrot.lane.b32.xlu0 %v4150_v63, %s2097_s11 }
 0x261   :  { %v1684_v19 = vpop.permute.xlu1 %1683  ;;  %v1746_v3 = vpop.permute.xlu0 %1745 }
 0x262   :  { %v1789_v36 = vmax.f32 %v1725_v13, %v1746_v3  ;;  %v1726_v12 = vmax.f32 %v1662_v2, %v1684_v19 }
 0x263   :  { %1763 = vrot.lane.b32.xlu1 %v4160_v40, %s2097_s11  ;;  %1825 = vrot.lane.b32.xlu0 %v4150_v63, %s2098_s12 }
 0x265   :  { %v1748_v53 = vpop.permute.xlu1 %1747  ;;  %v1810_v46 = vpop.permute.xlu0 %1809 }
 0x266   :  { %v1853_v47 = vmax.f32 %v1789_v36, %v1810_v46  ;;  %v1790_v54 = vmax.f32 %v1726_v12, %v1748_v53 }
 0x267   :  { %1827 = vrot.lane.b32.xlu1 %v4160_v40, %s2098_s12  ;;  %1889 = vrot.lane.b32.xlu0 %v4150_v63, %s2099_s13 }
 0x269   :  { %v1812_v35 = vpop.permute.xlu1 %1811  ;;  %v1874_v37 = vpop.permute.xlu0 %1873 }
 0x26a   :  { %v1917_v31 = vmax.f32 %v1853_v47, %v1874_v37  ;;  %v1854_v4 = vmax.f32 %v1790_v54, %v1812_v35 }
 0x26b   :  { %1891 = vrot.lane.b32.xlu1 %v4160_v40, %s2099_s13  ;;  %1953 = vrot.lane.b32.xlu0 %v4150_v63, %s2100_s14 }
 0x26d   :  { %v1876_v24 = vpop.permute.xlu1 %1875  ;;  %v1938_v44 = vpop.permute.xlu0 %1937 }
 0x26e   :  { %v1981_v6 = vmax.f32 %v1917_v31, %v1938_v44  ;;  %v1918_v20 = vmax.f32 %v1854_v4, %v1876_v24 }
 0x26f   :  { %1955 = vrot.lane.b32.xlu1 %v4160_v40, %s2100_s14  ;;  %1573 = vrot.lane.b32.xlu0 %v4202_v28, %s2094_s0 }
 0x270   :  { %v1997_v15 = vmax.f32 %v1981_v6, %v3858_v21 }
 0x271   :  { %v1940_v30 = vpop.permute.xlu1 %1939  ;;  %v1558_v33 = vpop.permute.xlu0 %1557 }
 0x272   :  { %v2020_v25 = vadd.f32 %v4099_v62, %v1997_v15  ;;  %v1982_v5 = vmax.f32 %v1918_v20, %v1940_v30  ;;  %v1599_v18 = vmax.f32 %v4015_v48, %v1558_v33 }
 0x273   :  { %1575 = vrot.lane.b32.xlu1 %v4210_v45, %s2094_s0  ;;  %1637 = vrot.lane.b32.xlu0 %v4202_v28, %s2095_s9 }
 0x274   :  { %v2036_v22 = vmax.f32 %v2020_v25, 0.0  ;;  %v1998_v42 = vmax.f32 %v1982_v5, %v3869_v34 }
 0x275   :  { %v1560_v14 = vpop.permute.xlu1 %1559  ;;  %v1622_v58 = vpop.permute.xlu0 %1621 }
 0x276   :  { %2052 = vst.msk [vmem:[%s4322_s3 + $0x20] sm:$0xff] %vm514_vm0, %v2036_v22  ;;  %v2021_v21 = vadd.f32 %v4099_v62, %v1998_v42  ;;  %v1663_v43 = vmax.f32 %v1599_v18, %v1622_v58  ;;  %v1600_v3 = vmax.f32 %v4024_v0, %v1560_v14 }
 0x277   :  { %1639 = vrot.lane.b32.xlu1 %v4210_v45, %s2095_s9  ;;  %1701 = vrot.lane.b32.xlu0 %v4202_v28, %s2096_s10 }
 0x278   :  { %v2037_v56 = vmax.f32 %v2021_v21, 0.0 }
 0x279   :  { %v1624_v38 = vpop.permute.xlu1 %1623  ;;  %v1686_v59 = vpop.permute.xlu0 %1685 }
 0x27a   :  { %2053 = vst.msk [vmem:[%s4322_s3 + $0x28] sm:$0xff] %vm514_vm0, %v2037_v56  ;;  %v1727_v16 = vmax.f32 %v1663_v43, %v1686_v59  ;;  %v1664_v8 = vmax.f32 %v1600_v3, %v1624_v38 }
 0x27b   :  { %1703 = vrot.lane.b32.xlu1 %v4210_v45, %s2096_s10  ;;  %1765 = vrot.lane.b32.xlu0 %v4202_v28, %s2097_s11 }
 0x27d   :  { %v1688_v34 = vpop.permute.xlu1 %1687  ;;  %v1750_v11 = vpop.permute.xlu0 %1749 }
 0x27e   :  { %v1791_v48 = vmax.f32 %v1727_v16, %v1750_v11  ;;  %v1728_v29 = vmax.f32 %v1664_v8, %v1688_v34 }
 0x27f   :  { %1767 = vrot.lane.b32.xlu1 %v4210_v45, %s2097_s11  ;;  %1829 = vrot.lane.b32.xlu0 %v4202_v28, %s2098_s12 }
 0x281   :  { %v1752_v57 = vpop.permute.xlu1 %1751  ;;  %v1814_v19 = vpop.permute.xlu0 %1813 }
 0x282   :  { %v1855_v13 = vmax.f32 %v1791_v48, %v1814_v19  ;;  %v1792_v0 = vmax.f32 %v1728_v29, %v1752_v57 }
 0x283   :  { %1831 = vrot.lane.b32.xlu1 %v4210_v45, %s2098_s12  ;;  %1893 = vrot.lane.b32.xlu0 %v4202_v28, %s2099_s13 }
 0x285   :  { %v1816_v53 = vpop.permute.xlu1 %1815  ;;  %v1878_v46 = vpop.permute.xlu0 %1877 }
 0x286   :  { %v1919_v2 = vmax.f32 %v1855_v13, %v1878_v46  ;;  %v1856_v35 = vmax.f32 %v1792_v0, %v1816_v53 }
 0x287   :  { %1895 = vrot.lane.b32.xlu1 %v4210_v45, %s2099_s13  ;;  %1957 = vrot.lane.b32.xlu0 %v4202_v28, %s2100_s14 }
 0x289   :  { %v1880_v36 = vpop.permute.xlu1 %1879  ;;  %v1942_v10 = vpop.permute.xlu0 %1941 }
 0x28a   :  { %v1983_v37 = vmax.f32 %v1919_v2, %v1942_v10  ;;  %v1920_v9 = vmax.f32 %v1856_v35, %v1880_v36 }
 0x28b   :  { %1959 = vrot.lane.b32.xlu1 %v4210_v45, %s2100_s14 }
 0x28c   :  { %v1999_v12 = vmax.f32 %v1983_v37, %v3881_v49 }
 0x28d   :  { %v1944_v47 = vpop.permute.xlu1 %1943  ;;  %v1562_v54 = vpop.permute.xlu0 %1561 }
 0x28e   :  { %v2022_v31 = vadd.f32 %v4099_v62, %v1999_v12  ;;  %v1984_v60 = vmax.f32 %v1920_v9, %v1944_v47 }
 0x290   :  { %v2038_v24 = vmax.f32 %v2022_v31, 0.0  ;;  %v2000_v44 = vmax.f32 %v1984_v60, %v3895_v7  ;;  %v1601_v7 = vmax.f32 %v4053_v23, %v1562_v54 }
 0x291   :  { %v1564_v50 = vpop.permute.xlu1 %1563  ;;  %v1626_v4 = vpop.permute.xlu0 %1625 }
 0x292   :  { %2054 = vst.msk [vmem:[%s4322_s3 + $0x30] sm:$0xff] %vm514_vm0, %v2038_v24  ;;  %v2023_v6 = vadd.f32 %v4099_v62, %v2000_v44  ;;  %v1665_v25 = vmax.f32 %v1601_v7, %v1626_v4  ;;  %v1602_v42 = vmax.f32 %v4062_v26, %v1564_v50 }
 0x294   :  { %v2039_v20 = vmax.f32 %v2023_v6, 0.0 }
 0x295   :  { %v1628_v15 = vpop.permute.xlu1 %1627  ;;  %v1690_v49 = vpop.permute.xlu0 %1689 }
 0x296   :  { %2055 = vst.msk [vmem:[%s4322_s3 + $0x38] sm:$0xff] %vm514_vm0, %v2039_v20  ;;  %v1729_v14 = vmax.f32 %v1665_v25, %v1690_v49  ;;  %v1666_v58 = vmax.f32 %v1602_v42, %v1628_v15 }
 0x299   :  { %v1692_v30 = vpop.permute.xlu1 %1691  ;;  %v1754_v33 = vpop.permute.xlu0 %1753 }
 0x29a   :  { %v1793_v21 = vmax.f32 %v1729_v14, %v1754_v33  ;;  %v1730_v59 = vmax.f32 %v1666_v58, %v1692_v30 }
 0x29d   :  { %v1756_v5 = vpop.permute.xlu1 %1755  ;;  %v1818_v22 = vpop.permute.xlu0 %1817 }
 0x29e   :  { %v1857_v34 = vmax.f32 %v1793_v21, %v1818_v22  ;;  %v1794_v11 = vmax.f32 %v1730_v59, %v1756_v5 }
 0x2a1   :  { %v1820_v56 = vpop.permute.xlu1 %1819  ;;  %v1882_v38 = vpop.permute.xlu0 %1881 }
 0x2a2   :  { %v1921_v18 = vmax.f32 %v1857_v34, %v1882_v38  ;;  %v1858_v19 = vmax.f32 %v1794_v11, %v1820_v56 }
 0x2a5   :  { %v1884_v43 = vpop.permute.xlu1 %1883  ;;  %v1946_v57 = vpop.permute.xlu0 %1945 }
 0x2a6   :  { %v1985_v3 = vmax.f32 %v1921_v18, %v1946_v57  ;;  %v1922_v16 = vmax.f32 %v1858_v19, %v1884_v43 }
 0x2a8   :  { %v2001_v23 = vmax.f32 %v1985_v3, %v3908_v61 }
 0x2a9   :  { %v1948_v8 = vpop.permute.xlu1 %1947  ;;  %v1566_v48 = vpop.permute.xlu0 %1565 }
 0x2aa   :  { %v2024_v26 = vadd.f32 %v4099_v62, %v2001_v23  ;;  %v1986_v53 = vmax.f32 %v1922_v16, %v1948_v8 }
 0x2ac   :  { %v2040_v46 = vmax.f32 %v2024_v26, 0.0  ;;  %v2002_v29 = vmax.f32 %v1986_v53, %v3919_v32  ;;  %v1603_v32 = vmax.f32 %v4092_v1, %v1566_v48 }
 0x2ad   :  { %v1568_v13 = vpop.permute.xlu1 %1567  ;;  %v1630_v0 = vpop.permute.xlu0 %1629 }
 0x2ae   :  { %2056 = vst.msk [vmem:[%s4322_s3 + $0x40] sm:$0xff] %vm514_vm0, %v2040_v46  ;;  %v2025_v2 = vadd.f32 %v4099_v62, %v2002_v29  ;;  %v1667_v9 = vmax.f32 %v1603_v32, %v1630_v0  ;;  %v1604_v54 = vmax.f32 %v4107_v52, %v1568_v13 }
 0x2b0   :  { %v2041_v36 = vmax.f32 %v2025_v2, 0.0 }
 0x2b1   :  { %v1632_v10 = vpop.permute.xlu1 %1631  ;;  %v1694_v61 = vpop.permute.xlu0 %1693 }
 0x2b2   :  { %2057 = vst.msk [vmem:[%s4322_s3 + $0x48] sm:$0xff] %vm514_vm0, %v2041_v36  ;;  %v1731_v31 = vmax.f32 %v1667_v9, %v1694_v61  ;;  %v1668_v60 = vmax.f32 %v1604_v54, %v1632_v10 }
 0x2b5   :  { %v1696_v35 = vpop.permute.xlu1 %1695  ;;  %v1758_v37 = vpop.permute.xlu0 %1757 }
 0x2b6   :  { %v1795_v24 = vmax.f32 %v1731_v31, %v1758_v37  ;;  %v1732_v4 = vmax.f32 %v1668_v60, %v1696_v35 }
 0x2b9   :  { %v1760_v12 = vpop.permute.xlu1 %1759  ;;  %v1822_v47 = vpop.permute.xlu0 %1821 }
 0x2ba   :  { %v1859_v6 = vmax.f32 %v1795_v24, %v1822_v47  ;;  %v1796_v20 = vmax.f32 %v1732_v4, %v1760_v12 }
 0x2bd   :  { %v1824_v44 = vpop.permute.xlu1 %1823  ;;  %v1886_v50 = vpop.permute.xlu0 %1885 }
 0x2be   :  { %v1923_v15 = vmax.f32 %v1859_v6, %v1886_v50  ;;  %v1860_v33 = vmax.f32 %v1796_v20, %v1824_v44 }
 0x2c1   :  { %v1888_v49 = vpop.permute.xlu1 %1887  ;;  %v1950_v30 = vpop.permute.xlu0 %1949 }
 0x2c2   :  { %v1987_v7 = vmax.f32 %v1923_v15, %v1950_v30  ;;  %v1924_v25 = vmax.f32 %v1860_v33, %v1888_v49 }
 0x2c4   :  { %v2003_v1 = vmax.f32 %v1987_v7, %v3930_v41 }
 0x2c5   :  { %v1952_v5 = vpop.permute.xlu1 %1951  ;;  %v1570_v22 = vpop.permute.xlu0 %1569 }
 0x2c6   :  { %v2026_v52 = vadd.f32 %v4099_v62, %v2003_v1  ;;  %v1988_v42 = vmax.f32 %v1924_v25, %v1952_v5 }
 0x2c8   :  { %v2042_v14 = vmax.f32 %v2026_v52, 0.0  ;;  %v2004_v58 = vmax.f32 %v1988_v42, %v3941_v39  ;;  %v1605_v39 = vmax.f32 %v4150_v63, %v1570_v22  ;;  %v1365_v22 = vpop.f32.mrf.mxu0 }
 0x2c9   :  { %v1572_v21 = vpop.permute.xlu1 %1571  ;;  %v1634_v56 = vpop.permute.xlu0 %1633 }
 0x2ca   :  { %2058 = vst.msk [vmem:[%s4322_s3 + $0x50] sm:$0xff] %vm514_vm0, %v2042_v14  ;;  %v2027_v38 = vadd.f32 %v4099_v62, %v2004_v58  ;;  %v1669_v43 = vmax.f32 %v1605_v39, %v1634_v56  ;;  %v1606_v3 = vmax.f32 %v4160_v40, %v1572_v21  ;;  %v1366_v21 = vadd.f32 %v1365_v22, %v3818_v27 }
 0x2cc   :  { %v2043_v59 = vmax.f32 %v2027_v38, 0.0  ;;  %v1526_v38 = vpop.f32.mrf.mxu1 }
 0x2cd   :  { %v1636_v34 = vpop.permute.xlu1 %1635  ;;  %v1698_v41 = vpop.permute.xlu0 %1697 }
 0x2ce   :  { %2059 = vst.msk [vmem:[%s4322_s3 + $0x58] sm:$0xff] %vm514_vm0, %v2043_v59  ;;  %v1733_v16 = vmax.f32 %v1669_v43, %v1698_v41  ;;  %v1670_v23 = vmax.f32 %v1606_v3, %v1636_v34  ;;  %v1527_v41 = vadd.f32 %v1526_v38, %v1366_v21 }
 0x2d1   :  { %v1700_v11 = vpop.permute.xlu1 %1699  ;;  %v1762_v18 = vpop.permute.xlu0 %1761 }
 0x2d2   :  { %v1797_v8 = vmax.f32 %v1733_v16, %v1762_v18  ;;  %v1734_v53 = vmax.f32 %v1670_v23, %v1700_v11 }
 0x2d5   :  { %v1764_v57 = vpop.permute.xlu1 %1763  ;;  %v1826_v19 = vpop.permute.xlu0 %1825 }
 0x2d6   :  { %v1861_v46 = vmax.f32 %v1797_v8, %v1826_v19  ;;  %v1798_v29 = vmax.f32 %v1734_v53, %v1764_v57 }
 0x2d9   :  { %v1828_v48 = vpop.permute.xlu1 %1827  ;;  %v1890_v26 = vpop.permute.xlu0 %1889 }
 0x2da   :  { %v1925_v13 = vmax.f32 %v1861_v46, %v1890_v26  ;;  %v1862_v36 = vmax.f32 %v1798_v29, %v1828_v48 }
 0x2dd   :  { %v1892_v0 = vpop.permute.xlu1 %1891  ;;  %v1954_v2 = vpop.permute.xlu0 %1953 }
 0x2de   :  { %v1989_v10 = vmax.f32 %v1925_v13, %v1954_v2  ;;  %v1926_v61 = vmax.f32 %v1862_v36, %v1892_v0 }
 0x2e0   :  { %v2005_v63 = vmax.f32 %v1989_v10, %v3952_v17 }
 0x2e1   :  { %v1956_v35 = vpop.permute.xlu1 %1955  ;;  %v1574_v37 = vpop.permute.xlu0 %1573 }
 0x2e2   :  { %v2028_v40 = vadd.f32 %v4099_v62, %v2005_v63  ;;  %v1990_v32 = vmax.f32 %v1926_v61, %v1956_v35 }
 0x2e4   :  { %v2044_v9 = vmax.f32 %v2028_v40, 0.0  ;;  %v2006_v12 = vmax.f32 %v1990_v32, %v3965_v55  ;;  %v1607_v55 = vmax.f32 %v4202_v28, %v1574_v37 }
 0x2e5   :  { %v1576_v47 = vpop.permute.xlu1 %1575  ;;  %v1638_v54 = vpop.permute.xlu0 %1637 }
 0x2e6   :  { %2060 = vst.msk [vmem:[%s4322_s3 + $0x60] sm:$0xff] %vm514_vm0, %v2044_v9  ;;  %v2029_v31 = vadd.f32 %v4099_v62, %v2006_v12  ;;  %v1671_v4 = vmax.f32 %v1607_v55, %v1638_v54  ;;  %v1608_v15 = vmax.f32 %v4210_v45, %v1576_v47 }
 0x2e8   :  { %v2045_v60 = vmax.f32 %v2029_v31, 0.0 }
 0x2e9   :  { %v1640_v24 = vpop.permute.xlu1 %1639  ;;  %v1702_v17 = vpop.permute.xlu0 %1701 }
 0x2ea   :  { %2061 = vst.msk [vmem:[%s4322_s3 + $0x68] sm:$0xff] %vm514_vm0, %v2045_v60  ;;  %v1735_v49 = vmax.f32 %v1671_v4, %v1702_v17  ;;  %v1672_v30 = vmax.f32 %v1608_v15, %v1640_v24 }
 0x2ed   :  { %v1704_v44 = vpop.permute.xlu1 %1703  ;;  %v1766_v50 = vpop.permute.xlu0 %1765 }
 0x2ee   :  { %v1799_v33 = vmax.f32 %v1735_v49, %v1766_v50  ;;  %v1736_v1 = vmax.f32 %v1672_v30, %v1704_v44 }
 0x2f1   :  { %v1768_v6 = vpop.permute.xlu1 %1767  ;;  %v1830_v20 = vpop.permute.xlu0 %1829 }
 0x2f2   :  { %v1863_v5 = vmax.f32 %v1799_v33, %v1830_v20  ;;  %v1800_v52 = vmax.f32 %v1736_v1, %v1768_v6 }
 0x2f5   :  { %v1832_v7 = vpop.permute.xlu1 %1831  ;;  %v1894_v25 = vpop.permute.xlu0 %1893 }
 0x2f6   :  { %v1927_v42 = vmax.f32 %v1863_v5, %v1894_v25  ;;  %v1864_v28 = vmax.f32 %v1800_v52, %v1832_v7 }
 0x2f9   :  { %v1896_v14 = vpop.permute.xlu1 %1895  ;;  %v1958_v58 = vpop.permute.xlu0 %1957 }
 0x2fa   :  { %v1991_v56 = vmax.f32 %v1927_v42, %v1958_v58  ;;  %v1928_v59 = vmax.f32 %v1864_v28, %v1896_v14 }
 0x2fc   :  { %v2007_v45 = vmax.f32 %v1991_v56, %v3979_v51 }
 0x2fd   :  { %v1960_v34 = vpop.permute.xlu1 %1959 }
 0x2fe   :  { %v2030_v11 = vadd.f32 %v4099_v62, %v2007_v45  ;;  %v1992_v18 = vmax.f32 %v1928_v59, %v1960_v34 }
 0x300   :  { %v2046_v39 = vmax.f32 %v2030_v11, 0.0  ;;  %v2008_v43 = vmax.f32 %v1992_v18, %v1527_v41 }
 0x302   :  { %2062 = vst.msk [vmem:[%s4322_s3 + $0x70] sm:$0xff] %vm514_vm0, %v2046_v39  ;;  %v2031_v27 = vadd.f32 %v4099_v62, %v2008_v43 }
 0x304   :  { %v2047_v57 = vmax.f32 %v2031_v27, 0.0 }
 0x306   :  { %2063 = vst.msk [vmem:[%s4322_s3 + $0x78] sm:$0xff] %vm514_vm0, %v2047_v57 }

// kernel: _forward.7
= control target key start
LH: loop header
LB: loop body
LE: loop exit
PB: predicated region body
PF: predicated region fallthrough
CT: control target
= control target key end

     0   :  { %v264_v0 = vmov 0.0   ;;  %vm42_vm0 = vcmask 130048   ;;  %s265_s13 = smov 112   ;;  %s266_s14 = smov 96   ;;  %s435_s1 = inlined_call_operand.vmem [shape: f32[144,48], index: 1, kind: input, shape index: {}]   ;;  %s436_s0 = inlined_call_operand.vmem [shape: f32[40,144], index: 0, kind: input, shape index: {}]   ;;  %s437_s2 = inlined_call_operand.vmem [shape: f32[1,16], index: 2, kind: input, shape index: {}]   ;;  %s438_s3 = inlined_call_operand.vmem [shape: f32[40,16], index: 3, kind: output, shape index: {}]  }
   0x1   :  { %58 = vmatprep.subr.mxu0 %v264_v0  ;;  %225 = vmatprep.subr.mxu1 %v264_v0  ;;  %v39_v1 = vld [vmem:[%s435_s1 + $0x78] sm:$0xff]  ;;  %v38_v2 = vld [vmem:[%s435_s1 + $0x70] sm:$0xff]  ;;  %v37_v3 = vld [vmem:[%s435_s1 + $0x68] sm:$0xff] }
   0x2   :  { %59 = vmatpush1.msra.mxu0 %v39_v1  ;;  %243 = vmatpush1.msra.mxu1 %v39_v1  ;;  %v36_v4 = vld [vmem:[%s435_s1 + $0x60] sm:$0xff]  ;;  %v35_v5 = vld [vmem:[%s435_s1 + $0x58] sm:$0xff]  ;;  %v34_v6 = vld [vmem:[%s435_s1 + $0x50] sm:$0xff] }
   0x3   :  { %60 = vmatprep.subr.mxu0 %v264_v0  ;;  %226 = vmatprep.subr.mxu1 %v264_v0  ;;  %v33_v7 = vld [vmem:[%s435_s1 + $0x48] sm:$0xff]  ;;  %v32_v8 = vld [vmem:[%s435_s1 + $0x40] sm:$0xff]  ;;  %v31_v9 = vld [vmem:[%s435_s1 + $0x38] sm:$0xff] }
   0x4   :  { %61 = vmatpush1.msra.mxu0 %v38_v2  ;;  %244 = vmatpush1.msra.mxu1 %v38_v2  ;;  %v30_v10 = vld [vmem:[%s435_s1 + $0x30] sm:$0xff]  ;;  %v29_v11 = vld [vmem:[%s435_s1 + $0x28] sm:$0xff]  ;;  %v28_v12 = vld [vmem:[%s435_s1 + $0x20] sm:$0xff] }
   0x5   :  { %62 = vmatprep.subr.mxu0 %v264_v0  ;;  %227 = vmatprep.subr.mxu1 %v264_v0  ;;  %v27_v13 = vld [vmem:[%s435_s1 + $0x18] sm:$0xff]  ;;  %v26_v14 = vld [vmem:[%s435_s1 + $0x10] sm:$0xff]  ;;  %v25_v15 = vld [vmem:[%s435_s1 + $0x8] sm:$0xff] }
   0x6   :  { %63 = vmatpush1.msra.mxu0 %v37_v3  ;;  %245 = vmatpush1.msra.mxu1 %v37_v3  ;;  %v24_v16 = vld [vmem:[%s435_s1] sm:$0xff]  ;;  %v41_v17 = vld [vmem:[%s435_s1 + $0x88] sm:$0xff]  ;;  %v21_v20 = vld [vmem:[%s436_s0 + $0x38] sm:$0xff] }
   0x7   :  { %64 = vmatprep.subr.mxu0 %v264_v0  ;;  %228 = vmatprep.subr.mxu1 %v264_v0  ;;  %v40_v18 = vld [vmem:[%s435_s1 + $0x80] sm:$0xff]  ;;  %v15_v19 = vld [vmem:[%s436_s0 + $0x8] sm:$0xff]  ;;  %v20_v22 = vld [vmem:[%s436_s0 + $0x30] sm:$0xff] }
   0x8   :  { %65 = vmatpush1.msra.mxu0 %v36_v4  ;;  %246 = vmatpush1.msra.mxu1 %v36_v4  ;;  %v14_v21 = vld [vmem:[%s436_s0] sm:$0xff]  ;;  %v17_v23 = vld [vmem:[%s436_s0 + $0x18] sm:$0xff]  ;;  %v23_v24 = vld [vmem:[%s436_s0 + $0x48] sm:$0xff] }
   0x9   :  { %66 = vmatprep.subr.mxu0 %v264_v0  ;;  %229 = vmatprep.subr.mxu1 %v264_v0  ;;  %v16_v25 = vld [vmem:[%s436_s0 + $0x10] sm:$0xff]  ;;  %v22_v26 = vld [vmem:[%s436_s0 + $0x40] sm:$0xff]  ;;  %v19_v27 = vld [vmem:[%s436_s0 + $0x28] sm:$0xff] }
   0xa   :  { %67 = vmatpush1.msra.mxu0 %v35_v5  ;;  %247 = vmatpush1.msra.mxu1 %v35_v5  ;;  %v18_v28 = vld [vmem:[%s436_s0 + $0x20] sm:$0xff] }
   0xb   :  { %68 = vmatprep.subr.mxu0 %v264_v0  ;;  %230 = vmatprep.subr.mxu1 %v264_v0  ;;  %v224_v42 = vld [vmem:[%s437_s2] ss:$0 sm:$0xff] }
   0xc   :  { %69 = vmatpush1.msra.mxu0 %v34_v6  ;;  %248 = vmatpush1.msra.mxu1 %v34_v6 }
   0xd   :  { %70 = vmatprep.subr.mxu0 %v264_v0  ;;  %231 = vmatprep.subr.mxu1 %v264_v0 }
   0xe   :  { %71 = vmatpush1.msra.mxu0 %v33_v7  ;;  %249 = vmatpush1.msra.mxu1 %v33_v7 }
   0xf   :  { %72 = vmatprep.subr.mxu0 %v264_v0  ;;  %232 = vmatprep.subr.mxu1 %v264_v0 }
  0x10   :  { %73 = vmatpush1.msra.mxu0 %v32_v8  ;;  %250 = vmatpush1.msra.mxu1 %v32_v8 }
  0x11   :  { %74 = vmatprep.subr.mxu0 %v264_v0  ;;  %233 = vmatprep.subr.mxu1 %v264_v0 }
  0x12   :  { %75 = vmatpush1.msra.mxu0 %v31_v9  ;;  %251 = vmatpush1.msra.mxu1 %v31_v9 }
  0x13   :  { %76 = vmatprep.subr.mxu0 %v264_v0  ;;  %234 = vmatprep.subr.mxu1 %v264_v0 }
  0x14   :  { %77 = vmatpush1.msra.mxu0 %v30_v10  ;;  %252 = vmatpush1.msra.mxu1 %v30_v10 }
  0x15   :  { %78 = vmatprep.subr.mxu0 %v264_v0  ;;  %235 = vmatprep.subr.mxu1 %v264_v0 }
  0x16   :  { %79 = vmatpush1.msra.mxu0 %v29_v11  ;;  %253 = vmatpush1.msra.mxu1 %v29_v11 }
  0x17   :  { %80 = vmatprep.subr.mxu0 %v264_v0  ;;  %236 = vmatprep.subr.mxu1 %v264_v0 }
  0x18   :  { %81 = vmatpush1.msra.mxu0 %v28_v12  ;;  %254 = vmatpush1.msra.mxu1 %v28_v12 }
  0x19   :  { %82 = vmatprep.subr.mxu0 %v264_v0  ;;  %237 = vmatprep.subr.mxu1 %v264_v0 }
  0x1a   :  { %83 = vmatpush1.msra.mxu0 %v27_v13  ;;  %255 = vmatpush1.msra.mxu1 %v27_v13 }
  0x1b   :  { %84 = vmatprep.subr.mxu0 %v264_v0  ;;  %238 = vmatprep.subr.mxu1 %v264_v0 }
  0x1c   :  { %85 = vmatpush1.msra.mxu0 %v26_v14  ;;  %256 = vmatpush1.msra.mxu1 %v26_v14 }
  0x1d   :  { %86 = vmatprep.subr.mxu0 %v264_v0  ;;  %239 = vmatprep.subr.mxu1 %v264_v0 }
  0x1e   :  { %87 = vmatpush1.msra.mxu0 %v25_v15  ;;  %257 = vmatpush1.msra.mxu1 %v25_v15 }
  0x1f   :  { %88 = vmatprep.subr.mxu0 %v264_v0  ;;  %240 = vmatprep.subr.mxu1 %v264_v0 }
  0x20   :  { %89 = vmatpush1.msra.mxu0 %v24_v16  ;;  %258 = vmatpush1.msra.mxu1 %v24_v16 }
  0x21   :  { %118 = vmatprep.subr.mxu0 %v264_v0  ;;  %241 = vmatprep.subr.mxu1 %v264_v0 }
  0x22   :  { %119 = vmatpush2.msra.mxu0 %v41_v17  ;;  %259 = vmatpush2.msra.mxu1 %v41_v17 }
  0x23   :  { %120 = vmatprep.subr.mxu0 %v264_v0  ;;  %242 = vmatprep.subr.mxu1 %v264_v0 }
  0x24   :  { %121 = vmatpush2.msra.mxu0 %v40_v18  ;;  %260 = vmatpush2.msra.mxu1 %v40_v18 }
  0x25   :  { %219 = vmatprep.mubr.msk.f32.mxu0 %vm42_vm0, %v15_v19  ;;  %222 = vmatprep.mubr.msk.f32.mxu1 %vm42_vm0, %v21_v20 }
  0x26   :  { %123 = vmatmul.mubr.f32.vlgmr.msra.gmra.mxu0 %v14_v21  ;;  %138 = vmatmul.mubr.f32.vlgmr.msra.gmra.mxu1 %v20_v22 }
  0x27   :  { %220 = vmatprep.mubr.msk.f32.mxu0 %vm42_vm0, %v17_v23  ;;  %223 = vmatprep.mubr.msk.f32.mxu1 %vm42_vm0, %v23_v24 }
  0x2a   :  { %128 = vmatmul.mubr.f32.gmra.mxu0 %v16_v25  ;;  %143 = vmatmul.mubr.f32.gmra.mxu1 %v22_v26 }
  0x2b   :  { %221 = vmatprep.mubr.msk.f32.mxu0 %vm42_vm0, %v19_v27 }
  0x2e   :  { %133 = vmatmul.mubr.f32.gmra.mxu0 %v18_v28 }
  0xe6   :  { %v124_v29 = vpop.f32.mrf.mxu0  ;;  %v139_v30 = vpop.f32.mrf.mxu1 }
  0xe7   :  { %159 = vrot.lane.b32.xlu1 %v139_v30, %s265_s13  ;;  %153 = vrot.lane.b32.xlu0 %v124_v29, %s265_s13 }
  0xe8   :  { %v126_v31 = vpop.f32.mrf.mxu0  ;;  %v141_v32 = vpop.f32.mrf.mxu1 }
  0xea   :  { %v129_v33 = vpop.f32.mrf.mxu0  ;;  %v144_v34 = vpop.f32.mrf.mxu1 }
  0xeb   :  { %173 = vrot.lane.b32.xlu1 %v124_v29, %s266_s14  ;;  %155 = vrot.lane.b32.xlu0 %v129_v33, %s265_s13 }
  0xec   :  { %v131_v35 = vpop.f32.mrf.mxu0  ;;  %v146_v36 = vpop.f32.mrf.mxu1 }
  0xee   :  { %v134_v37 = vpop.f32.mrf.mxu0 }
  0xef   :  { %161 = vrot.lane.b32.xlu0 %v144_v34, %s265_s13  ;;  %157 = vrot.lane.b32.xlu1 %v134_v37, %s265_s13 }
  0xf0   :  { %v136_v38 = vpop.f32.mrf.mxu0 }
  0xf3   :  { %175 = vrot.lane.b32.xlu0 %v129_v33, %s266_s14  ;;  %177 = vrot.lane.b32.xlu1 %v134_v37, %s266_s14 }
  0xf7   :  { %179 = vrot.lane.b32.xlu0 %v139_v30, %s266_s14  ;;  %181 = vrot.lane.b32.xlu1 %v144_v34, %s266_s14 }
 0x159   :  { %v160_v39 = vpop.permute.xlu1 %159  ;;  %v154_v40 = vpop.permute.xlu0 %153 }
 0x15a   :  { %v168_v41 = vmax.f32 %v124_v29, %v154_v40  ;;  %v171_v56 = vmax.f32 %v139_v30, %v160_v39 }
 0x15d   :  { %v174_v43 = vpop.permute.xlu1 %173  ;;  %v156_v44 = vpop.permute.xlu0 %155 }
 0x15e   :  { %v188_v45 = vmax.f32 %v168_v41, %v174_v43  ;;  %v169_v50 = vmax.f32 %v129_v33, %v156_v44 }
 0x160   :  { %v200_v46 = vadd.f32 %v224_v42, %v188_v45 }
 0x161   :  { %v162_v47 = vpop.permute.xlu0 %161  ;;  %v158_v48 = vpop.permute.xlu1 %157 }
 0x162   :  { %v205_v49 = vmax.f32 %v200_v46, 0.0  ;;  %v170_v51 = vmax.f32 %v134_v37, %v158_v48  ;;  %v172_v57 = vmax.f32 %v144_v34, %v162_v47 }
 0x164   :  { %210 = vst.msk [vmem:[%s438_s3] sm:$0xff] %vm42_vm0, %v205_v49 }
 0x165   :  { %v176_v52 = vpop.permute.xlu0 %175  ;;  %v178_v53 = vpop.permute.xlu1 %177 }
 0x166   :  { %v189_v54 = vmax.f32 %v169_v50, %v176_v52  ;;  %v190_v55 = vmax.f32 %v170_v51, %v178_v53 }
 0x168   :  { %v201_v58 = vadd.f32 %v224_v42, %v189_v54  ;;  %v202_v59 = vadd.f32 %v224_v42, %v190_v55 }
 0x169   :  { %v180_v60 = vpop.permute.xlu0 %179  ;;  %v182_v61 = vpop.permute.xlu1 %181 }
 0x16a   :  { %v206_v62 = vmax.f32 %v201_v58, 0.0  ;;  %v207_v63 = vmax.f32 %v202_v59, 0.0  ;;  %v191_v0 = vmax.f32 %v171_v56, %v180_v60  ;;  %v192_v1 = vmax.f32 %v172_v57, %v182_v61 }
 0x16c   :  { %211 = vst.msk [vmem:[%s438_s3 + $0x8] sm:$0xff] %vm42_vm0, %v206_v62  ;;  %212 = vst.msk [vmem:[%s438_s3 + $0x10] sm:$0xff] %vm42_vm0, %v207_v63  ;;  %v203_v2 = vadd.f32 %v224_v42, %v191_v0  ;;  %v204_v3 = vadd.f32 %v224_v42, %v192_v1 }
 0x16e   :  { %v208_v4 = vmax.f32 %v203_v2, 0.0  ;;  %v209_v5 = vmax.f32 %v204_v3, 0.0 }
 0x170   :  { %213 = vst.msk [vmem:[%s438_s3 + $0x18] sm:$0xff] %vm42_vm0, %v208_v4  ;;  %214 = vst.msk [vmem:[%s438_s3 + $0x20] sm:$0xff] %vm42_vm0, %v209_v5 }

// kernel: _forward.8
= control target key start
LH: loop header
LB: loop body
LE: loop exit
PB: predicated region body
PF: predicated region fallthrough
CT: control target
= control target key end

     0   :  { %v136_v0 = vmov 0.0   ;;  %vm34_vm0 = vcmask 130048   ;;  %s137_s25 = smov 112   ;;  %s138_s26 = smov 96   ;;  %s227_s1 = inlined_call_operand.vmem [shape: f32[144,48], index: 1, kind: input, shape index: {}]   ;;  %s228_s0 = inlined_call_operand.vmem [shape: f32[8,144], index: 0, kind: input, shape index: {}]   ;;  %s229_s2 = inlined_call_operand.vmem [shape: f32[1,16], index: 2, kind: input, shape index: {}]   ;;  %s230_s3 = inlined_call_operand.vmem [shape: f32[8,16], index: 3, kind: output, shape index: {}]  }
   0x1   :  { %38 = vmatprep.subr.mxu0 %v136_v0  ;;  %v31_v1 = vld [vmem:[%s227_s1 + $0x78] sm:$0xff]  ;;  %v30_v2 = vld [vmem:[%s227_s1 + $0x70] sm:$0xff]  ;;  %v29_v3 = vld [vmem:[%s227_s1 + $0x68] sm:$0xff] }
   0x2   :  { %39 = vmatpush1.msra.mxu0 %v31_v1  ;;  %v28_v4 = vld [vmem:[%s227_s1 + $0x60] sm:$0xff]  ;;  %v27_v5 = vld [vmem:[%s227_s1 + $0x58] sm:$0xff]  ;;  %v15_v6 = vld [vmem:[%s228_s0 + $0x8] sm:$0xff] }
   0x3   :  { %40 = vmatprep.subr.mxu0 %v136_v0  ;;  %131 = vmatprep.mubr.msk.f32.mxu0 %vm34_vm0, %v15_v6  ;;  %v26_v7 = vld [vmem:[%s227_s1 + $0x50] sm:$0xff]  ;;  %v25_v8 = vld [vmem:[%s227_s1 + $0x48] sm:$0xff]  ;;  %v24_v9 = vld [vmem:[%s227_s1 + $0x40] sm:$0xff] }
   0x4   :  { %41 = vmatpush1.msra.mxu0 %v30_v2  ;;  %v23_v10 = vld [vmem:[%s227_s1 + $0x38] sm:$0xff]  ;;  %v22_v11 = vld [vmem:[%s227_s1 + $0x30] sm:$0xff]  ;;  %v21_v12 = vld [vmem:[%s227_s1 + $0x28] sm:$0xff] }
   0x5   :  { %42 = vmatprep.subr.mxu0 %v136_v0  ;;  %v20_v13 = vld [vmem:[%s227_s1 + $0x20] sm:$0xff]  ;;  %v19_v14 = vld [vmem:[%s227_s1 + $0x18] sm:$0xff]  ;;  %v18_v15 = vld [vmem:[%s227_s1 + $0x10] sm:$0xff] }
   0x6   :  { %43 = vmatpush1.msra.mxu0 %v29_v3  ;;  %v17_v16 = vld [vmem:[%s227_s1 + $0x8] sm:$0xff]  ;;  %v16_v17 = vld [vmem:[%s227_s1] sm:$0xff] }
   0x7   :  { %44 = vmatprep.subr.mxu0 %v136_v0  ;;  %v33_v18 = vld [vmem:[%s227_s1 + $0x88] sm:$0xff]  ;;  %v32_v19 = vld [vmem:[%s227_s1 + $0x80] sm:$0xff] }
   0x8   :  { %45 = vmatpush1.msra.mxu0 %v28_v4  ;;  %v14_v20 = vld [vmem:[%s228_s0] sm:$0xff] }
   0x9   :  { %46 = vmatprep.subr.mxu0 %v136_v0  ;;  %v132_v25 = vld [vmem:[%s229_s2] ss:$0 sm:$0xff] }
   0xa   :  { %47 = vmatpush1.msra.mxu0 %v27_v5 }
   0xb   :  { %48 = vmatprep.subr.mxu0 %v136_v0 }
   0xc   :  { %49 = vmatpush1.msra.mxu0 %v26_v7 }
   0xd   :  { %50 = vmatprep.subr.mxu0 %v136_v0 }
   0xe   :  { %51 = vmatpush1.msra.mxu0 %v25_v8 }
   0xf   :  { %52 = vmatprep.subr.mxu0 %v136_v0 }
  0x10   :  { %53 = vmatpush1.msra.mxu0 %v24_v9 }
  0x11   :  { %54 = vmatprep.subr.mxu0 %v136_v0 }
  0x12   :  { %55 = vmatpush1.msra.mxu0 %v23_v10 }
  0x13   :  { %56 = vmatprep.subr.mxu0 %v136_v0 }
  0x14   :  { %57 = vmatpush1.msra.mxu0 %v22_v11 }
  0x15   :  { %58 = vmatprep.subr.mxu0 %v136_v0 }
  0x16   :  { %59 = vmatpush1.msra.mxu0 %v21_v12 }
  0x17   :  { %60 = vmatprep.subr.mxu0 %v136_v0 }
  0x18   :  { %61 = vmatpush1.msra.mxu0 %v20_v13 }
  0x19   :  { %62 = vmatprep.subr.mxu0 %v136_v0 }
  0x1a   :  { %63 = vmatpush1.msra.mxu0 %v19_v14 }
  0x1b   :  { %64 = vmatprep.subr.mxu0 %v136_v0 }
  0x1c   :  { %65 = vmatpush1.msra.mxu0 %v18_v15 }
  0x1d   :  { %66 = vmatprep.subr.mxu0 %v136_v0 }
  0x1e   :  { %67 = vmatpush1.msra.mxu0 %v17_v16 }
  0x1f   :  { %68 = vmatprep.subr.mxu0 %v136_v0 }
  0x20   :  { %69 = vmatpush1.msra.mxu0 %v16_v17 }
  0x21   :  { %98 = vmatprep.subr.mxu0 %v136_v0 }
  0x22   :  { %99 = vmatpush2.msra.mxu0 %v33_v18 }
  0x23   :  { %100 = vmatprep.subr.mxu0 %v136_v0 }
  0x24   :  { %101 = vmatpush2.msra.mxu0 %v32_v19 }
  0x25   :  { %103 = vmatmul.mubr.f32.vlgmr.msra.gmra.mxu0 %v14_v20 }
  0xe5   :  { %v104_v21 = vpop.f32.mrf.mxu0 }
  0xe6   :  { %109 = vrot.lane.b32.xlu0 %v104_v21, %s137_s25 }
  0xe7   :  { %v106_v22 = vpop.f32.mrf.mxu0 }
  0xea   :  { %113 = vrot.lane.b32.xlu0 %v104_v21, %s138_s26 }
 0x158   :  { %v110_v23 = vpop.permute.xlu0 %109 }
 0x159   :  { %v112_v24 = vmax.f32 %v104_v21, %v110_v23 }
 0x15c   :  { %v114_v26 = vpop.permute.xlu0 %113 }
 0x15d   :  { %v116_v27 = vmax.f32 %v112_v24, %v114_v26 }
 0x15f   :  { %v124_v28 = vadd.f32 %v132_v25, %v116_v27 }
 0x161   :  { %v125_v29 = vmax.f32 %v124_v28, 0.0 }
 0x163   :  { %126 = vst.msk [vmem:[%s230_s3] sm:$0xff] %vm34_vm0, %v125_v29 }

// kernel: _forward.9
= control target key start
LH: loop header
LB: loop body
LE: loop exit
PB: predicated region body
PF: predicated region fallthrough
CT: control target
= control target key end

     0   :  { %v307_v4 = vmov 0.0   ;;  %vm46_vm0 = vcmask 392192   ;;  %s483_s0 = inlined_call_operand.vmem [shape: f32[2,48], index: 0, kind: input, shape index: {}]   ;;  %s484_s1 = inlined_call_operand.vmem [shape: f32[48,256], index: 1, kind: input, shape index: {}]   ;;  %s485_s2 = inlined_call_operand.vmem [shape: f32[1,256], index: 2, kind: input, shape index: {}]   ;;  %s486_s3 = inlined_call_operand.vmem [shape: f32[256,10], index: 3, kind: input, shape index: {}]   ;;  %s487_s4 = inlined_call_operand.vmem [shape: f32[1,10], index: 4, kind: input, shape index: {}]   ;;  %s488_s5 = inlined_call_operand.hbm [shape: f32[2,10], index: 5, kind: output, shape index: {}]  }
   0x1   :  { %v33_v0 = vld [vmem:[%s484_s1 + $0x58] sm:$0xff]  ;;  %v32_v1 = vld [vmem:[%s484_s1 + $0x50] sm:$0xff]  ;;  %v31_v2 = vld [vmem:[%s484_s1 + $0x48] sm:$0xff]  ;;  %114 = vmatprep.mubr.f32.mxu0 %v307_v4 }
   0x2   :  { %70 = vmatprep.subr.mxu0 %v33_v0  ;;  %v30_v3 = vld [vmem:[%s484_s1 + $0x40] sm:$0xff]  ;;  %v29_v5 = vld [vmem:[%s484_s1 + $0x38] sm:$0xff]  ;;  %v28_v6 = vld [vmem:[%s484_s1 + $0x30] sm:$0xff] }
   0x3   :  { %71 = vmatpush1.msra.mxu0 %v32_v1  ;;  %v27_v7 = vld [vmem:[%s484_s1 + $0x28] sm:$0xff]  ;;  %v152_v8 = vld [vmem:[%s486_s3 + $0xf8] sm:$0xff]  ;;  %v26_v10 = vld [vmem:[%s484_s1 + $0x20] sm:$0xff] }
   0x4   :  { %72 = vmatprep.subr.mxu0 %v31_v2  ;;  %v136_v9 = vld [vmem:[%s486_s3 + $0x78] sm:$0xff]  ;;  %248 = vmatprep.subr.mxu1 %v152_v8  ;;  %v151_v11 = vld [vmem:[%s486_s3 + $0xf0] sm:$0xff]  ;;  %v150_v14 = vld [vmem:[%s486_s3 + $0xe8] sm:$0xff] }
   0x5   :  { %73 = vmatpush1.msra.mxu0 %v30_v3  ;;  %v135_v12 = vld [vmem:[%s486_s3 + $0x70] sm:$0xff]  ;;  %v25_v13 = vld [vmem:[%s484_s1 + $0x18] sm:$0xff]  ;;  %249 = vmatpush3.msra.mxu1 %v136_v9  ;;  %v134_v16 = vld [vmem:[%s486_s3 + $0x68] sm:$0xff] }
   0x6   :  { %74 = vmatprep.subr.mxu0 %v29_v5  ;;  %v24_v15 = vld [vmem:[%s484_s1 + $0x10] sm:$0xff]  ;;  %250 = vmatprep.subr.mxu1 %v151_v11  ;;  %v23_v17 = vld [vmem:[%s484_s1 + $0x8] sm:$0xff]  ;;  %v149_v18 = vld [vmem:[%s486_s3 + $0xe0] sm:$0xff] }
   0x7   :  { %75 = vmatpush1.msra.mxu0 %v28_v6  ;;  %251 = vmatpush3.msra.mxu1 %v135_v12  ;;  %v22_v19 = vld [vmem:[%s484_s1] sm:$0xff]  ;;  %v148_v22 = vld [vmem:[%s486_s3 + $0xd8] sm:$0xff]  ;;  %v147_v24 = vld [vmem:[%s486_s3 + $0xd0] sm:$0xff] }
   0x8   :  { %76 = vmatprep.subr.mxu0 %v27_v7  ;;  %252 = vmatprep.subr.mxu1 %v150_v14  ;;  %v133_v20 = vld [vmem:[%s486_s3 + $0x60] sm:$0xff]  ;;  %v132_v23 = vld [vmem:[%s486_s3 + $0x58] sm:$0xff]  ;;  %v131_v25 = vld [vmem:[%s486_s3 + $0x50] sm:$0xff] }
   0x9   :  { %77 = vmatpush1.msra.mxu0 %v26_v10  ;;  %v21_v21 = vld [vmem:[%s483_s0] sm:$0x3]  ;;  %253 = vmatpush3.msra.mxu1 %v134_v16 }
   0xa   :  { %78 = vmatprep.subr.mxu0 %v25_v13  ;;  %254 = vmatprep.subr.mxu1 %v149_v18 }
   0xb   :  { %79 = vmatpush1.msra.mxu0 %v24_v15  ;;  %255 = vmatpush3.msra.mxu1 %v133_v20 }
   0xc   :  { %80 = vmatprep.subr.mxu0 %v23_v17  ;;  %256 = vmatprep.subr.mxu1 %v148_v22 }
   0xd   :  { %81 = vmatpush1.msra.mxu0 %v22_v19 }
   0xe   :  { %246 = vmatmul.mubr.msk.f32.vlgmr.msra.gmra.mxu0 %vm46_vm0, %v21_v21 }
   0xf   :  { %10 = vsyncpa [#allocation3], 0  ;;  %257 = vmatpush3.msra.mxu1 %v132_v23  ;;  %v146_v26 = vld [vmem:[%s486_s3 + $0xc8] sm:$0xff]  ;;  %v145_v28 = vld [vmem:[%s486_s3 + $0xc0] sm:$0xff]  ;;  %v36_v46 = vlaneseq  ;;  %s308_s7 = smov [#allocation2]   ;;  %vm230_vm1 = vcmask 74752  }
  0x10   :  { %258 = vmatprep.subr.mxu1 %v147_v24  ;;  %v130_v27 = vld [vmem:[%s486_s3 + $0x48] sm:$0xff]  ;;  %v129_v29 = vld [vmem:[%s486_s3 + $0x40] sm:$0xff]  ;;  %v144_v30 = vld [vmem:[%s486_s3 + $0xb8] sm:$0xff]  ;;  %s238_s8 = sshll.u32 %s308_s7, 4  ;;  %s239_s8 = int_to_ptr.vmem [resolvable:$true] %s238_s8 }
  0x11   :  { %259 = vmatpush3.msra.mxu1 %v131_v25  ;;  %v128_v31 = vld [vmem:[%s486_s3 + $0x38] sm:$0xff]  ;;  %v143_v32 = vld [vmem:[%s486_s3 + $0xb0] sm:$0xff]  ;;  %v142_v34 = vld [vmem:[%s486_s3 + $0xa8] sm:$0xff]  ;;  %v37_v47 = vshrl.u32 %v36_v46, 7  ;;  %p290_p1 = scmp.lt.s32.totalorder %s239_s8, %s239_s8 }
  0x12   :  { %260 = vmatprep.subr.mxu1 %v146_v26  ;;  %v127_v33 = vld [vmem:[%s486_s3 + $0x30] sm:$0xff]  ;;  %v126_v35 = vld [vmem:[%s486_s3 + $0x28] sm:$0xff]  ;;  %v141_v36 = vld [vmem:[%s486_s3 + $0xa0] sm:$0xff] }
  0x13   :  { %261 = vmatpush3.msra.mxu1 %v130_v27  ;;  %v125_v37 = vld [vmem:[%s486_s3 + $0x20] sm:$0xff]  ;;  %v140_v38 = vld [vmem:[%s486_s3 + $0x98] sm:$0xff]  ;;  %v139_v40 = vld [vmem:[%s486_s3 + $0x90] sm:$0xff]  ;;  %v42_v48 = vsub.s32 1, %v37_v47  ;;  %v38_v49 = vsub.s32 0, %v37_v47 }
  0x14   :  { %262 = vmatprep.subr.mxu1 %v145_v28  ;;  %v124_v39 = vld [vmem:[%s486_s3 + $0x18] sm:$0xff]  ;;  %v123_v41 = vld [vmem:[%s486_s3 + $0x10] sm:$0xff]  ;;  %v138_v42 = vld [vmem:[%s486_s3 + $0x88] sm:$0xff] }
  0x15   :  { %263 = vmatpush3.msra.mxu1 %v129_v29  ;;  %v122_v43 = vld [vmem:[%s486_s3 + $0x8] sm:$0xff]  ;;  %v137_v44 = vld [vmem:[%s486_s3 + $0x80] sm:$0xff] }
  0x16   :  { %264 = vmatprep.subr.mxu1 %v144_v30  ;;  %v121_v45 = vld [vmem:[%s486_s3] sm:$0xff] }
  0x17   :  { %265 = vmatpush3.msra.mxu1 %v128_v31  ;;  %v34_v50 = vld [vmem:[%s485_s2] sm:$0x3]  ;;  %s285_s2 = scalar_lea.vmem %s239_s8, 32 }
  0x18   :  { %266 = vmatprep.subr.mxu1 %v143_v32  ;;  %v43_v51 = vrot.slane %v34_v50, %v42_v48  ;;  %v39_v52 = vrot.slane %v34_v50, %v38_v49  ;;  %v247_v58 = vld [vmem:[%s487_s4] ss:$0 sm:$0xff]  ;;  %p286_p0 = scmp.ne.s32.totalorder %s239_s8, %s285_s2  ;;  %p291_p2 = scmp.lt.s32.totalorder %s285_s2, %s285_s2 }
  0x19   :  { %267 = vmatpush3.msra.mxu1 %v127_v33 }
  0x1a   :  { %268 = vmatprep.subr.mxu1 %v142_v34  ;;  %p292_p3 = por %p291_p2, %p290_p1 }
  0x1b   :  { %269 = vmatpush3.msra.mxu1 %v126_v35 }
  0x1c   :  { %270 = vmatprep.subr.mxu1 %v141_v36  ;;  %p293_p4 = pnand %p292_p3, %p286_p0 }
  0x1d   :  { %271 = vmatpush3.msra.mxu1 %v125_v37 }
  0x1e   :  { %272 = vmatprep.subr.mxu1 %v140_v38 }
  0x1f   :  { %273 = vmatpush3.msra.mxu1 %v124_v39 }
  0x20   :  { %274 = vmatprep.subr.mxu1 %v139_v40 }
  0x21   :  { %275 = vmatpush3.msra.mxu1 %v123_v41 }
  0x22   :  { %276 = vmatprep.subr.mxu1 %v138_v42 }
  0x23   :  { %277 = vmatpush3.msra.mxu1 %v122_v43 }
  0x24   :  { %278 = vmatprep.subr.mxu1 %v137_v44 }
  0x25   :  { %279 = vmatpush3.msra.mxu1 %v121_v45 }
  0xce   :  { %v116_v53 = vpop.f32.mrf.mxu0 }
  0xcf   :  { %v117_v56 = vadd.f32 %v116_v53, %v39_v52 }
  0xd0   :  { %v118_v54 = vpop.f32.mrf.mxu0 }
  0xd1   :  { %v119_v55 = vadd.f32 %v118_v54, %v43_v51 }
  0xd3   :  { %224 = vmatprep.mubr.f32.mxu1 %v119_v55 }
  0xd4   :  { %225 = vmatmul.mubr.f32.vlgmr.msra.gmra.mxu1 %v117_v56 }
 0x194   :  { %v280_v57 = vpop.f32.mrf.mxu1 }
 0x196   :  { %v281_v59 = vpop.f32.mrf.mxu1 }
 0x197   :  { %v282_v60 = vadd.f32 %v281_v59, %v280_v57 }
 0x199   :  { %v227_v61 = vadd.f32 %v282_v60, %v247_v58 }
 0x19b   :  { %231 = vst.msk [vmem:[#allocation2] sm:$0x3] %vm230_vm1, %v227_v61 }
 0x19c   :  { %296 = shalt.err (!%p293_p4)
}
 0x19d   :  { %241 = dma.vmem_to_hbm [thread:$0]  %s239_s8, 32, %s488_s5, [#allocation3]  }
 0x19e   :  { %305 = dma.done.wait [#allocation3], 32  }
 0x19f   :  { %306 = vsyncadd [#allocation3], 4294967264 }
 0x1a0   :  { %245 = vsyncpa [#allocation3], 1 }

</bundles_post_ra>
